<compile_context>
chip_gen: v5e
topology: v5e:2x2
jax: 0.10.0
libtpu: 0.0.40
codegen_flags: <defaults>
</compile_context>

<pallas_src>
import math
import jax
import jax.numpy as jnp
from jax.experimental import pallas as pl
from jax.experimental.pallas import tpu as pltpu

CPAD = 128   # lane-dense channel padding for every activation / GEMM output
EPS = 1e-5   # BatchNorm eps (PyTorch default)


# ------------------------------- Pallas kernels ------------------------------

def _gemm_stats_kernel(a_ref, b_ref, o_ref, sum_ref, sq_ref):
    """(TM,K)@(K,128) on the MXU + per-channel sum / sum-of-squares (BN stats)."""
    acc = jnp.dot(a_ref[...], b_ref[...], preferred_element_type=jnp.float32)
    o_ref[...] = acc

    @pl.when(pl.program_id(0) == 0)
    def _():
        sum_ref[...] = jnp.zeros_like(sum_ref)
        sq_ref[...] = jnp.zeros_like(sq_ref)

    sum_ref[...] += jnp.sum(acc, axis=0, keepdims=True)
    sq_ref[...] += jnp.sum(acc * acc, axis=0, keepdims=True)


def _scale_bias_relu_kernel(x_ref, s_ref, b_ref, o_ref):
    """Fused BatchNorm apply + ReLU: y = max(x*s + b, 0), bf16 out."""
    y = x_ref[...] * s_ref[...] + b_ref[...]
    o_ref[...] = jnp.maximum(y, 0.0).astype(o_ref.dtype)


def _bn_add_relu_kernel(z_ref, s2_ref, b2_ref, sc_ref, ssc_ref, bsc_ref, o_ref):
    """Fused bn2 + shortcut-BN + residual add + ReLU, bf16 out."""
    z = z_ref[...] * s2_ref[...] + b2_ref[...]
    sc = sc_ref[...].astype(jnp.float32) * ssc_ref[...] + bsc_ref[...]
    o_ref[...] = jnp.maximum(z + sc, 0.0).astype(o_ref.dtype)


# ------------------------------ Pallas wrappers -------------------------------

def _row_tiling(m):
    # tile rows at 128 when it divides evenly; otherwise one full-array block
    if m >= 256 and m % 128 == 0:
        return 128, m // 128
    return m, 1


def gemm_bn_stats(a, b):
    """a:(M,K) bf16, b:(K,128) bf16 -> (conv out f32 (M,128), (1,128) sum, (1,128) sumsq)."""
    M, K = a.shape
    N = b.shape[1]
    tm, gm = _row_tiling(M)
    return pl.pallas_call(
        _gemm_stats_kernel,
        out_shape=(jax.ShapeDtypeStruct((M, N), jnp.float32),
                   jax.ShapeDtypeStruct((1, N), jnp.float32),
                   jax.ShapeDtypeStruct((1, N), jnp.float32)),
        grid=(gm,),
        in_specs=[pl.BlockSpec((tm, K), lambda i: (i, 0)),
                  pl.BlockSpec((K, N), lambda i: (0, 0))],
        out_specs=(pl.BlockSpec((tm, N), lambda i: (i, 0)),
                   pl.BlockSpec((1, N), lambda i: (0, 0)),
                   pl.BlockSpec((1, N), lambda i: (0, 0))),
        compiler_params=pltpu.CompilerParams(
            dimension_semantics=("arbitrary",)),   # stats accumulate over row tiles
    )(a, b)


def scale_bias_relu(x, scale, bias):
    M, C = x.shape
    tm, gm = _row_tiling(M)
    return pl.pallas_call(
        _scale_bias_relu_kernel,
        out_shape=jax.ShapeDtypeStruct((M, C), jnp.bfloat16),
        grid=(gm,),
        in_specs=[pl.BlockSpec((tm, C), lambda i: (i, 0)),
                  pl.BlockSpec((1, C), lambda i: (0, 0)),
                  pl.BlockSpec((1, C), lambda i: (0, 0))],
        out_specs=pl.BlockSpec((tm, C), lambda i: (i, 0)),
        compiler_params=pltpu.CompilerParams(
            dimension_semantics=("parallel",)),
    )(x, scale, bias)


def bn_add_relu(z, s2, b2, sc, ssc, bsc):
    M, C = z.shape
    tm, gm = _row_tiling(M)
    return pl.pallas_call(
        _bn_add_relu_kernel,
        out_shape=jax.ShapeDtypeStruct((M, C), jnp.bfloat16),
        grid=(gm,),
        in_specs=[pl.BlockSpec((tm, C), lambda i: (i, 0)),
                  pl.BlockSpec((1, C), lambda i: (0, 0)),
                  pl.BlockSpec((1, C), lambda i: (0, 0)),
                  pl.BlockSpec((tm, C), lambda i: (i, 0)),
                  pl.BlockSpec((1, C), lambda i: (0, 0)),
                  pl.BlockSpec((1, C), lambda i: (0, 0))],
        out_specs=pl.BlockSpec((tm, C), lambda i: (i, 0)),
        compiler_params=pltpu.CompilerParams(
            dimension_semantics=("parallel",)),
    )(z, s2, b2, sc, ssc, bsc)


# --------------------------------- JAX glue -----------------------------------

def im2col_3x3(x, stride):
    """x: (N,H,W,CPAD) -> (N*Ho*Wo, 9*CPAD) bf16 im2col matrix (pad=1)."""
    N, H, W, C = x.shape
    Ho = (H + 2 - 3) // stride + 1
    Wo = (W + 2 - 3) // stride + 1
    xp = jnp.pad(x, ((0, 0), (1, 1), (1, 1), (0, 0)))
    taps = []
    for dy in range(3):
        for dx in range(3):
            taps.append(xp[:, dy:dy + stride * (Ho - 1) + 1:stride,
                           dx:dx + stride * (Wo - 1) + 1:stride, :])
    a = jnp.concatenate(taps, axis=-1).reshape(N * Ho * Wo, 9 * C)
    return a, (N, Ho, Wo)


def fold_bn(ssum, ssq, count, gamma_p, beta_p):
    """Train-mode BN (biased variance over N*H*W) folded to per-channel scale/bias."""
    mean = ssum / count
    var = jnp.maximum(ssq / count - mean * mean, 0.0)
    scale = gamma_p * jax.lax.rsqrt(var + EPS)    # gamma_p is zero in padded columns
    bias = beta_p - mean * scale
    return scale, bias


# ----------------------------- parameter packing ------------------------------

def conv_init(key, cout, cin, kh, kw):
    fan_in = cin * kh * kw
    return (jax.random.normal(key, (cout, cin, kh, kw), jnp.float32)
            * (1.0 / math.sqrt(fan_in)))


def pack_conv3x3(w, in_off, out_off):
    cout, cin = w.shape[0], w.shape[1]
    b = jnp.zeros((3, 3, CPAD, CPAD), jnp.float32)
    b = b.at[:, :, in_off:in_off + cin, out_off:out_off + cout].set(
        jnp.transpose(w, (2, 3, 1, 0)))
    return b.reshape(9 * CPAD, CPAD)


def pack_conv1x1_center(w, in_off, out_off):
    # 1x1/stride-s conv == centre tap of the 3x3/pad-1/stride-s im2col
    cout, cin = w.shape[0], w.shape[1]
    b = jnp.zeros((3, 3, CPAD, CPAD), jnp.float32)
    b = b.at[1, 1, in_off:in_off + cin, out_off:out_off + cout].set(
        jnp.transpose(w[:, :, 0, 0], (1, 0)))
    return b.reshape(9 * CPAD, CPAD)


def pack_vec(v, off):
    out = jnp.zeros((1, CPAD), jnp.float32)
    return out.at[0, off:off + v.shape[0]].set(v)


def make_basic_block(key, ci, co, stride):
    # merged conv1+shortcut GEMM needs both outputs inside one 128-lane tile
    assert 2 * co <= CPAD
    k1, k2, k3 = jax.random.split(key, 3)
    ds = (stride != 1) or (ci != co)
    c1_off = co if ds else 0                      # conv1 output column offset
    b1 = pack_conv3x3(conv_init(k1, co, ci, 3, 3), 0, c1_off)
    if ds:
        b1 = b1 + pack_conv1x1_center(conv_init(k3, co, ci, 1, 1), 0, 0)
    b2 = pack_conv3x3(conv_init(k2, co, co, 3, 3), c1_off, 0)
    p = {
        "B1": b1.astype(jnp.bfloat16),
        "B2": b2.astype(jnp.bfloat16),
        "g1": pack_vec(jnp.ones((co,), jnp.float32), c1_off),
        "b1": pack_vec(jnp.zeros((co,), jnp.float32), c1_off),
        "g2": pack_vec(jnp.ones((co,), jnp.float32), 0),
        "b2": pack_vec(jnp.zeros((co,), jnp.float32), 0),
    }
    if ds:
        p["gsc"] = pack_vec(jnp.ones((co,), jnp.float32), 0)
        p["bsc"] = pack_vec(jnp.zeros((co,), jnp.float32), 0)
    else:
        p["sc_one"] = pack_vec(jnp.ones((co,), jnp.float32), 0)
        p["sc_zero"] = jnp.zeros((1, CPAD), jnp.float32)
    cfg = dict(stride=stride, ci=ci, co=co, ds=ds, c1_off=c1_off)
    return p, cfg


def make_resnet(key, in_planes, num_blocks, in_ch):
    keys = jax.random.split(key, 1 + sum(num_blocks))
    params = {
        "Bstem": pack_conv3x3(conv_init(keys[0], in_planes, in_ch, 3, 3),
                              0, 0).astype(jnp.bfloat16),
        "g_stem": pack_vec(jnp.ones((in_planes,), jnp.float32), 0),
        "b_stem": pack_vec(jnp.zeros((in_planes,), jnp.float32), 0),
        "blocks": [],
    }
    cfgs = []
    cur, ki = in_planes, 1
    for nb, mult, s0 in zip(num_blocks, (1, 2, 4, 8), (1, 2, 2, 2)):
        planes = in_planes * mult
        for s in [s0] + [1] * (nb - 1):
            p, cfg = make_basic_block(keys[ki], cur, planes, s)
            params["blocks"].append(p)
            cfgs.append(cfg)
            cur = planes                         # BasicBlock.expansion == 1
            ki += 1
    return params, cfgs, cur


# ---------------------------------- forward -----------------------------------

def basic_block_forward(x4d, p, cfg):
    # conv1 (+ merged 1x1 shortcut when downsampling): one GEMM + BN stats
    a, (N, Ho, Wo) = im2col_3x3(x4d, cfg["stride"])
    count = float(a.shape[0])                    # N*Ho*Wo real rows
    u, s1, q1 = gemm_bn_stats(a, p["B1"])
    # bn1 + relu (zero scale/bias keeps shortcut / padding columns at 0)
    sc1, bi1 = fold_bn(s1, q1, count, p["g1"], p["b1"])
    y = scale_bias_relu(u, sc1, bi1).reshape(N, Ho, Wo, CPAD)
    # conv2: one GEMM + BN stats
    a2, _ = im2col_3x3(y, 1)
    z, s2, q2 = gemm_bn_stats(a2, p["B2"])
    sc2, bi2 = fold_bn(s2, q2, count, p["g2"], p["b2"])
    # bn2 + shortcut-BN + residual add + relu: one fused elementwise kernel
    if cfg["ds"]:
        scs, bis = fold_bn(s1, q1, count, p["gsc"], p["bsc"])
        sc_in = u                                # raw shortcut conv lives in cols [0:co]
    else:
        scs, bis = p["sc_one"], p["sc_zero"]
        sc_in = x4d.reshape(-1, CPAD)            # identity shortcut (bf16, post-ReLU)
    out = bn_add_relu(z, sc2, bi2, sc_in, scs, bis)
    return out.reshape(N, Ho, Wo, CPAD)


def resnet_forward(x_nchw, params, cfgs, c_final):
    # NCHW -> NHWC, pad channels once to the lane-dense width, bf16 for the MXU
    x = jnp.transpose(x_nchw, (0, 2, 3, 1)).astype(jnp.float32)
    x = jnp.pad(x, ((0, 0), (0, 0), (0, 0), (0, CPAD - x.shape[-1])))
    x = x.astype(jnp.bfloat16)
    # stem: conv1 -> bn1 -> relu   (one GEMM+stats call + one fused apply call)
    a, (N, Ho, Wo) = im2col_3x3(x, 1)
    u, s, q = gemm_bn_stats(a, params["Bstem"])
    sc, bi = fold_bn(s, q, float(a.shape[0]), params["g_stem"], params["b_stem"])
    x = scale_bias_relu(u, sc, bi).reshape(N, Ho, Wo, CPAD)
    # layer1..layer4
    for p, cfg in zip(params["blocks"], cfgs):
        x = basic_block_forward(x, p, cfg)
    # drop channel padding, back to NCHW f32 like the PyTorch module
    return jnp.transpose(x[..., :c_final].astype(jnp.float32), (0, 3, 1, 2))


# ------------------------------------ main -------------------------------------

if __name__ == "__main__":
    # ResNet(in_planes=8, block=BasicBlock, num_blocks=[1,1,1,1], in_ch=1, feat_dim='2d')
    # TODO(synk): `block` is a ctor argument of the PyTorch module; standard
    # BasicBlock (expansion == 1) semantics are implemented here.
    in_planes, num_blocks, in_ch = 8, [1, 1, 1, 1], 1

    key = jax.random.PRNGKey(0)
    kx, kp = jax.random.split(key)
    x = jax.random.normal(kx, (2, in_ch, 16, 16), jnp.float32)   # NCHW like PyTorch
    params, cfgs, c_final = make_resnet(kp, in_planes, num_blocks, in_ch)

    fwd = jax.jit(lambda inp: resnet_forward(inp, params, cfgs, c_final))
    out = jax.block_until_ready(fwd(x))
    assert out.shape == (2, in_planes * 8, 2, 2), out.shape
    assert bool(jnp.all(jnp.isfinite(out)))
    print("KERNEL_OK")
</pallas_src>

<mosaic_0001>
module attributes {stable_mosaic.version = 11 : i64} {
  func.func @_gemm_stats_kernel(%arg0: i32, %arg1: memref<128x1152xbf16, #tpu.memory_space<vmem>>, %arg2: memref<1152x128xbf16, #tpu.memory_space<vmem>>, %arg3: memref<128x128xf32, #tpu.memory_space<vmem>>, %arg4: memref<1x128xf32, #tpu.memory_space<vmem>>, %arg5: memref<1x128xf32, #tpu.memory_space<vmem>>) attributes {dimension_semantics = [#tpu.dimension_semantics<arbitrary>], iteration_bounds = array<i64: 4>, scalar_prefetch = 0 : i64, scratch_operands = 0 : i64, tpu.core_type = #tpu.core_type<tc>, window_params = [{transform_indices = @transform_0, window_bounds = array<i64: 128, 1152>}, {pipeline_mode = #tpu.pipeline_mode<synchronous>, transform_indices = @transform_1, window_bounds = array<i64: 1152, 128>}, {transform_indices = @transform_2, window_bounds = array<i64: 128, 128>}, {pipeline_mode = #tpu.pipeline_mode<synchronous>, transform_indices = @transform_3, window_bounds = array<i64: 1, 128>}, {pipeline_mode = #tpu.pipeline_mode<synchronous>, transform_indices = @transform_4, window_bounds = array<i64: 1, 128>}]} {
    %c0 = arith.constant 0 : index
    %c0_0 = arith.constant 0 : index
    %0 = vector.load %arg1[%c0, %c0_0] : memref<128x1152xbf16, #tpu.memory_space<vmem>>, vector<128x1152xbf16>
    %c0_1 = arith.constant 0 : index
    %c0_2 = arith.constant 0 : index
    %1 = vector.load %arg2[%c0_1, %c0_2] : memref<1152x128xbf16, #tpu.memory_space<vmem>>, vector<1152x128xbf16>
    %cst = arith.constant dense<0.000000e+00> : vector<128x128xf32>
    %2 = tpu.matmul %0, %1, %cst {dimension_numbers = #tpu.dot_dimension_numbers<[1], [0], [0], [1], [0, 0, 1, 1], [], []>} : vector<128x1152xbf16>, vector<1152x128xbf16>, vector<128x128xf32> -> vector<128x128xf32>
    %c0_3 = arith.constant 0 : index
    %c0_4 = arith.constant 0 : index
    %3 = vector.load %arg3[%c0_3, %c0_4] : memref<128x128xf32, #tpu.memory_space<vmem>>, vector<128x128xf32>
    tpu.vector_store %arg3[%c0_3, %c0_4], %2 {strides = array<i32>} : memref<128x128xf32, #tpu.memory_space<vmem>>, vector<128x128xf32>,
    %c0_i32 = arith.constant 0 : i32
    %4 = arith.cmpi eq, %arg0, %c0_i32 : i32
    %5 = arith.extui %4 : i1 to i32
    %c0_i32_5 = arith.constant 0 : i32
    %6 = arith.cmpi ne, %5, %c0_i32_5 : i32
    scf.if %6 {
      %cst_16 = arith.constant 0.000000e+00 : f32
      %18 = vector.broadcast %cst_16 : f32 to vector<1x128xf32>
      %c0_17 = arith.constant 0 : index
      %c0_18 = arith.constant 0 : index
      %19 = vector.load %arg4[%c0_17, %c0_18] : memref<1x128xf32, #tpu.memory_space<vmem>>, vector<1x128xf32>
      tpu.vector_store %arg4[%c0_17, %c0_18], %18 {strides = array<i32>} : memref<1x128xf32, #tpu.memory_space<vmem>>, vector<1x128xf32>,
      %cst_19 = arith.constant 0.000000e+00 : f32
      %20 = vector.broadcast %cst_19 : f32 to vector<1x128xf32>
      %c0_20 = arith.constant 0 : index
      %c0_21 = arith.constant 0 : index
      %21 = vector.load %arg5[%c0_20, %c0_21] : memref<1x128xf32, #tpu.memory_space<vmem>>, vector<1x128xf32>
      tpu.vector_store %arg5[%c0_20, %c0_21], %20 {strides = array<i32>} : memref<1x128xf32, #tpu.memory_space<vmem>>, vector<1x128xf32>,
    } else {
    }
    %c0_6 = arith.constant 0 : index
    %c0_7 = arith.constant 0 : index
    %7 = vector.load %arg4[%c0_6, %c0_7] : memref<1x128xf32, #tpu.memory_space<vmem>>, vector<1x128xf32>
    %cst_8 = arith.constant dense<0.000000e+00> : vector<128xf32>
    %8 = vector.multi_reduction <add>, %2, %cst_8 [0] : vector<128x128xf32> to vector<128xf32>
    %9 = vector.shape_cast %8 : vector<128xf32> to vector<1x128xf32>
    %10 = arith.addf %7, %9 : vector<1x128xf32>
    %c0_9 = arith.constant 0 : index
    %c0_10 = arith.constant 0 : index
    %11 = vector.load %arg4[%c0_9, %c0_10] : memref<1x128xf32, #tpu.memory_space<vmem>>, vector<1x128xf32>
    tpu.vector_store %arg4[%c0_9, %c0_10], %10 {strides = array<i32>} : memref<1x128xf32, #tpu.memory_space<vmem>>, vector<1x128xf32>,
    %c0_11 = arith.constant 0 : index
    %c0_12 = arith.constant 0 : index
    %12 = vector.load %arg5[%c0_11, %c0_12] : memref<1x128xf32, #tpu.memory_space<vmem>>, vector<1x128xf32>
    %13 = arith.mulf %2, %2 : vector<128x128xf32>
    %cst_13 = arith.constant dense<0.000000e+00> : vector<128xf32>
    %14 = vector.multi_reduction <add>, %13, %cst_13 [0] : vector<128x128xf32> to vector<128xf32>
    %15 = vector.shape_cast %14 : vector<128xf32> to vector<1x128xf32>
    %16 = arith.addf %12, %15 : vector<1x128xf32>
    %c0_14 = arith.constant 0 : index
    %c0_15 = arith.constant 0 : index
    %17 = vector.load %arg5[%c0_14, %c0_15] : memref<1x128xf32, #tpu.memory_space<vmem>>, vector<1x128xf32>
    tpu.vector_store %arg5[%c0_14, %c0_15], %16 {strides = array<i32>} : memref<1x128xf32, #tpu.memory_space<vmem>>, vector<1x128xf32>,
    return
  }
  func.func @transform_0(%arg0: i32) -> (i32, i32) {
    %c0_i32 = arith.constant 0 : i32
    %c0_i32_0 = arith.constant 0 : i32
    return %arg0, %c0_i32 : i32, i32
  }
  func.func @transform_1(%arg0: i32) -> (i32, i32) {
    %c0_i32 = arith.constant 0 : i32
    %c0_i32_0 = arith.constant 0 : i32
    %c0_i32_1 = arith.constant 0 : i32
    return %c0_i32, %c0_i32_0 : i32, i32
  }
  func.func @transform_2(%arg0: i32) -> (i32, i32) {
    %c0_i32 = arith.constant 0 : i32
    %c0_i32_0 = arith.constant 0 : i32
    return %arg0, %c0_i32 : i32, i32
  }
  func.func @transform_3(%arg0: i32) -> (i32, i32) {
    %c0_i32 = arith.constant 0 : i32
    %c0_i32_0 = arith.constant 0 : i32
    %c0_i32_1 = arith.constant 0 : i32
    return %c0_i32, %c0_i32_0 : i32, i32
  }
  func.func @transform_4(%arg0: i32) -> (i32, i32) {
    %c0_i32 = arith.constant 0 : i32
    %c0_i32_0 = arith.constant 0 : i32
    %c0_i32_1 = arith.constant 0 : i32
    return %c0_i32, %c0_i32_0 : i32, i32
  }
}

module attributes {stable_mosaic.version = 11 : i64} {
  func.func @_scale_bias_relu_kernel(%arg0: i32, %arg1: memref<128x128xf32, #tpu.memory_space<vmem>>, %arg2: memref<1x128xf32, #tpu.memory_space<vmem>>, %arg3: memref<1x128xf32, #tpu.memory_space<vmem>>, %arg4: memref<128x128xbf16, #tpu.memory_space<vmem>>) attributes {dimension_semantics = [#tpu.dimension_semantics<parallel>], iteration_bounds = array<i64: 4>, scalar_prefetch = 0 : i64, scratch_operands = 0 : i64, tpu.core_type = #tpu.core_type<tc>, window_params = [{transform_indices = @transform_0, window_bounds = array<i64: 128, 128>}, {pipeline_mode = #tpu.pipeline_mode<synchronous>, transform_indices = @transform_1, window_bounds = array<i64: 1, 128>}, {pipeline_mode = #tpu.pipeline_mode<synchronous>, transform_indices = @transform_2, window_bounds = array<i64: 1, 128>}, {transform_indices = @transform_3, window_bounds = array<i64: 128, 128>}]} {
    %c0 = arith.constant 0 : index
    %c0_0 = arith.constant 0 : index
    %0 = vector.load %arg1[%c0, %c0_0] : memref<128x128xf32, #tpu.memory_space<vmem>>, vector<128x128xf32>
    %c0_1 = arith.constant 0 : index
    %c0_2 = arith.constant 0 : index
    %1 = vector.load %arg2[%c0_1, %c0_2] : memref<1x128xf32, #tpu.memory_space<vmem>>, vector<1x128xf32>
    %2 = vector.broadcast %1 : vector<1x128xf32> to vector<128x128xf32>
    %3 = arith.mulf %0, %2 : vector<128x128xf32>
    %c0_3 = arith.constant 0 : index
    %c0_4 = arith.constant 0 : index
    %4 = vector.load %arg3[%c0_3, %c0_4] : memref<1x128xf32, #tpu.memory_space<vmem>>, vector<1x128xf32>
    %5 = vector.broadcast %4 : vector<1x128xf32> to vector<128x128xf32>
    %6 = arith.addf %3, %5 : vector<128x128xf32>
    %cst = arith.constant 0.000000e+00 : f32
    %7 = vector.broadcast %cst : f32 to vector<128x128xf32>
    %8 = arith.maximumf %6, %7 : vector<128x128xf32>
    %9 = arith.truncf %8 : vector<128x128xf32> to vector<128x128xbf16>
    %c0_5 = arith.constant 0 : index
    %c0_6 = arith.constant 0 : index
    %10 = vector.load %arg4[%c0_5, %c0_6] : memref<128x128xbf16, #tpu.memory_space<vmem>>, vector<128x128xbf16>
    tpu.vector_store %arg4[%c0_5, %c0_6], %9 {strides = array<i32>} : memref<128x128xbf16, #tpu.memory_space<vmem>>, vector<128x128xbf16>,
    return
  }
  func.func @transform_0(%arg0: i32) -> (i32, i32) {
    %c0_i32 = arith.constant 0 : i32
    %c0_i32_0 = arith.constant 0 : i32
    return %arg0, %c0_i32 : i32, i32
  }
  func.func @transform_1(%arg0: i32) -> (i32, i32) {
    %c0_i32 = arith.constant 0 : i32
    %c0_i32_0 = arith.constant 0 : i32
    %c0_i32_1 = arith.constant 0 : i32
    return %c0_i32, %c0_i32_0 : i32, i32
  }
  func.func @transform_2(%arg0: i32) -> (i32, i32) {
    %c0_i32 = arith.constant 0 : i32
    %c0_i32_0 = arith.constant 0 : i32
    %c0_i32_1 = arith.constant 0 : i32
    return %c0_i32, %c0_i32_0 : i32, i32
  }
  func.func @transform_3(%arg0: i32) -> (i32, i32) {
    %c0_i32 = arith.constant 0 : i32
    %c0_i32_0 = arith.constant 0 : i32
    return %arg0, %c0_i32 : i32, i32
  }
}

module attributes {stable_mosaic.version = 11 : i64} {
  func.func @_bn_add_relu_kernel(%arg0: i32, %arg1: memref<128x128xf32, #tpu.memory_space<vmem>>, %arg2: memref<1x128xf32, #tpu.memory_space<vmem>>, %arg3: memref<1x128xf32, #tpu.memory_space<vmem>>, %arg4: memref<128x128xbf16, #tpu.memory_space<vmem>>, %arg5: memref<1x128xf32, #tpu.memory_space<vmem>>, %arg6: memref<1x128xf32, #tpu.memory_space<vmem>>, %arg7: memref<128x128xbf16, #tpu.memory_space<vmem>>) attributes {dimension_semantics = [#tpu.dimension_semantics<parallel>], iteration_bounds = array<i64: 4>, scalar_prefetch = 0 : i64, scratch_operands = 0 : i64, tpu.core_type = #tpu.core_type<tc>, window_params = [{transform_indices = @transform_0, window_bounds = array<i64: 128, 128>}, {pipeline_mode = #tpu.pipeline_mode<synchronous>, transform_indices = @transform_1, window_bounds = array<i64: 1, 128>}, {pipeline_mode = #tpu.pipeline_mode<synchronous>, transform_indices = @transform_2, window_bounds = array<i64: 1, 128>}, {transform_indices = @transform_3, window_bounds = array<i64: 128, 128>}, {pipeline_mode = #tpu.pipeline_mode<synchronous>, transform_indices = @transform_4, window_bounds = array<i64: 1, 128>}, {pipeline_mode = #tpu.pipeline_mode<synchronous>, transform_indices = @transform_5, window_bounds = array<i64: 1, 128>}, {transform_indices = @transform_6, window_bounds = array<i64: 128, 128>}]} {
    %c0 = arith.constant 0 : index
    %c0_0 = arith.constant 0 : index
    %0 = vector.load %arg1[%c0, %c0_0] : memref<128x128xf32, #tpu.memory_space<vmem>>, vector<128x128xf32>
    %c0_1 = arith.constant 0 : index
    %c0_2 = arith.constant 0 : index
    %1 = vector.load %arg2[%c0_1, %c0_2] : memref<1x128xf32, #tpu.memory_space<vmem>>, vector<1x128xf32>
    %2 = vector.broadcast %1 : vector<1x128xf32> to vector<128x128xf32>
    %3 = arith.mulf %0, %2 : vector<128x128xf32>
    %c0_3 = arith.constant 0 : index
    %c0_4 = arith.constant 0 : index
    %4 = vector.load %arg3[%c0_3, %c0_4] : memref<1x128xf32, #tpu.memory_space<vmem>>, vector<1x128xf32>
    %5 = vector.broadcast %4 : vector<1x128xf32> to vector<128x128xf32>
    %6 = arith.addf %3, %5 : vector<128x128xf32>
    %c0_5 = arith.constant 0 : index
    %c0_6 = arith.constant 0 : index
    %7 = vector.load %arg4[%c0_5, %c0_6] : memref<128x128xbf16, #tpu.memory_space<vmem>>, vector<128x128xbf16>
    %8 = arith.extf %7 : vector<128x128xbf16> to vector<128x128xf32>
    %c0_7 = arith.constant 0 : index
    %c0_8 = arith.constant 0 : index
    %9 = vector.load %arg5[%c0_7, %c0_8] : memref<1x128xf32, #tpu.memory_space<vmem>>, vector<1x128xf32>
    %10 = vector.broadcast %9 : vector<1x128xf32> to vector<128x128xf32>
    %11 = arith.mulf %8, %10 : vector<128x128xf32>
    %c0_9 = arith.constant 0 : index
    %c0_10 = arith.constant 0 : index
    %12 = vector.load %arg6[%c0_9, %c0_10] : memref<1x128xf32, #tpu.memory_space<vmem>>, vector<1x128xf32>
    %13 = vector.broadcast %12 : vector<1x128xf32> to vector<128x128xf32>
    %14 = arith.addf %11, %13 : vector<128x128xf32>
    %15 = arith.addf %6, %14 : vector<128x128xf32>
    %cst = arith.constant 0.000000e+00 : f32
    %16 = vector.broadcast %cst : f32 to vector<128x128xf32>
    %17 = arith.maximumf %15, %16 : vector<128x128xf32>
    %18 = arith.truncf %17 : vector<128x128xf32> to vector<128x128xbf16>
    %c0_11 = arith.constant 0 : index
    %c0_12 = arith.constant 0 : index
    %19 = vector.load %arg7[%c0_11, %c0_12] : memref<128x128xbf16, #tpu.memory_space<vmem>>, vector<128x128xbf16>
    tpu.vector_store %arg7[%c0_11, %c0_12], %18 {strides = array<i32>} : memref<128x128xbf16, #tpu.memory_space<vmem>>, vector<128x128xbf16>,
    return
  }
  func.func @transform_0(%arg0: i32) -> (i32, i32) {
    %c0_i32 = arith.constant 0 : i32
    %c0_i32_0 = arith.constant 0 : i32
    return %arg0, %c0_i32 : i32, i32
  }
  func.func @transform_1(%arg0: i32) -> (i32, i32) {
    %c0_i32 = arith.constant 0 : i32
    %c0_i32_0 = arith.constant 0 : i32
    %c0_i32_1 = arith.constant 0 : i32
    return %c0_i32, %c0_i32_0 : i32, i32
  }
  func.func @transform_2(%arg0: i32) -> (i32, i32) {
    %c0_i32 = arith.constant 0 : i32
    %c0_i32_0 = arith.constant 0 : i32
    %c0_i32_1 = arith.constant 0 : i32
    return %c0_i32, %c0_i32_0 : i32, i32
  }
  func.func @transform_3(%arg0: i32) -> (i32, i32) {
    %c0_i32 = arith.constant 0 : i32
    %c0_i32_0 = arith.constant 0 : i32
    return %arg0, %c0_i32 : i32, i32
  }
  func.func @transform_4(%arg0: i32) -> (i32, i32) {
    %c0_i32 = arith.constant 0 : i32
    %c0_i32_0 = arith.constant 0 : i32
    %c0_i32_1 = arith.constant 0 : i32
    return %c0_i32, %c0_i32_0 : i32, i32
  }
  func.func @transform_5(%arg0: i32) -> (i32, i32) {
    %c0_i32 = arith.constant 0 : i32
    %c0_i32_0 = arith.constant 0 : i32
    %c0_i32_1 = arith.constant 0 : i32
    return %c0_i32, %c0_i32_0 : i32, i32
  }
  func.func @transform_6(%arg0: i32) -> (i32, i32) {
    %c0_i32 = arith.constant 0 : i32
    %c0_i32_0 = arith.constant 0 : i32
    return %arg0, %c0_i32 : i32, i32
  }
}

module attributes {stable_mosaic.version = 11 : i64} {
  func.func @_gemm_stats_kernel(%arg0: i32, %arg1: memref<128x1152xbf16, #tpu.memory_space<vmem>>, %arg2: memref<1152x128xbf16, #tpu.memory_space<vmem>>, %arg3: memref<128x128xf32, #tpu.memory_space<vmem>>, %arg4: memref<1x128xf32, #tpu.memory_space<vmem>>, %arg5: memref<1x128xf32, #tpu.memory_space<vmem>>) attributes {dimension_semantics = [#tpu.dimension_semantics<arbitrary>], iteration_bounds = array<i64: 1>, scalar_prefetch = 0 : i64, scratch_operands = 0 : i64, tpu.core_type = #tpu.core_type<tc>, window_params = [{transform_indices = @transform_0, window_bounds = array<i64: 128, 1152>}, {pipeline_mode = #tpu.pipeline_mode<synchronous>, transform_indices = @transform_1, window_bounds = array<i64: 1152, 128>}, {transform_indices = @transform_2, window_bounds = array<i64: 128, 128>}, {pipeline_mode = #tpu.pipeline_mode<synchronous>, transform_indices = @transform_3, window_bounds = array<i64: 1, 128>}, {pipeline_mode = #tpu.pipeline_mode<synchronous>, transform_indices = @transform_4, window_bounds = array<i64: 1, 128>}]} {
    %c0 = arith.constant 0 : index
    %c0_0 = arith.constant 0 : index
    %0 = vector.load %arg1[%c0, %c0_0] : memref<128x1152xbf16, #tpu.memory_space<vmem>>, vector<128x1152xbf16>
    %c0_1 = arith.constant 0 : index
    %c0_2 = arith.constant 0 : index
    %1 = vector.load %arg2[%c0_1, %c0_2] : memref<1152x128xbf16, #tpu.memory_space<vmem>>, vector<1152x128xbf16>
    %cst = arith.constant dense<0.000000e+00> : vector<128x128xf32>
    %2 = tpu.matmul %0, %1, %cst {dimension_numbers = #tpu.dot_dimension_numbers<[1], [0], [0], [1], [0, 0, 1, 1], [], []>} : vector<128x1152xbf16>, vector<1152x128xbf16>, vector<128x128xf32> -> vector<128x128xf32>
    %c0_3 = arith.constant 0 : index
    %c0_4 = arith.constant 0 : index
    %3 = vector.load %arg3[%c0_3, %c0_4] : memref<128x128xf32, #tpu.memory_space<vmem>>, vector<128x128xf32>
    tpu.vector_store %arg3[%c0_3, %c0_4], %2 {strides = array<i32>} : memref<128x128xf32, #tpu.memory_space<vmem>>, vector<128x128xf32>,
    %c0_i32 = arith.constant 0 : i32
    %4 = arith.cmpi eq, %arg0, %c0_i32 : i32
    %5 = arith.extui %4 : i1 to i32
    %c0_i32_5 = arith.constant 0 : i32
    %6 = arith.cmpi ne, %5, %c0_i32_5 : i32
    scf.if %6 {
      %cst_16 = arith.constant 0.000000e+00 : f32
      %18 = vector.broadcast %cst_16 : f32 to vector<1x128xf32>
      %c0_17 = arith.constant 0 : index
      %c0_18 = arith.constant 0 : index
      %19 = vector.load %arg4[%c0_17, %c0_18] : memref<1x128xf32, #tpu.memory_space<vmem>>, vector<1x128xf32>
      tpu.vector_store %arg4[%c0_17, %c0_18], %18 {strides = array<i32>} : memref<1x128xf32, #tpu.memory_space<vmem>>, vector<1x128xf32>,
      %cst_19 = arith.constant 0.000000e+00 : f32
      %20 = vector.broadcast %cst_19 : f32 to vector<1x128xf32>
      %c0_20 = arith.constant 0 : index
      %c0_21 = arith.constant 0 : index
      %21 = vector.load %arg5[%c0_20, %c0_21] : memref<1x128xf32, #tpu.memory_space<vmem>>, vector<1x128xf32>
      tpu.vector_store %arg5[%c0_20, %c0_21], %20 {strides = array<i32>} : memref<1x128xf32, #tpu.memory_space<vmem>>, vector<1x128xf32>,
    } else {
    }
    %c0_6 = arith.constant 0 : index
    %c0_7 = arith.constant 0 : index
    %7 = vector.load %arg4[%c0_6, %c0_7] : memref<1x128xf32, #tpu.memory_space<vmem>>, vector<1x128xf32>
    %cst_8 = arith.constant dense<0.000000e+00> : vector<128xf32>
    %8 = vector.multi_reduction <add>, %2, %cst_8 [0] : vector<128x128xf32> to vector<128xf32>
    %9 = vector.shape_cast %8 : vector<128xf32> to vector<1x128xf32>
    %10 = arith.addf %7, %9 : vector<1x128xf32>
    %c0_9 = arith.constant 0 : index
    %c0_10 = arith.constant 0 : index
    %11 = vector.load %arg4[%c0_9, %c0_10] : memref<1x128xf32, #tpu.memory_space<vmem>>, vector<1x128xf32>
    tpu.vector_store %arg4[%c0_9, %c0_10], %10 {strides = array<i32>} : memref<1x128xf32, #tpu.memory_space<vmem>>, vector<1x128xf32>,
    %c0_11 = arith.constant 0 : index
    %c0_12 = arith.constant 0 : index
    %12 = vector.load %arg5[%c0_11, %c0_12] : memref<1x128xf32, #tpu.memory_space<vmem>>, vector<1x128xf32>
    %13 = arith.mulf %2, %2 : vector<128x128xf32>
    %cst_13 = arith.constant dense<0.000000e+00> : vector<128xf32>
    %14 = vector.multi_reduction <add>, %13, %cst_13 [0] : vector<128x128xf32> to vector<128xf32>
    %15 = vector.shape_cast %14 : vector<128xf32> to vector<1x128xf32>
    %16 = arith.addf %12, %15 : vector<1x128xf32>
    %c0_14 = arith.constant 0 : index
    %c0_15 = arith.constant 0 : index
    %17 = vector.load %arg5[%c0_14, %c0_15] : memref<1x128xf32, #tpu.memory_space<vmem>>, vector<1x128xf32>
    tpu.vector_store %arg5[%c0_14, %c0_15], %16 {strides = array<i32>} : memref<1x128xf32, #tpu.memory_space<vmem>>, vector<1x128xf32>,
    return
  }
  func.func @transform_0(%arg0: i32) -> (i32, i32) {
    %c0_i32 = arith.constant 0 : i32
    %c0_i32_0 = arith.constant 0 : i32
    return %arg0, %c0_i32 : i32, i32
  }
  func.func @transform_1(%arg0: i32) -> (i32, i32) {
    %c0_i32 = arith.constant 0 : i32
    %c0_i32_0 = arith.constant 0 : i32
    %c0_i32_1 = arith.constant 0 : i32
    return %c0_i32, %c0_i32_0 : i32, i32
  }
  func.func @transform_2(%arg0: i32) -> (i32, i32) {
    %c0_i32 = arith.constant 0 : i32
    %c0_i32_0 = arith.constant 0 : i32
    return %arg0, %c0_i32 : i32, i32
  }
  func.func @transform_3(%arg0: i32) -> (i32, i32) {
    %c0_i32 = arith.constant 0 : i32
    %c0_i32_0 = arith.constant 0 : i32
    %c0_i32_1 = arith.constant 0 : i32
    return %c0_i32, %c0_i32_0 : i32, i32
  }
  func.func @transform_4(%arg0: i32) -> (i32, i32) {
    %c0_i32 = arith.constant 0 : i32
    %c0_i32_0 = arith.constant 0 : i32
    %c0_i32_1 = arith.constant 0 : i32
    return %c0_i32, %c0_i32_0 : i32, i32
  }
}

module attributes {stable_mosaic.version = 11 : i64} {
  func.func @_scale_bias_relu_kernel(%arg0: i32, %arg1: memref<128x128xf32, #tpu.memory_space<vmem>>, %arg2: memref<1x128xf32, #tpu.memory_space<vmem>>, %arg3: memref<1x128xf32, #tpu.memory_space<vmem>>, %arg4: memref<128x128xbf16, #tpu.memory_space<vmem>>) attributes {dimension_semantics = [#tpu.dimension_semantics<parallel>], iteration_bounds = array<i64: 1>, scalar_prefetch = 0 : i64, scratch_operands = 0 : i64, tpu.core_type = #tpu.core_type<tc>, window_params = [{transform_indices = @transform_0, window_bounds = array<i64: 128, 128>}, {pipeline_mode = #tpu.pipeline_mode<synchronous>, transform_indices = @transform_1, window_bounds = array<i64: 1, 128>}, {pipeline_mode = #tpu.pipeline_mode<synchronous>, transform_indices = @transform_2, window_bounds = array<i64: 1, 128>}, {transform_indices = @transform_3, window_bounds = array<i64: 128, 128>}]} {
    %c0 = arith.constant 0 : index
    %c0_0 = arith.constant 0 : index
    %0 = vector.load %arg1[%c0, %c0_0] : memref<128x128xf32, #tpu.memory_space<vmem>>, vector<128x128xf32>
    %c0_1 = arith.constant 0 : index
    %c0_2 = arith.constant 0 : index
    %1 = vector.load %arg2[%c0_1, %c0_2] : memref<1x128xf32, #tpu.memory_space<vmem>>, vector<1x128xf32>
    %2 = vector.broadcast %1 : vector<1x128xf32> to vector<128x128xf32>
    %3 = arith.mulf %0, %2 : vector<128x128xf32>
    %c0_3 = arith.constant 0 : index
    %c0_4 = arith.constant 0 : index
    %4 = vector.load %arg3[%c0_3, %c0_4] : memref<1x128xf32, #tpu.memory_space<vmem>>, vector<1x128xf32>
    %5 = vector.broadcast %4 : vector<1x128xf32> to vector<128x128xf32>
    %6 = arith.addf %3, %5 : vector<128x128xf32>
    %cst = arith.constant 0.000000e+00 : f32
    %7 = vector.broadcast %cst : f32 to vector<128x128xf32>
    %8 = arith.maximumf %6, %7 : vector<128x128xf32>
    %9 = arith.truncf %8 : vector<128x128xf32> to vector<128x128xbf16>
    %c0_5 = arith.constant 0 : index
    %c0_6 = arith.constant 0 : index
    %10 = vector.load %arg4[%c0_5, %c0_6] : memref<128x128xbf16, #tpu.memory_space<vmem>>, vector<128x128xbf16>
    tpu.vector_store %arg4[%c0_5, %c0_6], %9 {strides = array<i32>} : memref<128x128xbf16, #tpu.memory_space<vmem>>, vector<128x128xbf16>,
    return
  }
  func.func @transform_0(%arg0: i32) -> (i32, i32) {
    %c0_i32 = arith.constant 0 : i32
    %c0_i32_0 = arith.constant 0 : i32
    return %arg0, %c0_i32 : i32, i32
  }
  func.func @transform_1(%arg0: i32) -> (i32, i32) {
    %c0_i32 = arith.constant 0 : i32
    %c0_i32_0 = arith.constant 0 : i32
    %c0_i32_1 = arith.constant 0 : i32
    return %c0_i32, %c0_i32_0 : i32, i32
  }
  func.func @transform_2(%arg0: i32) -> (i32, i32) {
    %c0_i32 = arith.constant 0 : i32
    %c0_i32_0 = arith.constant 0 : i32
    %c0_i32_1 = arith.constant 0 : i32
    return %c0_i32, %c0_i32_0 : i32, i32
  }
  func.func @transform_3(%arg0: i32) -> (i32, i32) {
    %c0_i32 = arith.constant 0 : i32
    %c0_i32_0 = arith.constant 0 : i32
    return %arg0, %c0_i32 : i32, i32
  }
}

module attributes {stable_mosaic.version = 11 : i64} {
  func.func @_bn_add_relu_kernel(%arg0: i32, %arg1: memref<128x128xf32, #tpu.memory_space<vmem>>, %arg2: memref<1x128xf32, #tpu.memory_space<vmem>>, %arg3: memref<1x128xf32, #tpu.memory_space<vmem>>, %arg4: memref<128x128xf32, #tpu.memory_space<vmem>>, %arg5: memref<1x128xf32, #tpu.memory_space<vmem>>, %arg6: memref<1x128xf32, #tpu.memory_space<vmem>>, %arg7: memref<128x128xbf16, #tpu.memory_space<vmem>>) attributes {dimension_semantics = [#tpu.dimension_semantics<parallel>], iteration_bounds = array<i64: 1>, scalar_prefetch = 0 : i64, scratch_operands = 0 : i64, tpu.core_type = #tpu.core_type<tc>, window_params = [{transform_indices = @transform_0, window_bounds = array<i64: 128, 128>}, {pipeline_mode = #tpu.pipeline_mode<synchronous>, transform_indices = @transform_1, window_bounds = array<i64: 1, 128>}, {pipeline_mode = #tpu.pipeline_mode<synchronous>, transform_indices = @transform_2, window_bounds = array<i64: 1, 128>}, {transform_indices = @transform_3, window_bounds = array<i64: 128, 128>}, {pipeline_mode = #tpu.pipeline_mode<synchronous>, transform_indices = @transform_4, window_bounds = array<i64: 1, 128>}, {pipeline_mode = #tpu.pipeline_mode<synchronous>, transform_indices = @transform_5, window_bounds = array<i64: 1, 128>}, {transform_indices = @transform_6, window_bounds = array<i64: 128, 128>}]} {
    %c0 = arith.constant 0 : index
    %c0_0 = arith.constant 0 : index
    %0 = vector.load %arg1[%c0, %c0_0] : memref<128x128xf32, #tpu.memory_space<vmem>>, vector<128x128xf32>
    %c0_1 = arith.constant 0 : index
    %c0_2 = arith.constant 0 : index
    %1 = vector.load %arg2[%c0_1, %c0_2] : memref<1x128xf32, #tpu.memory_space<vmem>>, vector<1x128xf32>
    %2 = vector.broadcast %1 : vector<1x128xf32> to vector<128x128xf32>
    %3 = arith.mulf %0, %2 : vector<128x128xf32>
    %c0_3 = arith.constant 0 : index
    %c0_4 = arith.constant 0 : index
    %4 = vector.load %arg3[%c0_3, %c0_4] : memref<1x128xf32, #tpu.memory_space<vmem>>, vector<1x128xf32>
    %5 = vector.broadcast %4 : vector<1x128xf32> to vector<128x128xf32>
    %6 = arith.addf %3, %5 : vector<128x128xf32>
    %c0_5 = arith.constant 0 : index
    %c0_6 = arith.constant 0 : index
    %7 = vector.load %arg4[%c0_5, %c0_6] : memref<128x128xf32, #tpu.memory_space<vmem>>, vector<128x128xf32>
    %c0_7 = arith.constant 0 : index
    %c0_8 = arith.constant 0 : index
    %8 = vector.load %arg5[%c0_7, %c0_8] : memref<1x128xf32, #tpu.memory_space<vmem>>, vector<1x128xf32>
    %9 = vector.broadcast %8 : vector<1x128xf32> to vector<128x128xf32>
    %10 = arith.mulf %7, %9 : vector<128x128xf32>
    %c0_9 = arith.constant 0 : index
    %c0_10 = arith.constant 0 : index
    %11 = vector.load %arg6[%c0_9, %c0_10] : memref<1x128xf32, #tpu.memory_space<vmem>>, vector<1x128xf32>
    %12 = vector.broadcast %11 : vector<1x128xf32> to vector<128x128xf32>
    %13 = arith.addf %10, %12 : vector<128x128xf32>
    %14 = arith.addf %6, %13 : vector<128x128xf32>
    %cst = arith.constant 0.000000e+00 : f32
    %15 = vector.broadcast %cst : f32 to vector<128x128xf32>
    %16 = arith.maximumf %14, %15 : vector<128x128xf32>
    %17 = arith.truncf %16 : vector<128x128xf32> to vector<128x128xbf16>
    %c0_11 = arith.constant 0 : index
    %c0_12 = arith.constant 0 : index
    %18 = vector.load %arg7[%c0_11, %c0_12] : memref<128x128xbf16, #tpu.memory_space<vmem>>, vector<128x128xbf16>
    tpu.vector_store %arg7[%c0_11, %c0_12], %17 {strides = array<i32>} : memref<128x128xbf16, #tpu.memory_space<vmem>>, vector<128x128xbf16>,
    return
  }
  func.func @transform_0(%arg0: i32) -> (i32, i32) {
    %c0_i32 = arith.constant 0 : i32
    %c0_i32_0 = arith.constant 0 : i32
    return %arg0, %c0_i32 : i32, i32
  }
  func.func @transform_1(%arg0: i32) -> (i32, i32) {
    %c0_i32 = arith.constant 0 : i32
    %c0_i32_0 = arith.constant 0 : i32
    %c0_i32_1 = arith.constant 0 : i32
    return %c0_i32, %c0_i32_0 : i32, i32
  }
  func.func @transform_2(%arg0: i32) -> (i32, i32) {
    %c0_i32 = arith.constant 0 : i32
    %c0_i32_0 = arith.constant 0 : i32
    %c0_i32_1 = arith.constant 0 : i32
    return %c0_i32, %c0_i32_0 : i32, i32
  }
  func.func @transform_3(%arg0: i32) -> (i32, i32) {
    %c0_i32 = arith.constant 0 : i32
    %c0_i32_0 = arith.constant 0 : i32
    return %arg0, %c0_i32 : i32, i32
  }
  func.func @transform_4(%arg0: i32) -> (i32, i32) {
    %c0_i32 = arith.constant 0 : i32
    %c0_i32_0 = arith.constant 0 : i32
    %c0_i32_1 = arith.constant 0 : i32
    return %c0_i32, %c0_i32_0 : i32, i32
  }
  func.func @transform_5(%arg0: i32) -> (i32, i32) {
    %c0_i32 = arith.constant 0 : i32
    %c0_i32_0 = arith.constant 0 : i32
    %c0_i32_1 = arith.constant 0 : i32
    return %c0_i32, %c0_i32_0 : i32, i32
  }
  func.func @transform_6(%arg0: i32) -> (i32, i32) {
    %c0_i32 = arith.constant 0 : i32
    %c0_i32_0 = arith.constant 0 : i32
    return %arg0, %c0_i32 : i32, i32
  }
}

module attributes {stable_mosaic.version = 11 : i64} {
  func.func @_gemm_stats_kernel(%arg0: i32, %arg1: memref<32x1152xbf16, #tpu.memory_space<vmem>>, %arg2: memref<1152x128xbf16, #tpu.memory_space<vmem>>, %arg3: memref<32x128xf32, #tpu.memory_space<vmem>>, %arg4: memref<1x128xf32, #tpu.memory_space<vmem>>, %arg5: memref<1x128xf32, #tpu.memory_space<vmem>>) attributes {dimension_semantics = [#tpu.dimension_semantics<arbitrary>], iteration_bounds = array<i64: 1>, scalar_prefetch = 0 : i64, scratch_operands = 0 : i64, tpu.core_type = #tpu.core_type<tc>, window_params = [{transform_indices = @transform_0, window_bounds = array<i64: 32, 1152>}, {pipeline_mode = #tpu.pipeline_mode<synchronous>, transform_indices = @transform_1, window_bounds = array<i64: 1152, 128>}, {transform_indices = @transform_2, window_bounds = array<i64: 32, 128>}, {pipeline_mode = #tpu.pipeline_mode<synchronous>, transform_indices = @transform_3, window_bounds = array<i64: 1, 128>}, {pipeline_mode = #tpu.pipeline_mode<synchronous>, transform_indices = @transform_4, window_bounds = array<i64: 1, 128>}]} {
    %c0 = arith.constant 0 : index
    %c0_0 = arith.constant 0 : index
    %0 = vector.load %arg1[%c0, %c0_0] : memref<32x1152xbf16, #tpu.memory_space<vmem>>, vector<32x1152xbf16>
    %c0_1 = arith.constant 0 : index
    %c0_2 = arith.constant 0 : index
    %1 = vector.load %arg2[%c0_1, %c0_2] : memref<1152x128xbf16, #tpu.memory_space<vmem>>, vector<1152x128xbf16>
    %cst = arith.constant dense<0.000000e+00> : vector<32x128xf32>
    %2 = tpu.matmul %0, %1, %cst {dimension_numbers = #tpu.dot_dimension_numbers<[1], [0], [0], [1], [0, 0, 1, 1], [], []>} : vector<32x1152xbf16>, vector<1152x128xbf16>, vector<32x128xf32> -> vector<32x128xf32>
    %c0_3 = arith.constant 0 : index
    %c0_4 = arith.constant 0 : index
    %3 = vector.load %arg3[%c0_3, %c0_4] : memref<32x128xf32, #tpu.memory_space<vmem>>, vector<32x128xf32>
    tpu.vector_store %arg3[%c0_3, %c0_4], %2 {strides = array<i32>} : memref<32x128xf32, #tpu.memory_space<vmem>>, vector<32x128xf32>,
    %c0_i32 = arith.constant 0 : i32
    %4 = arith.cmpi eq, %arg0, %c0_i32 : i32
    %5 = arith.extui %4 : i1 to i32
    %c0_i32_5 = arith.constant 0 : i32
    %6 = arith.cmpi ne, %5, %c0_i32_5 : i32
    scf.if %6 {
      %cst_16 = arith.constant 0.000000e+00 : f32
      %18 = vector.broadcast %cst_16 : f32 to vector<1x128xf32>
      %c0_17 = arith.constant 0 : index
      %c0_18 = arith.constant 0 : index
      %19 = vector.load %arg4[%c0_17, %c0_18] : memref<1x128xf32, #tpu.memory_space<vmem>>, vector<1x128xf32>
      tpu.vector_store %arg4[%c0_17, %c0_18], %18 {strides = array<i32>} : memref<1x128xf32, #tpu.memory_space<vmem>>, vector<1x128xf32>,
      %cst_19 = arith.constant 0.000000e+00 : f32
      %20 = vector.broadcast %cst_19 : f32 to vector<1x128xf32>
      %c0_20 = arith.constant 0 : index
      %c0_21 = arith.constant 0 : index
      %21 = vector.load %arg5[%c0_20, %c0_21] : memref<1x128xf32, #tpu.memory_space<vmem>>, vector<1x128xf32>
      tpu.vector_store %arg5[%c0_20, %c0_21], %20 {strides = array<i32>} : memref<1x128xf32, #tpu.memory_space<vmem>>, vector<1x128xf32>,
    } else {
    }
    %c0_6 = arith.constant 0 : index
    %c0_7 = arith.constant 0 : index
    %7 = vector.load %arg4[%c0_6, %c0_7] : memref<1x128xf32, #tpu.memory_space<vmem>>, vector<1x128xf32>
    %cst_8 = arith.constant dense<0.000000e+00> : vector<128xf32>
    %8 = vector.multi_reduction <add>, %2, %cst_8 [0] : vector<32x128xf32> to vector<128xf32>
    %9 = vector.shape_cast %8 : vector<128xf32> to vector<1x128xf32>
    %10 = arith.addf %7, %9 : vector<1x128xf32>
    %c0_9 = arith.constant 0 : index
    %c0_10 = arith.constant 0 : index
    %11 = vector.load %arg4[%c0_9, %c0_10] : memref<1x128xf32, #tpu.memory_space<vmem>>, vector<1x128xf32>
    tpu.vector_store %arg4[%c0_9, %c0_10], %10 {strides = array<i32>} : memref<1x128xf32, #tpu.memory_space<vmem>>, vector<1x128xf32>,
    %c0_11 = arith.constant 0 : index
    %c0_12 = arith.constant 0 : index
    %12 = vector.load %arg5[%c0_11, %c0_12] : memref<1x128xf32, #tpu.memory_space<vmem>>, vector<1x128xf32>
    %13 = arith.mulf %2, %2 : vector<32x128xf32>
    %cst_13 = arith.constant dense<0.000000e+00> : vector<128xf32>
    %14 = vector.multi_reduction <add>, %13, %cst_13 [0] : vector<32x128xf32> to vector<128xf32>
    %15 = vector.shape_cast %14 : vector<128xf32> to vector<1x128xf32>
    %16 = arith.addf %12, %15 : vector<1x128xf32>
    %c0_14 = arith.constant 0 : index
    %c0_15 = arith.constant 0 : index
    %17 = vector.load %arg5[%c0_14, %c0_15] : memref<1x128xf32, #tpu.memory_space<vmem>>, vector<1x128xf32>
    tpu.vector_store %arg5[%c0_14, %c0_15], %16 {strides = array<i32>} : memref<1x128xf32, #tpu.memory_space<vmem>>, vector<1x128xf32>,
    return
  }
  func.func @transform_0(%arg0: i32) -> (i32, i32) {
    %c0_i32 = arith.constant 0 : i32
    %c0_i32_0 = arith.constant 0 : i32
    return %arg0, %c0_i32 : i32, i32
  }
  func.func @transform_1(%arg0: i32) -> (i32, i32) {
    %c0_i32 = arith.constant 0 : i32
    %c0_i32_0 = arith.constant 0 : i32
    %c0_i32_1 = arith.constant 0 : i32
    return %c0_i32, %c0_i32_0 : i32, i32
  }
  func.func @transform_2(%arg0: i32) -> (i32, i32) {
    %c0_i32 = arith.constant 0 : i32
    %c0_i32_0 = arith.constant 0 : i32
    return %arg0, %c0_i32 : i32, i32
  }
  func.func @transform_3(%arg0: i32) -> (i32, i32) {
    %c0_i32 = arith.constant 0 : i32
    %c0_i32_0 = arith.constant 0 : i32
    %c0_i32_1 = arith.constant 0 : i32
    return %c0_i32, %c0_i32_0 : i32, i32
  }
  func.func @transform_4(%arg0: i32) -> (i32, i32) {
    %c0_i32 = arith.constant 0 : i32
    %c0_i32_0 = arith.constant 0 : i32
    %c0_i32_1 = arith.constant 0 : i32
    return %c0_i32, %c0_i32_0 : i32, i32
  }
}

module attributes {stable_mosaic.version = 11 : i64} {
  func.func @_scale_bias_relu_kernel(%arg0: i32, %arg1: memref<32x128xf32, #tpu.memory_space<vmem>>, %arg2: memref<1x128xf32, #tpu.memory_space<vmem>>, %arg3: memref<1x128xf32, #tpu.memory_space<vmem>>, %arg4: memref<32x128xbf16, #tpu.memory_space<vmem>>) attributes {dimension_semantics = [#tpu.dimension_semantics<parallel>], iteration_bounds = array<i64: 1>, scalar_prefetch = 0 : i64, scratch_operands = 0 : i64, tpu.core_type = #tpu.core_type<tc>, window_params = [{transform_indices = @transform_0, window_bounds = array<i64: 32, 128>}, {pipeline_mode = #tpu.pipeline_mode<synchronous>, transform_indices = @transform_1, window_bounds = array<i64: 1, 128>}, {pipeline_mode = #tpu.pipeline_mode<synchronous>, transform_indices = @transform_2, window_bounds = array<i64: 1, 128>}, {transform_indices = @transform_3, window_bounds = array<i64: 32, 128>}]} {
    %c0 = arith.constant 0 : index
    %c0_0 = arith.constant 0 : index
    %0 = vector.load %arg1[%c0, %c0_0] : memref<32x128xf32, #tpu.memory_space<vmem>>, vector<32x128xf32>
    %c0_1 = arith.constant 0 : index
    %c0_2 = arith.constant 0 : index
    %1 = vector.load %arg2[%c0_1, %c0_2] : memref<1x128xf32, #tpu.memory_space<vmem>>, vector<1x128xf32>
    %2 = vector.broadcast %1 : vector<1x128xf32> to vector<32x128xf32>
    %3 = arith.mulf %0, %2 : vector<32x128xf32>
    %c0_3 = arith.constant 0 : index
    %c0_4 = arith.constant 0 : index
    %4 = vector.load %arg3[%c0_3, %c0_4] : memref<1x128xf32, #tpu.memory_space<vmem>>, vector<1x128xf32>
    %5 = vector.broadcast %4 : vector<1x128xf32> to vector<32x128xf32>
    %6 = arith.addf %3, %5 : vector<32x128xf32>
    %cst = arith.constant 0.000000e+00 : f32
    %7 = vector.broadcast %cst : f32 to vector<32x128xf32>
    %8 = arith.maximumf %6, %7 : vector<32x128xf32>
    %9 = arith.truncf %8 : vector<32x128xf32> to vector<32x128xbf16>
    %c0_5 = arith.constant 0 : index
    %c0_6 = arith.constant 0 : index
    %10 = vector.load %arg4[%c0_5, %c0_6] : memref<32x128xbf16, #tpu.memory_space<vmem>>, vector<32x128xbf16>
    tpu.vector_store %arg4[%c0_5, %c0_6], %9 {strides = array<i32>} : memref<32x128xbf16, #tpu.memory_space<vmem>>, vector<32x128xbf16>,
    return
  }
  func.func @transform_0(%arg0: i32) -> (i32, i32) {
    %c0_i32 = arith.constant 0 : i32
    %c0_i32_0 = arith.constant 0 : i32
    return %arg0, %c0_i32 : i32, i32
  }
  func.func @transform_1(%arg0: i32) -> (i32, i32) {
    %c0_i32 = arith.constant 0 : i32
    %c0_i32_0 = arith.constant 0 : i32
    %c0_i32_1 = arith.constant 0 : i32
    return %c0_i32, %c0_i32_0 : i32, i32
  }
  func.func @transform_2(%arg0: i32) -> (i32, i32) {
    %c0_i32 = arith.constant 0 : i32
    %c0_i32_0 = arith.constant 0 : i32
    %c0_i32_1 = arith.constant 0 : i32
    return %c0_i32, %c0_i32_0 : i32, i32
  }
  func.func @transform_3(%arg0: i32) -> (i32, i32) {
    %c0_i32 = arith.constant 0 : i32
    %c0_i32_0 = arith.constant 0 : i32
    return %arg0, %c0_i32 : i32, i32
  }
}

module attributes {stable_mosaic.version = 11 : i64} {
  func.func @_bn_add_relu_kernel(%arg0: i32, %arg1: memref<32x128xf32, #tpu.memory_space<vmem>>, %arg2: memref<1x128xf32, #tpu.memory_space<vmem>>, %arg3: memref<1x128xf32, #tpu.memory_space<vmem>>, %arg4: memref<32x128xf32, #tpu.memory_space<vmem>>, %arg5: memref<1x128xf32, #tpu.memory_space<vmem>>, %arg6: memref<1x128xf32, #tpu.memory_space<vmem>>, %arg7: memref<32x128xbf16, #tpu.memory_space<vmem>>) attributes {dimension_semantics = [#tpu.dimension_semantics<parallel>], iteration_bounds = array<i64: 1>, scalar_prefetch = 0 : i64, scratch_operands = 0 : i64, tpu.core_type = #tpu.core_type<tc>, window_params = [{transform_indices = @transform_0, window_bounds = array<i64: 32, 128>}, {pipeline_mode = #tpu.pipeline_mode<synchronous>, transform_indices = @transform_1, window_bounds = array<i64: 1, 128>}, {pipeline_mode = #tpu.pipeline_mode<synchronous>, transform_indices = @transform_2, window_bounds = array<i64: 1, 128>}, {transform_indices = @transform_3, window_bounds = array<i64: 32, 128>}, {pipeline_mode = #tpu.pipeline_mode<synchronous>, transform_indices = @transform_4, window_bounds = array<i64: 1, 128>}, {pipeline_mode = #tpu.pipeline_mode<synchronous>, transform_indices = @transform_5, window_bounds = array<i64: 1, 128>}, {transform_indices = @transform_6, window_bounds = array<i64: 32, 128>}]} {
    %c0 = arith.constant 0 : index
    %c0_0 = arith.constant 0 : index
    %0 = vector.load %arg1[%c0, %c0_0] : memref<32x128xf32, #tpu.memory_space<vmem>>, vector<32x128xf32>
    %c0_1 = arith.constant 0 : index
    %c0_2 = arith.constant 0 : index
    %1 = vector.load %arg2[%c0_1, %c0_2] : memref<1x128xf32, #tpu.memory_space<vmem>>, vector<1x128xf32>
    %2 = vector.broadcast %1 : vector<1x128xf32> to vector<32x128xf32>
    %3 = arith.mulf %0, %2 : vector<32x128xf32>
    %c0_3 = arith.constant 0 : index
    %c0_4 = arith.constant 0 : index
    %4 = vector.load %arg3[%c0_3, %c0_4] : memref<1x128xf32, #tpu.memory_space<vmem>>, vector<1x128xf32>
    %5 = vector.broadcast %4 : vector<1x128xf32> to vector<32x128xf32>
    %6 = arith.addf %3, %5 : vector<32x128xf32>
    %c0_5 = arith.constant 0 : index
    %c0_6 = arith.constant 0 : index
    %7 = vector.load %arg4[%c0_5, %c0_6] : memref<32x128xf32, #tpu.memory_space<vmem>>, vector<32x128xf32>
    %c0_7 = arith.constant 0 : index
    %c0_8 = arith.constant 0 : index
    %8 = vector.load %arg5[%c0_7, %c0_8] : memref<1x128xf32, #tpu.memory_space<vmem>>, vector<1x128xf32>
    %9 = vector.broadcast %8 : vector<1x128xf32> to vector<32x128xf32>
    %10 = arith.mulf %7, %9 : vector<32x128xf32>
    %c0_9 = arith.constant 0 : index
    %c0_10 = arith.constant 0 : index
    %11 = vector.load %arg6[%c0_9, %c0_10] : memref<1x128xf32, #tpu.memory_space<vmem>>, vector<1x128xf32>
    %12 = vector.broadcast %11 : vector<1x128xf32> to vector<32x128xf32>
    %13 = arith.addf %10, %12 : vector<32x128xf32>
    %14 = arith.addf %6, %13 : vector<32x128xf32>
    %cst = arith.constant 0.000000e+00 : f32
    %15 = vector.broadcast %cst : f32 to vector<32x128xf32>
    %16 = arith.maximumf %14, %15 : vector<32x128xf32>
    %17 = arith.truncf %16 : vector<32x128xf32> to vector<32x128xbf16>
    %c0_11 = arith.constant 0 : index
    %c0_12 = arith.constant 0 : index
    %18 = vector.load %arg7[%c0_11, %c0_12] : memref<32x128xbf16, #tpu.memory_space<vmem>>, vector<32x128xbf16>
    tpu.vector_store %arg7[%c0_11, %c0_12], %17 {strides = array<i32>} : memref<32x128xbf16, #tpu.memory_space<vmem>>, vector<32x128xbf16>,
    return
  }
  func.func @transform_0(%arg0: i32) -> (i32, i32) {
    %c0_i32 = arith.constant 0 : i32
    %c0_i32_0 = arith.constant 0 : i32
    return %arg0, %c0_i32 : i32, i32
  }
  func.func @transform_1(%arg0: i32) -> (i32, i32) {
    %c0_i32 = arith.constant 0 : i32
    %c0_i32_0 = arith.constant 0 : i32
    %c0_i32_1 = arith.constant 0 : i32
    return %c0_i32, %c0_i32_0 : i32, i32
  }
  func.func @transform_2(%arg0: i32) -> (i32, i32) {
    %c0_i32 = arith.constant 0 : i32
    %c0_i32_0 = arith.constant 0 : i32
    %c0_i32_1 = arith.constant 0 : i32
    return %c0_i32, %c0_i32_0 : i32, i32
  }
  func.func @transform_3(%arg0: i32) -> (i32, i32) {
    %c0_i32 = arith.constant 0 : i32
    %c0_i32_0 = arith.constant 0 : i32
    return %arg0, %c0_i32 : i32, i32
  }
  func.func @transform_4(%arg0: i32) -> (i32, i32) {
    %c0_i32 = arith.constant 0 : i32
    %c0_i32_0 = arith.constant 0 : i32
    %c0_i32_1 = arith.constant 0 : i32
    return %c0_i32, %c0_i32_0 : i32, i32
  }
  func.func @transform_5(%arg0: i32) -> (i32, i32) {
    %c0_i32 = arith.constant 0 : i32
    %c0_i32_0 = arith.constant 0 : i32
    %c0_i32_1 = arith.constant 0 : i32
    return %c0_i32, %c0_i32_0 : i32, i32
  }
  func.func @transform_6(%arg0: i32) -> (i32, i32) {
    %c0_i32 = arith.constant 0 : i32
    %c0_i32_0 = arith.constant 0 : i32
    return %arg0, %c0_i32 : i32, i32
  }
}

module attributes {stable_mosaic.version = 11 : i64} {
  func.func @_gemm_stats_kernel(%arg0: i32, %arg1: memref<8x1152xbf16, #tpu.memory_space<vmem>>, %arg2: memref<1152x128xbf16, #tpu.memory_space<vmem>>, %arg3: memref<8x128xf32, #tpu.memory_space<vmem>>, %arg4: memref<1x128xf32, #tpu.memory_space<vmem>>, %arg5: memref<1x128xf32, #tpu.memory_space<vmem>>) attributes {dimension_semantics = [#tpu.dimension_semantics<arbitrary>], iteration_bounds = array<i64: 1>, scalar_prefetch = 0 : i64, scratch_operands = 0 : i64, tpu.core_type = #tpu.core_type<tc>, window_params = [{transform_indices = @transform_0, window_bounds = array<i64: 8, 1152>}, {pipeline_mode = #tpu.pipeline_mode<synchronous>, transform_indices = @transform_1, window_bounds = array<i64: 1152, 128>}, {transform_indices = @transform_2, window_bounds = array<i64: 8, 128>}, {pipeline_mode = #tpu.pipeline_mode<synchronous>, transform_indices = @transform_3, window_bounds = array<i64: 1, 128>}, {pipeline_mode = #tpu.pipeline_mode<synchronous>, transform_indices = @transform_4, window_bounds = array<i64: 1, 128>}]} {
    %c0 = arith.constant 0 : index
    %c0_0 = arith.constant 0 : index
    %0 = vector.load %arg1[%c0, %c0_0] : memref<8x1152xbf16, #tpu.memory_space<vmem>>, vector<8x1152xbf16>
    %c0_1 = arith.constant 0 : index
    %c0_2 = arith.constant 0 : index
    %1 = vector.load %arg2[%c0_1, %c0_2] : memref<1152x128xbf16, #tpu.memory_space<vmem>>, vector<1152x128xbf16>
    %cst = arith.constant dense<0.000000e+00> : vector<8x128xf32>
    %2 = tpu.matmul %0, %1, %cst {dimension_numbers = #tpu.dot_dimension_numbers<[1], [0], [0], [1], [0, 0, 1, 1], [], []>} : vector<8x1152xbf16>, vector<1152x128xbf16>, vector<8x128xf32> -> vector<8x128xf32>
    %c0_3 = arith.constant 0 : index
    %c0_4 = arith.constant 0 : index
    %3 = vector.load %arg3[%c0_3, %c0_4] : memref<8x128xf32, #tpu.memory_space<vmem>>, vector<8x128xf32>
    tpu.vector_store %arg3[%c0_3, %c0_4], %2 {strides = array<i32>} : memref<8x128xf32, #tpu.memory_space<vmem>>, vector<8x128xf32>,
    %c0_i32 = arith.constant 0 : i32
    %4 = arith.cmpi eq, %arg0, %c0_i32 : i32
    %5 = arith.extui %4 : i1 to i32
    %c0_i32_5 = arith.constant 0 : i32
    %6 = arith.cmpi ne, %5, %c0_i32_5 : i32
    scf.if %6 {
      %cst_16 = arith.constant 0.000000e+00 : f32
      %18 = vector.broadcast %cst_16 : f32 to vector<1x128xf32>
      %c0_17 = arith.constant 0 : index
      %c0_18 = arith.constant 0 : index
      %19 = vector.load %arg4[%c0_17, %c0_18] : memref<1x128xf32, #tpu.memory_space<vmem>>, vector<1x128xf32>
      tpu.vector_store %arg4[%c0_17, %c0_18], %18 {strides = array<i32>} : memref<1x128xf32, #tpu.memory_space<vmem>>, vector<1x128xf32>,
      %cst_19 = arith.constant 0.000000e+00 : f32
      %20 = vector.broadcast %cst_19 : f32 to vector<1x128xf32>
      %c0_20 = arith.constant 0 : index
      %c0_21 = arith.constant 0 : index
      %21 = vector.load %arg5[%c0_20, %c0_21] : memref<1x128xf32, #tpu.memory_space<vmem>>, vector<1x128xf32>
      tpu.vector_store %arg5[%c0_20, %c0_21], %20 {strides = array<i32>} : memref<1x128xf32, #tpu.memory_space<vmem>>, vector<1x128xf32>,
    } else {
    }
    %c0_6 = arith.constant 0 : index
    %c0_7 = arith.constant 0 : index
    %7 = vector.load %arg4[%c0_6, %c0_7] : memref<1x128xf32, #tpu.memory_space<vmem>>, vector<1x128xf32>
    %cst_8 = arith.constant dense<0.000000e+00> : vector<128xf32>
    %8 = vector.multi_reduction <add>, %2, %cst_8 [0] : vector<8x128xf32> to vector<128xf32>
    %9 = vector.shape_cast %8 : vector<128xf32> to vector<1x128xf32>
    %10 = arith.addf %7, %9 : vector<1x128xf32>
    %c0_9 = arith.constant 0 : index
    %c0_10 = arith.constant 0 : index
    %11 = vector.load %arg4[%c0_9, %c0_10] : memref<1x128xf32, #tpu.memory_space<vmem>>, vector<1x128xf32>
    tpu.vector_store %arg4[%c0_9, %c0_10], %10 {strides = array<i32>} : memref<1x128xf32, #tpu.memory_space<vmem>>, vector<1x128xf32>,
    %c0_11 = arith.constant 0 : index
    %c0_12 = arith.constant 0 : index
    %12 = vector.load %arg5[%c0_11, %c0_12] : memref<1x128xf32, #tpu.memory_space<vmem>>, vector<1x128xf32>
    %13 = arith.mulf %2, %2 : vector<8x128xf32>
    %cst_13 = arith.constant dense<0.000000e+00> : vector<128xf32>
    %14 = vector.multi_reduction <add>, %13, %cst_13 [0] : vector<8x128xf32> to vector<128xf32>
    %15 = vector.shape_cast %14 : vector<128xf32> to vector<1x128xf32>
    %16 = arith.addf %12, %15 : vector<1x128xf32>
    %c0_14 = arith.constant 0 : index
    %c0_15 = arith.constant 0 : index
    %17 = vector.load %arg5[%c0_14, %c0_15] : memref<1x128xf32, #tpu.memory_space<vmem>>, vector<1x128xf32>
    tpu.vector_store %arg5[%c0_14, %c0_15], %16 {strides = array<i32>} : memref<1x128xf32, #tpu.memory_space<vmem>>, vector<1x128xf32>,
    return
  }
  func.func @transform_0(%arg0: i32) -> (i32, i32) {
    %c0_i32 = arith.constant 0 : i32
    %c0_i32_0 = arith.constant 0 : i32
    return %arg0, %c0_i32 : i32, i32
  }
  func.func @transform_1(%arg0: i32) -> (i32, i32) {
    %c0_i32 = arith.constant 0 : i32
    %c0_i32_0 = arith.constant 0 : i32
    %c0_i32_1 = arith.constant 0 : i32
    return %c0_i32, %c0_i32_0 : i32, i32
  }
  func.func @transform_2(%arg0: i32) -> (i32, i32) {
    %c0_i32 = arith.constant 0 : i32
    %c0_i32_0 = arith.constant 0 : i32
    return %arg0, %c0_i32 : i32, i32
  }
  func.func @transform_3(%arg0: i32) -> (i32, i32) {
    %c0_i32 = arith.constant 0 : i32
    %c0_i32_0 = arith.constant 0 : i32
    %c0_i32_1 = arith.constant 0 : i32
    return %c0_i32, %c0_i32_0 : i32, i32
  }
  func.func @transform_4(%arg0: i32) -> (i32, i32) {
    %c0_i32 = arith.constant 0 : i32
    %c0_i32_0 = arith.constant 0 : i32
    %c0_i32_1 = arith.constant 0 : i32
    return %c0_i32, %c0_i32_0 : i32, i32
  }
}

module attributes {stable_mosaic.version = 11 : i64} {
  func.func @_scale_bias_relu_kernel(%arg0: i32, %arg1: memref<8x128xf32, #tpu.memory_space<vmem>>, %arg2: memref<1x128xf32, #tpu.memory_space<vmem>>, %arg3: memref<1x128xf32, #tpu.memory_space<vmem>>, %arg4: memref<8x128xbf16, #tpu.memory_space<vmem>>) attributes {dimension_semantics = [#tpu.dimension_semantics<parallel>], iteration_bounds = array<i64: 1>, scalar_prefetch = 0 : i64, scratch_operands = 0 : i64, tpu.core_type = #tpu.core_type<tc>, window_params = [{transform_indices = @transform_0, window_bounds = array<i64: 8, 128>}, {pipeline_mode = #tpu.pipeline_mode<synchronous>, transform_indices = @transform_1, window_bounds = array<i64: 1, 128>}, {pipeline_mode = #tpu.pipeline_mode<synchronous>, transform_indices = @transform_2, window_bounds = array<i64: 1, 128>}, {transform_indices = @transform_3, window_bounds = array<i64: 8, 128>}]} {
    %c0 = arith.constant 0 : index
    %c0_0 = arith.constant 0 : index
    %0 = vector.load %arg1[%c0, %c0_0] : memref<8x128xf32, #tpu.memory_space<vmem>>, vector<8x128xf32>
    %c0_1 = arith.constant 0 : index
    %c0_2 = arith.constant 0 : index
    %1 = vector.load %arg2[%c0_1, %c0_2] : memref<1x128xf32, #tpu.memory_space<vmem>>, vector<1x128xf32>
    %2 = vector.broadcast %1 : vector<1x128xf32> to vector<8x128xf32>
    %3 = arith.mulf %0, %2 : vector<8x128xf32>
    %c0_3 = arith.constant 0 : index
    %c0_4 = arith.constant 0 : index
    %4 = vector.load %arg3[%c0_3, %c0_4] : memref<1x128xf32, #tpu.memory_space<vmem>>, vector<1x128xf32>
    %5 = vector.broadcast %4 : vector<1x128xf32> to vector<8x128xf32>
    %6 = arith.addf %3, %5 : vector<8x128xf32>
    %cst = arith.constant 0.000000e+00 : f32
    %7 = vector.broadcast %cst : f32 to vector<8x128xf32>
    %8 = arith.maximumf %6, %7 : vector<8x128xf32>
    %9 = arith.truncf %8 : vector<8x128xf32> to vector<8x128xbf16>
    %c0_5 = arith.constant 0 : index
    %c0_6 = arith.constant 0 : index
    %10 = vector.load %arg4[%c0_5, %c0_6] : memref<8x128xbf16, #tpu.memory_space<vmem>>, vector<8x128xbf16>
    tpu.vector_store %arg4[%c0_5, %c0_6], %9 {strides = array<i32>} : memref<8x128xbf16, #tpu.memory_space<vmem>>, vector<8x128xbf16>,
    return
  }
  func.func @transform_0(%arg0: i32) -> (i32, i32) {
    %c0_i32 = arith.constant 0 : i32
    %c0_i32_0 = arith.constant 0 : i32
    return %arg0, %c0_i32 : i32, i32
  }
  func.func @transform_1(%arg0: i32) -> (i32, i32) {
    %c0_i32 = arith.constant 0 : i32
    %c0_i32_0 = arith.constant 0 : i32
    %c0_i32_1 = arith.constant 0 : i32
    return %c0_i32, %c0_i32_0 : i32, i32
  }
  func.func @transform_2(%arg0: i32) -> (i32, i32) {
    %c0_i32 = arith.constant 0 : i32
    %c0_i32_0 = arith.constant 0 : i32
    %c0_i32_1 = arith.constant 0 : i32
    return %c0_i32, %c0_i32_0 : i32, i32
  }
  func.func @transform_3(%arg0: i32) -> (i32, i32) {
    %c0_i32 = arith.constant 0 : i32
    %c0_i32_0 = arith.constant 0 : i32
    return %arg0, %c0_i32 : i32, i32
  }
}

module attributes {stable_mosaic.version = 11 : i64} {
  func.func @_bn_add_relu_kernel(%arg0: i32, %arg1: memref<8x128xf32, #tpu.memory_space<vmem>>, %arg2: memref<1x128xf32, #tpu.memory_space<vmem>>, %arg3: memref<1x128xf32, #tpu.memory_space<vmem>>, %arg4: memref<8x128xf32, #tpu.memory_space<vmem>>, %arg5: memref<1x128xf32, #tpu.memory_space<vmem>>, %arg6: memref<1x128xf32, #tpu.memory_space<vmem>>, %arg7: memref<8x128xbf16, #tpu.memory_space<vmem>>) attributes {dimension_semantics = [#tpu.dimension_semantics<parallel>], iteration_bounds = array<i64: 1>, scalar_prefetch = 0 : i64, scratch_operands = 0 : i64, tpu.core_type = #tpu.core_type<tc>, window_params = [{transform_indices = @transform_0, window_bounds = array<i64: 8, 128>}, {pipeline_mode = #tpu.pipeline_mode<synchronous>, transform_indices = @transform_1, window_bounds = array<i64: 1, 128>}, {pipeline_mode = #tpu.pipeline_mode<synchronous>, transform_indices = @transform_2, window_bounds = array<i64: 1, 128>}, {transform_indices = @transform_3, window_bounds = array<i64: 8, 128>}, {pipeline_mode = #tpu.pipeline_mode<synchronous>, transform_indices = @transform_4, window_bounds = array<i64: 1, 128>}, {pipeline_mode = #tpu.pipeline_mode<synchronous>, transform_indices = @transform_5, window_bounds = array<i64: 1, 128>}, {transform_indices = @transform_6, window_bounds = array<i64: 8, 128>}]} {
    %c0 = arith.constant 0 : index
    %c0_0 = arith.constant 0 : index
    %0 = vector.load %arg1[%c0, %c0_0] : memref<8x128xf32, #tpu.memory_space<vmem>>, vector<8x128xf32>
    %c0_1 = arith.constant 0 : index
    %c0_2 = arith.constant 0 : index
    %1 = vector.load %arg2[%c0_1, %c0_2] : memref<1x128xf32, #tpu.memory_space<vmem>>, vector<1x128xf32>
    %2 = vector.broadcast %1 : vector<1x128xf32> to vector<8x128xf32>
    %3 = arith.mulf %0, %2 : vector<8x128xf32>
    %c0_3 = arith.constant 0 : index
    %c0_4 = arith.constant 0 : index
    %4 = vector.load %arg3[%c0_3, %c0_4] : memref<1x128xf32, #tpu.memory_space<vmem>>, vector<1x128xf32>
    %5 = vector.broadcast %4 : vector<1x128xf32> to vector<8x128xf32>
    %6 = arith.addf %3, %5 : vector<8x128xf32>
    %c0_5 = arith.constant 0 : index
    %c0_6 = arith.constant 0 : index
    %7 = vector.load %arg4[%c0_5, %c0_6] : memref<8x128xf32, #tpu.memory_space<vmem>>, vector<8x128xf32>
    %c0_7 = arith.constant 0 : index
    %c0_8 = arith.constant 0 : index
    %8 = vector.load %arg5[%c0_7, %c0_8] : memref<1x128xf32, #tpu.memory_space<vmem>>, vector<1x128xf32>
    %9 = vector.broadcast %8 : vector<1x128xf32> to vector<8x128xf32>
    %10 = arith.mulf %7, %9 : vector<8x128xf32>
    %c0_9 = arith.constant 0 : index
    %c0_10 = arith.constant 0 : index
    %11 = vector.load %arg6[%c0_9, %c0_10] : memref<1x128xf32, #tpu.memory_space<vmem>>, vector<1x128xf32>
    %12 = vector.broadcast %11 : vector<1x128xf32> to vector<8x128xf32>
    %13 = arith.addf %10, %12 : vector<8x128xf32>
    %14 = arith.addf %6, %13 : vector<8x128xf32>
    %cst = arith.constant 0.000000e+00 : f32
    %15 = vector.broadcast %cst : f32 to vector<8x128xf32>
    %16 = arith.maximumf %14, %15 : vector<8x128xf32>
    %17 = arith.truncf %16 : vector<8x128xf32> to vector<8x128xbf16>
    %c0_11 = arith.constant 0 : index
    %c0_12 = arith.constant 0 : index
    %18 = vector.load %arg7[%c0_11, %c0_12] : memref<8x128xbf16, #tpu.memory_space<vmem>>, vector<8x128xbf16>
    tpu.vector_store %arg7[%c0_11, %c0_12], %17 {strides = array<i32>} : memref<8x128xbf16, #tpu.memory_space<vmem>>, vector<8x128xbf16>,
    return
  }
  func.func @transform_0(%arg0: i32) -> (i32, i32) {
    %c0_i32 = arith.constant 0 : i32
    %c0_i32_0 = arith.constant 0 : i32
    return %arg0, %c0_i32 : i32, i32
  }
  func.func @transform_1(%arg0: i32) -> (i32, i32) {
    %c0_i32 = arith.constant 0 : i32
    %c0_i32_0 = arith.constant 0 : i32
    %c0_i32_1 = arith.constant 0 : i32
    return %c0_i32, %c0_i32_0 : i32, i32
  }
  func.func @transform_2(%arg0: i32) -> (i32, i32) {
    %c0_i32 = arith.constant 0 : i32
    %c0_i32_0 = arith.constant 0 : i32
    %c0_i32_1 = arith.constant 0 : i32
    return %c0_i32, %c0_i32_0 : i32, i32
  }
  func.func @transform_3(%arg0: i32) -> (i32, i32) {
    %c0_i32 = arith.constant 0 : i32
    %c0_i32_0 = arith.constant 0 : i32
    return %arg0, %c0_i32 : i32, i32
  }
  func.func @transform_4(%arg0: i32) -> (i32, i32) {
    %c0_i32 = arith.constant 0 : i32
    %c0_i32_0 = arith.constant 0 : i32
    %c0_i32_1 = arith.constant 0 : i32
    return %c0_i32, %c0_i32_0 : i32, i32
  }
  func.func @transform_5(%arg0: i32) -> (i32, i32) {
    %c0_i32 = arith.constant 0 : i32
    %c0_i32_0 = arith.constant 0 : i32
    %c0_i32_1 = arith.constant 0 : i32
    return %c0_i32, %c0_i32_0 : i32, i32
  }
  func.func @transform_6(%arg0: i32) -> (i32, i32) {
    %c0_i32 = arith.constant 0 : i32
    %c0_i32_0 = arith.constant 0 : i32
    return %arg0, %c0_i32 : i32, i32
  }
}

</mosaic_0001>

<bundles_post_ra>
// kernel: _lambda_.19
= control target key start
LH: loop header
LB: loop body
LE: loop exit
PB: predicated region body
PF: predicated region fallthrough
CT: control target
= control target key end

     0   :  { %s430_s12 = smov 0   ;;  %s521_s0 = inlined_call_operand.vmem [shape: f32[512,128], index: 0, kind: input, shape index: {}]   ;;  %s522_s1 = inlined_call_operand.vmem [shape: f32[1,128], index: 1, kind: input, shape index: {}]   ;;  %s523_s2 = inlined_call_operand.vmem [shape: f32[1,128], index: 2, kind: input, shape index: {}]   ;;  %s524_s3 = inlined_call_operand.vmem [shape: bf16[512,128], index: 3, kind: output, shape index: {}]  }
   0x1 LB: > { %s334_s13 = sadd.s32 4294967295, %s408_s12   ;;  %p338_p0 = scmp.ge.s32.totalorder %s408_s12, 1  ;;  %s408_s12 = sphi %s430_s12, %s13_s12  }
   0x2   : > { %p138_p1 = scmp.lt.s32.totalorder %s408_s12, 5 }
   0x4   : > { %p139_p2 = pnand %p338_p0, %p138_p1 }
   0x5   : > { %s339_s14 = sshll.u32 (!%p139_p2), %s334_s13, 4 }
   0x6   : > { %142 = sbr.rel (%p139_p2) target bundleno = 35 (0x23), region = 32  ;;  %p163_p3 = scmp.lt.s32.totalorder (!%p139_p2), %s339_s14, 63 }
   0xb   : > { %s526_s14 = smov (!%p163_p3, %s339_s14), 63  ;;  %v443_v0 = vld [vmem:[%s522_s1] ss:$0 sm:$0xff] }
   0xc   : > { %s340_s17 = sshll.u32 %s526_s14, 3  ;;  %v454_v1 = vld [vmem:[%s523_s2] ss:$0 sm:$0xff]  ;;  %s342_s23 = sshll.u32 %s526_s14, 2 }
   0xd   : > { %s449_s20 = scalar_lea.vmem %s521_s0, %s340_s17  ;;  %s486_s26 = scalar_lea.vmem %s524_s3, %s342_s23 }
   0xe   : > { %v174_v2 = vld [vmem:[%s449_s20] sm:$0xff]  ;;  %v175_v3 = vld [vmem:[%s449_s20 + $0x8] sm:$0xff]  ;;  %v176_v4 = vld [vmem:[%s449_s20 + $0x10] sm:$0xff] }
   0xf   : > { %v194_v5 = vmul.f32 %v443_v0, %v174_v2  ;;  %v195_v6 = vmul.f32 %v443_v0, %v175_v3  ;;  %v177_v7 = vld [vmem:[%s449_s20 + $0x18] sm:$0xff]  ;;  %v196_v8 = vmul.f32 %v443_v0, %v176_v4  ;;  %v178_v9 = vld [vmem:[%s449_s20 + $0x20] sm:$0xff]  ;;  %v179_v10 = vld [vmem:[%s449_s20 + $0x28] sm:$0xff] }
  0x10   : > { %v197_v11 = vmul.f32 %v443_v0, %v177_v7  ;;  %v198_v12 = vmul.f32 %v443_v0, %v178_v9  ;;  %v199_v13 = vmul.f32 %v443_v0, %v179_v10  ;;  %v180_v14 = vld [vmem:[%s449_s20 + $0x30] sm:$0xff]  ;;  %v181_v15 = vld [vmem:[%s449_s20 + $0x38] sm:$0xff]  ;;  %v182_v24 = vld [vmem:[%s449_s20 + $0x40] sm:$0xff] }
  0x11   : > { %v214_v16 = vadd.f32 %v454_v1, %v194_v5  ;;  %v215_v17 = vadd.f32 %v454_v1, %v195_v6  ;;  %v216_v18 = vadd.f32 %v454_v1, %v196_v8  ;;  %v200_v19 = vmul.f32 %v443_v0, %v180_v14  ;;  %v183_v25 = vld [vmem:[%s449_s20 + $0x48] sm:$0xff]  ;;  %v184_v30 = vld [vmem:[%s449_s20 + $0x50] sm:$0xff]  ;;  %v185_v35 = vld [vmem:[%s449_s20 + $0x58] sm:$0xff] }
  0x12   : > { %v217_v20 = vadd.f32 %v454_v1, %v197_v11  ;;  %v218_v21 = vadd.f32 %v454_v1, %v198_v12  ;;  %v219_v22 = vadd.f32 %v454_v1, %v199_v13  ;;  %v201_v23 = vmul.f32 %v443_v0, %v181_v15  ;;  %v186_v36 = vld [vmem:[%s449_s20 + $0x60] sm:$0xff]  ;;  %v187_v41 = vld [vmem:[%s449_s20 + $0x68] sm:$0xff]  ;;  %v188_v42 = vld [vmem:[%s449_s20 + $0x70] sm:$0xff] }
  0x13   : > { %v230_v26 = vmax.f32 %v214_v16, 0.0  ;;  %v231_v27 = vmax.f32 %v215_v17, 0.0  ;;  %v232_v28 = vmax.f32 %v216_v18, 0.0  ;;  %v220_v29 = vadd.f32 %v454_v1, %v200_v19  ;;  %v189_v51 = vld [vmem:[%s449_s20 + $0x78] sm:$0xff] }
  0x14   : > { %v233_v31 = vmax.f32 %v217_v20, 0.0  ;;  %v234_v32 = vmax.f32 %v218_v21, 0.0  ;;  %v235_v33 = vmax.f32 %v219_v22, 0.0  ;;  %v221_v34 = vadd.f32 %v454_v1, %v201_v23 }
  0x15   : > { %v348_v37 = vpack.c.bf16 %v231_v27, %v230_v26  ;;  %v236_v38 = vmax.f32 %v220_v29, 0.0  ;;  %v202_v39 = vmul.f32 %v443_v0, %v182_v24  ;;  %v203_v40 = vmul.f32 %v443_v0, %v183_v25 }
  0x16   : > { %v353_v43 = vpack.c.bf16 %v233_v31, %v232_v28  ;;  %v358_v44 = vpack.c.bf16 %v235_v33, %v234_v32  ;;  %v237_v45 = vmax.f32 %v221_v34, 0.0  ;;  %v204_v46 = vmul.f32 %v443_v0, %v184_v30 }
  0x17   : > { %349 = vst [vmem:[%s486_s26] sm:$0xff] %v348_v37   ;;  %v222_v47 = vadd.f32 %v454_v1, %v202_v39  ;;  %v223_v48 = vadd.f32 %v454_v1, %v203_v40  ;;  %v205_v49 = vmul.f32 %v443_v0, %v185_v35  ;;  %v206_v50 = vmul.f32 %v443_v0, %v186_v36 }
  0x18   : > { %385 = vst [vmem:[%s486_s26 + $0x8] sm:$0xff] %v353_v43   ;;  %v363_v52 = vpack.c.bf16 %v237_v45, %v236_v38  ;;  %v224_v53 = vadd.f32 %v454_v1, %v204_v46  ;;  %v207_v54 = vmul.f32 %v443_v0, %v187_v41  ;;  %v208_v55 = vmul.f32 %v443_v0, %v188_v42 }
  0x19   : > { %386 = vst [vmem:[%s486_s26 + $0x10] sm:$0xff] %v358_v44   ;;  %v238_v56 = vmax.f32 %v222_v47, 0.0  ;;  %v239_v57 = vmax.f32 %v223_v48, 0.0  ;;  %v225_v58 = vadd.f32 %v454_v1, %v205_v49  ;;  %v226_v59 = vadd.f32 %v454_v1, %v206_v50 }
  0x1a   : > { %387 = vst [vmem:[%s486_s26 + $0x18] sm:$0xff] %v363_v52   ;;  %v240_v60 = vmax.f32 %v224_v53, 0.0  ;;  %v227_v61 = vadd.f32 %v454_v1, %v207_v54  ;;  %v209_v62 = vmul.f32 %v443_v0, %v189_v51  ;;  %v228_v63 = vadd.f32 %v454_v1, %v208_v55 }
  0x1b   : > { %v368_v2 = vpack.c.bf16 %v239_v57, %v238_v56  ;;  %v241_v3 = vmax.f32 %v225_v58, 0.0  ;;  %v242_v4 = vmax.f32 %v226_v59, 0.0 }
  0x1c   : > { %v243_v5 = vmax.f32 %v227_v61, 0.0  ;;  %v229_v6 = vadd.f32 %v454_v1, %v209_v62  ;;  %v244_v7 = vmax.f32 %v228_v63, 0.0 }
  0x1d   : > { %388 = vst [vmem:[%s486_s26 + $0x20] sm:$0xff] %v368_v2   ;;  %v373_v8 = vpack.c.bf16 %v241_v3, %v240_v60 }
  0x1e   : > { %v378_v9 = vpack.c.bf16 %v243_v5, %v242_v4  ;;  %v245_v10 = vmax.f32 %v229_v6, 0.0 }
  0x1f   : > { %389 = vst [vmem:[%s486_s26 + $0x28] sm:$0xff] %v373_v8  }
  0x20   : > { %390 = vst [vmem:[%s486_s26 + $0x30] sm:$0xff] %v378_v9   ;;  %v383_v11 = vpack.c.bf16 %v245_v10, %v244_v7 }
  0x22   : > { %391 = vst [vmem:[%s486_s26 + $0x38] sm:$0xff] %v383_v11  }
  0x23 PF: > { %s13_s12 = sadd.s32 1, %s408_s12  }
  0x24   : > { %p10_p4 = scmp.ge.s32.totalorder %s13_s12, 6  }
  0x26   :  { %12 = sbr.rel (!%p10_p4) target bundleno = 1 (0x1), region = 62 }

// kernel: _lambda_.18
= control target key start
LH: loop header
LB: loop body
LE: loop exit
PB: predicated region body
PF: predicated region fallthrough
CT: control target
= control target key end

     0   :  { %s2618_s15 = smov 0   ;;  %s3203_s0 = inlined_call_operand.vmem [shape: bf16[512,1152], index: 0, kind: input, shape index: {}]   ;;  %s3204_s1 = inlined_call_operand.vmem [shape: bf16[1152,128], index: 1, kind: input, shape index: {}]   ;;  %s3205_s2 = inlined_call_operand.vmem [shape: f32[512,128], index: 2, kind: output, shape index: {0}]   ;;  %s3206_s3 = inlined_call_operand.vmem [shape: f32[1,128], index: 3, kind: output, shape index: {1}]   ;;  %s3207_s4 = inlined_call_operand.vmem [shape: f32[1,128], index: 4, kind: output, shape index: {2}]  }
   0x1 LB: > { %s1818_s16 = sadd.s32 4294967295, %s2590_s15   ;;  %p1822_p0 = scmp.ge.s32.totalorder %s2590_s15, 1  ;;  %s2590_s15 = sphi %s2618_s15, %s15_s15  }
   0x2   : > { %p159_p1 = scmp.lt.s32.totalorder %s2590_s15, 5 }
   0x4   : > { %p160_p2 = pnand %p1822_p0, %p159_p1 }
   0x5   : > { %s1823_s23 = sshll.u32 (!%p160_p2), %s1818_s16, 4  ;;  %p2403_p4 = scmp.ne.s32.totalorder (!%p160_p2), %s1818_s16, 0 }
   0x6   : > { %163 = sbr.rel (%p160_p2) target bundleno = 512 (0x200), region = 28  ;;  %p187_p3 = scmp.lt.s32.totalorder (!%p160_p2), %s1823_s23, 63 }
   0xb   : > { %v2485_v0 = vld [vmem:[%s3204_s1 + $0x38] sm:$0xff]  ;;  %v2484_v1 = vld [vmem:[%s3204_s1 + $0x30] sm:$0xff]  ;;  %v2483_v2 = vld [vmem:[%s3204_s1 + $0x28] sm:$0xff]  ;;  %s3209_s23 = smov (!%p187_p3, %s1823_s23), 63 }
   0xc   : > { %2550 = vmatpush.bf16.msra.mxu1 %v2485_v0  ;;  %2551 = vmatpush.bf16.msra.mxu2 %v2485_v0  ;;  %v2482_v3 = vld [vmem:[%s3204_s1 + $0x20] sm:$0xff]  ;;  %v2481_v4 = vld [vmem:[%s3204_s1 + $0x18] sm:$0xff]  ;;  %v2480_v5 = vld [vmem:[%s3204_s1 + $0x10] sm:$0xff]  ;;  %s2574_s30 = smul.u32 36, %s3209_s23 }
   0xd   : > { %2552 = vmatpush.bf16.msra.mxu3 %v2485_v0  ;;  %1223 = vmatpush.bf16.msra.mxu0 %v2485_v0  ;;  %v2479_v6 = vld [vmem:[%s3204_s1 + $0x8] sm:$0xff]  ;;  %v2478_v7 = vld [vmem:[%s3204_s1] sm:$0xff]  ;;  %v2501_v16 = vld [vmem:[%s3204_s1 + $0xb8] sm:$0xff] }
   0xe   : > { %s2655_s9 = scalar_lea.vmem %s3203_s0, %s2574_s30  ;;  %v2493_v17 = vld [vmem:[%s3204_s1 + $0x78] sm:$0xff]  ;;  %v2500_v24 = vld [vmem:[%s3204_s1 + $0xb0] sm:$0xff]  ;;  %v2499_v28 = vld [vmem:[%s3204_s1 + $0xa8] sm:$0xff] }
   0xf   : > { %v1901_v8 = vld [vmem:[%s2655_s9 + $0x90] sm:$0xf]  ;;  %v2428_v9 = vld [vmem:[%s2655_s9 + $0xb0] sm:$0xf0]  ;;  %v1973_v10 = vld [vmem:[%s2655_s9 + $0x120] sm:$0xf] }
  0x10   : > { %2553 = vmatpush.bf16.msra.mxu1 %v2484_v1  ;;  %2554 = vmatpush.bf16.msra.mxu2 %v2484_v1  ;;  %v2446_v11 = vld [vmem:[%s2655_s9 + $0x140] sm:$0xf0]  ;;  %v2045_v12 = vld [vmem:[%s2655_s9 + $0x1b0] sm:$0xf]  ;;  %v2464_v13 = vld [vmem:[%s2655_s9 + $0x1d0] sm:$0xf0]  ;;  %v1902_v18 = vor.u32 %v2428_v9, %v1901_v8 }
  0x11   : > { %2555 = vmatpush.bf16.msra.mxu3 %v2484_v1  ;;  %1224 = vmatpush.bf16.msra.mxu0 %v2484_v1  ;;  %v1829_v14 = vld [vmem:[%s2655_s9] sm:$0xf]  ;;  %v2410_v15 = vld [vmem:[%s2655_s9 + $0x20] sm:$0xf0]  ;;  %v1974_v19 = vor.u32 %v2446_v11, %v1973_v10  ;;  %v2046_v20 = vor.u32 %v2464_v13, %v2045_v12  ;;  %v2509_v22 = vld [vmem:[%s3204_s1 + $0xf8] sm:$0xff] }
  0x12   : > { %v1830_v21 = vor.u32 %v2410_v15, %v1829_v14  ;;  %v2517_v23 = vld [vmem:[%s3204_s1 + $0x138] sm:$0xff]  ;;  %v2492_v25 = vld [vmem:[%s3204_s1 + $0x70] sm:$0xff]  ;;  %v2491_v29 = vld [vmem:[%s3204_s1 + $0x68] sm:$0xff] }
  0x13   : > { %v2508_v26 = vld [vmem:[%s3204_s1 + $0xf0] sm:$0xff]  ;;  %v2507_v30 = vld [vmem:[%s3204_s1 + $0xe8] sm:$0xff]  ;;  %v2498_v32 = vld [vmem:[%s3204_s1 + $0xa0] sm:$0xff] }
  0x14   : > { %2556 = vmatpush.bf16.msra.mxu1 %v2483_v2  ;;  %2557 = vmatpush.bf16.msra.mxu2 %v2483_v2  ;;  %v2516_v27 = vld [vmem:[%s3204_s1 + $0x130] sm:$0xff]  ;;  %v2515_v31 = vld [vmem:[%s3204_s1 + $0x128] sm:$0xff]  ;;  %v2490_v33 = vld [vmem:[%s3204_s1 + $0x60] sm:$0xff] }
  0x15   : > { %2558 = vmatpush.bf16.msra.mxu3 %v2483_v2  ;;  %1225 = vmatpush.bf16.msra.mxu0 %v2483_v2  ;;  %v2506_v34 = vld [vmem:[%s3204_s1 + $0xe0] sm:$0xff]  ;;  %v1937_v36 = vld [vmem:[%s2655_s9 + $0xd8] sm:$0xf]  ;;  %v2437_v37 = vld [vmem:[%s2655_s9 + $0xf8] sm:$0xf0] }
  0x16   : > { %v2514_v35 = vld [vmem:[%s3204_s1 + $0x120] sm:$0xff]  ;;  %v2009_v38 = vld [vmem:[%s2655_s9 + $0x168] sm:$0xf]  ;;  %v2455_v39 = vld [vmem:[%s2655_s9 + $0x188] sm:$0xf0]  ;;  %v1938_v46 = vor.u32 %v2437_v37, %v1937_v36 }
  0x17   : > { %v2081_v40 = vld [vmem:[%s2655_s9 + $0x1f8] sm:$0xf]  ;;  %v2473_v41 = vld [vmem:[%s2655_s9 + $0x218] sm:$0xf0]  ;;  %v1865_v42 = vld [vmem:[%s2655_s9 + $0x48] sm:$0xf]  ;;  %v2010_v47 = vor.u32 %v2455_v39, %v2009_v38 }
  0x18   : > { %2559 = vmatpush.bf16.msra.mxu1 %v2482_v3  ;;  %2560 = vmatpush.bf16.msra.mxu2 %v2482_v3  ;;  %v2419_v43 = vld [vmem:[%s2655_s9 + $0x68] sm:$0xf0]  ;;  %v2497_v44 = vld [vmem:[%s3204_s1 + $0x98] sm:$0xff]  ;;  %v2082_v48 = vor.u32 %v2473_v41, %v2081_v40  ;;  %v2496_v52 = vld [vmem:[%s3204_s1 + $0x90] sm:$0xff] }
  0x19   : > { %2561 = vmatpush.bf16.msra.mxu3 %v2482_v3  ;;  %1226 = vmatpush.bf16.msra.mxu0 %v2482_v3  ;;  %v2489_v45 = vld [vmem:[%s3204_s1 + $0x58] sm:$0xff]  ;;  %v1866_v49 = vor.u32 %v2419_v43, %v1865_v42  ;;  %v2488_v53 = vld [vmem:[%s3204_s1 + $0x50] sm:$0xff]  ;;  %v2495_v56 = vld [vmem:[%s3204_s1 + $0x88] sm:$0xff] }
  0x1a   : > { %v2505_v50 = vld [vmem:[%s3204_s1 + $0xd8] sm:$0xff]  ;;  %v2504_v54 = vld [vmem:[%s3204_s1 + $0xd0] sm:$0xff]  ;;  %v2487_v57 = vld [vmem:[%s3204_s1 + $0x48] sm:$0xff] }
  0x1b   : > { %v2513_v51 = vld [vmem:[%s3204_s1 + $0x118] sm:$0xff]  ;;  %v2512_v55 = vld [vmem:[%s3204_s1 + $0x110] sm:$0xff]  ;;  %v2503_v58 = vld [vmem:[%s3204_s1 + $0xc8] sm:$0xff] }
  0x1c   : > { %2562 = vmatpush.bf16.msra.mxu1 %v2481_v4  ;;  %2563 = vmatpush.bf16.msra.mxu2 %v2481_v4  ;;  %v2511_v59 = vld [vmem:[%s3204_s1 + $0x108] sm:$0xff]  ;;  %v2494_v60 = vld [vmem:[%s3204_s1 + $0x80] sm:$0xff]  ;;  %v2533_v2 = vld [vmem:[%s3204_s1 + $0x1b8] sm:$0xff] }
  0x1d   : > { %2564 = vmatpush.bf16.msra.mxu3 %v2481_v4  ;;  %1227 = vmatpush.bf16.msra.mxu0 %v2481_v4  ;;  %v2486_v61 = vld [vmem:[%s3204_s1 + $0x40] sm:$0xff]  ;;  %v1831_v1 = vld [vmem:[%s2655_s9 + $0x24] sm:$0xf0]  ;;  %v2525_v3 = vld [vmem:[%s3204_s1 + $0x178] sm:$0xff] }
  0x1e   : > { %v2406_v62 = vld [vmem:[%s2655_s9 + $0x4] sm:$0xf]  ;;  %v1837_v4 = vld [vmem:[%s2655_s9 + $0x8] sm:$0xf]  ;;  %v1845_v8 = vld [vmem:[%s2655_s9 + $0x10] sm:$0xf] }
  0x1f   : > { %v2502_v63 = vld [vmem:[%s3204_s1 + $0xc0] sm:$0xff]  ;;  %v2412_v9 = vld [vmem:[%s2655_s9 + $0x30] sm:$0xf0]  ;;  %v2541_v10 = vld [vmem:[%s3204_s1 + $0x1f8] sm:$0xff]  ;;  %v1834_v12 = vor.u32 %v2406_v62, %v1831_v1 }
  0x20   : > { %2565 = vmatpush.bf16.msra.mxu1 %v2480_v5  ;;  %2566 = vmatpush.bf16.msra.mxu2 %v2480_v5  ;;  %v2510_v0 = vld [vmem:[%s3204_s1 + $0x100] sm:$0xff]  ;;  %v2549_v11 = vld [vmem:[%s3204_s1 + $0x238] sm:$0xff]  ;;  %v1846_v15 = vor.u32 %v2412_v9, %v1845_v8  ;;  %v2424_v40 = vld [vmem:[%s2655_s9 + $0x94] sm:$0xf] }
  0x21   : > { %2567 = vmatpush.bf16.msra.mxu3 %v2480_v5  ;;  %1228 = vmatpush.bf16.msra.mxu0 %v2480_v5  ;;  %v2411_v5 = vld [vmem:[%s2655_s9 + $0x28] sm:$0xf0]  ;;  %v2530_v36 = vld [vmem:[%s3204_s1 + $0x1a0] sm:$0xff]  ;;  %v1903_v41 = vld [vmem:[%s2655_s9 + $0xb4] sm:$0xf0] }
  0x22   : > { %v1838_v13 = vor.u32 %v2411_v5, %v1837_v4  ;;  %v2538_v37 = vld [vmem:[%s3204_s1 + $0x1e0] sm:$0xff]  ;;  %v1909_v42 = vld [vmem:[%s2655_s9 + $0x98] sm:$0xf]  ;;  %v2429_v43 = vld [vmem:[%s2655_s9 + $0xb8] sm:$0xf0] }
  0x23   : > { %v2522_v38 = vld [vmem:[%s3204_s1 + $0x160] sm:$0xff]  ;;  %v1953_v62 = vld [vmem:[%s2655_s9 + $0xe8] sm:$0xf]  ;;  %v2528_v4 = vld [vmem:[%s3204_s1 + $0x190] sm:$0xff] }
  0x24   : > { %2568 = vmatpush.bf16.msra.mxu1 %v2479_v6  ;;  %2569 = vmatpush.bf16.msra.mxu2 %v2479_v6  ;;  %v2546_v39 = vld [vmem:[%s3204_s1 + $0x220] sm:$0xff]  ;;  %v2536_v5 = vld [vmem:[%s3204_s1 + $0x1d0] sm:$0xff]  ;;  %v1975_v9 = vld [vmem:[%s2655_s9 + $0x144] sm:$0xf0] }
  0x25   : > { %2570 = vmatpush.bf16.msra.mxu3 %v2479_v6  ;;  %1229 = vmatpush.bf16.msra.mxu0 %v2479_v6  ;;  %v2407_v6 = vld [vmem:[%s2655_s9 + $0xc] sm:$0xf]  ;;  %v2442_v8 = vld [vmem:[%s2655_s9 + $0x124] sm:$0xf] }
  0x28   : > { %2571 = vmatpush.bf16.msra.mxu1 %v2478_v7  ;;  %2572 = vmatpush.bf16.msra.mxu2 %v2478_v7 }
  0x29   : > { %2573 = vmatpush.bf16.msra.mxu3 %v2478_v7  ;;  %1230 = vmatpush.bf16.msra.mxu0 %v2478_v7  ;;  %v1839_v7 = vld [vmem:[%s2655_s9 + $0x2c] sm:$0xf0] }
  0x2a   : > { %v1842_v14 = vor.u32 %v2407_v6, %v1839_v7  ;;  %v2520_v6 = vld [vmem:[%s3204_s1 + $0x150] sm:$0xff] }
  0x2b   : > { %1241 = vmatmul.bf16.vlgmr.msra.gmra.mxu1 %v1902_v18  ;;  %1251 = vmatmul.bf16.vlgmr.msra.gmra.mxu2 %v1974_v19  ;;  %v2540_v18 = vld [vmem:[%s3204_s1 + $0x1f0] sm:$0xff] }
  0x2c   : > { %1321 = vmatpush.bf16.msrb.mxu2 %v2501_v16  ;;  %1272 = vmatpush.bf16.msrb.mxu1 %v2493_v17  ;;  %v2532_v16 = vld [vmem:[%s3204_s1 + $0x1b0] sm:$0xff] }
  0x2d   : > { %1261 = vmatmul.bf16.vlgmr.msra.gmra.mxu3 %v2046_v20  ;;  %1231 = vmatmul.bf16.vlgmr.msra.gmra.mxu0 %v1830_v21  ;;  %v2524_v17 = vld [vmem:[%s3204_s1 + $0x170] sm:$0xff]  ;;  %v2531_v20 = vld [vmem:[%s3204_s1 + $0x1a8] sm:$0xff] }
  0x2e   : > { %1370 = vmatpush.bf16.msrb.mxu3 %v2509_v22  ;;  %1419 = vmatpush.bf16.msrb.mxu0 %v2517_v23  ;;  %v2548_v19 = vld [vmem:[%s3204_s1 + $0x230] sm:$0xff]  ;;  %v2523_v21 = vld [vmem:[%s3204_s1 + $0x168] sm:$0xff] }
  0x2f   : > { %v2539_v22 = vld [vmem:[%s3204_s1 + $0x1e8] sm:$0xff]  ;;  %v2544_v7 = vld [vmem:[%s3204_s1 + $0x210] sm:$0xff] }
  0x30   : > { %1322 = vmatpush.bf16.msrb.mxu2 %v2500_v24  ;;  %1273 = vmatpush.bf16.msrb.mxu1 %v2492_v25  ;;  %v2547_v23 = vld [vmem:[%s3204_s1 + $0x228] sm:$0xff]  ;;  %v1867_v25 = vld [vmem:[%s2655_s9 + $0x6c] sm:$0xf0] }
  0x31   : > { %v2415_v24 = vld [vmem:[%s2655_s9 + $0x4c] sm:$0xf] }
  0x32   : > { %1371 = vmatpush.bf16.msrb.mxu3 %v2508_v26  ;;  %1420 = vmatpush.bf16.msrb.mxu0 %v2516_v27  ;;  %v1873_v26 = vld [vmem:[%s2655_s9 + $0x50] sm:$0xf]  ;;  %v2420_v27 = vld [vmem:[%s2655_s9 + $0x70] sm:$0xf0] }
  0x34   : > { %1323 = vmatpush.bf16.msrb.mxu2 %v2499_v28  ;;  %1274 = vmatpush.bf16.msrb.mxu1 %v2491_v29  ;;  %v2416_v28 = vld [vmem:[%s2655_s9 + $0x54] sm:$0xf]  ;;  %v1875_v29 = vld [vmem:[%s2655_s9 + $0x74] sm:$0xf0] }
  0x36   : > { %1372 = vmatpush.bf16.msrb.mxu3 %v2507_v30  ;;  %1421 = vmatpush.bf16.msrb.mxu0 %v2515_v31  ;;  %v1881_v30 = vld [vmem:[%s2655_s9 + $0x58] sm:$0xf]  ;;  %v2421_v31 = vld [vmem:[%s2655_s9 + $0x78] sm:$0xf0] }
  0x38   : > { %1324 = vmatpush.bf16.msrb.mxu2 %v2498_v32  ;;  %1275 = vmatpush.bf16.msrb.mxu1 %v2490_v33  ;;  %v1870_v32 = vor.u32 %v2415_v24, %v1867_v25  ;;  %v1874_v33 = vor.u32 %v2420_v27, %v1873_v26  ;;  %v2451_v24 = vld [vmem:[%s2655_s9 + $0x16c] sm:$0xf]  ;;  %v2011_v25 = vld [vmem:[%s2655_s9 + $0x18c] sm:$0xf0]  ;;  %v2456_v27 = vld [vmem:[%s2655_s9 + $0x190] sm:$0xf0] }
  0x39   : > { %v2017_v26 = vld [vmem:[%s2655_s9 + $0x170] sm:$0xf] }
  0x3a   : > { %1373 = vmatpush.bf16.msrb.mxu3 %v2506_v34  ;;  %1422 = vmatpush.bf16.msrb.mxu0 %v2514_v35  ;;  %v1878_v34 = vor.u32 %v2416_v28, %v1875_v29  ;;  %v1882_v35 = vor.u32 %v2421_v31, %v1881_v30  ;;  %v2452_v28 = vld [vmem:[%s2655_s9 + $0x174] sm:$0xf]  ;;  %v2019_v29 = vld [vmem:[%s2655_s9 + $0x194] sm:$0xf0]  ;;  %v2457_v31 = vld [vmem:[%s2655_s9 + $0x198] sm:$0xf0] }
  0x3b   : > { %1246 = vmatmul.bf16.gmra.mxu1 %v1938_v46  ;;  %1256 = vmatmul.bf16.gmra.mxu2 %v2010_v47  ;;  %v1917_v46 = vld [vmem:[%s2655_s9 + $0xa0] sm:$0xf]  ;;  %v2430_v47 = vld [vmem:[%s2655_s9 + $0xc0] sm:$0xf0]  ;;  %v2025_v30 = vld [vmem:[%s2655_s9 + $0x178] sm:$0xf] }
  0x3c   : > { %1325 = vmatpush.bf16.msrb.mxu2 %v2497_v44  ;;  %1276 = vmatpush.bf16.msrb.mxu1 %v2489_v45  ;;  %v2425_v44 = vld [vmem:[%s2655_s9 + $0x9c] sm:$0xf]  ;;  %v1911_v45 = vld [vmem:[%s2655_s9 + $0xbc] sm:$0xf0] }
  0x3d   : > { %1266 = vmatmul.bf16.gmra.mxu3 %v2082_v48  ;;  %1236 = vmatmul.bf16.gmra.mxu0 %v1866_v49  ;;  %v1906_v48 = vor.u32 %v2424_v40, %v1903_v41  ;;  %v1910_v49 = vor.u32 %v2429_v43, %v1909_v42  ;;  %v2460_v40 = vld [vmem:[%s2655_s9 + $0x1b4] sm:$0xf]  ;;  %v2047_v41 = vld [vmem:[%s2655_s9 + $0x1d4] sm:$0xf0]  ;;  %v2465_v43 = vld [vmem:[%s2655_s9 + $0x1d8] sm:$0xf0] }
  0x3e   : > { %1374 = vmatpush.bf16.msrb.mxu3 %v2505_v50  ;;  %1423 = vmatpush.bf16.msrb.mxu0 %v2513_v51  ;;  %v1914_v50 = vor.u32 %v2425_v44, %v1911_v45  ;;  %v1918_v51 = vor.u32 %v2430_v47, %v1917_v46  ;;  %v2053_v42 = vld [vmem:[%s2655_s9 + $0x1b8] sm:$0xf]  ;;  %v2461_v44 = vld [vmem:[%s2655_s9 + $0x1bc] sm:$0xf]  ;;  %v2055_v45 = vld [vmem:[%s2655_s9 + $0x1dc] sm:$0xf0] }
  0x3f   : > { %v2061_v46 = vld [vmem:[%s2655_s9 + $0x1c0] sm:$0xf]  ;;  %v2466_v47 = vld [vmem:[%s2655_s9 + $0x1e0] sm:$0xf0] }
  0x40   : > { %1326 = vmatpush.bf16.msrb.mxu2 %v2496_v52  ;;  %1277 = vmatpush.bf16.msrb.mxu1 %v2488_v53  ;;  %v2529_v52 = vld [vmem:[%s3204_s1 + $0x198] sm:$0xff] }
  0x41   : > { %v2537_v53 = vld [vmem:[%s3204_s1 + $0x1d8] sm:$0xff] }
  0x42   : > { %1375 = vmatpush.bf16.msrb.mxu3 %v2504_v54  ;;  %1424 = vmatpush.bf16.msrb.mxu0 %v2512_v55  ;;  %v2521_v54 = vld [vmem:[%s3204_s1 + $0x158] sm:$0xff] }
  0x43   : > { %v2545_v55 = vld [vmem:[%s3204_s1 + $0x218] sm:$0xff] }
  0x44   : > { %1327 = vmatpush.bf16.msrb.mxu2 %v2495_v56  ;;  %1278 = vmatpush.bf16.msrb.mxu1 %v2487_v57  ;;  %v2433_v56 = vld [vmem:[%s2655_s9 + $0xdc] sm:$0xf]  ;;  %v1939_v57 = vld [vmem:[%s2655_s9 + $0xfc] sm:$0xf0] }
  0x46   : > { %1376 = vmatpush.bf16.msrb.mxu3 %v2503_v58  ;;  %1425 = vmatpush.bf16.msrb.mxu0 %v2511_v59  ;;  %v1945_v58 = vld [vmem:[%s2655_s9 + $0xe0] sm:$0xf]  ;;  %v2438_v59 = vld [vmem:[%s2655_s9 + $0x100] sm:$0xf0] }
  0x47   : > { %v1946_v1 = vor.u32 %v2438_v59, %v1945_v58  ;;  %v2469_v58 = vld [vmem:[%s2655_s9 + $0x1fc] sm:$0xf]  ;;  %v2083_v59 = vld [vmem:[%s2655_s9 + $0x21c] sm:$0xf0] }
  0x48   : > { %1328 = vmatpush.bf16.msrb.mxu2 %v2494_v60  ;;  %1279 = vmatpush.bf16.msrb.mxu1 %v2486_v61  ;;  %v2434_v60 = vld [vmem:[%s2655_s9 + $0xe4] sm:$0xf]  ;;  %v1947_v61 = vld [vmem:[%s2655_s9 + $0x104] sm:$0xf0] }
  0x4a   : > { %1377 = vmatpush.bf16.msrb.mxu3 %v2502_v63  ;;  %1426 = vmatpush.bf16.msrb.mxu0 %v2510_v0  ;;  %v2439_v63 = vld [vmem:[%s2655_s9 + $0x108] sm:$0xf0]  ;;  %v1942_v0 = vor.u32 %v2433_v56, %v1939_v57 }
  0x4b   : > { %1280 = vmatmul.bf16.vlgmr.msrb.gmra.mxu1 %v1834_v12  ;;  %1329 = vmatmul.bf16.vlgmr.msrb.gmra.mxu2 %v1838_v13  ;;  %v2443_v12 = vld [vmem:[%s2655_s9 + $0x12c] sm:$0xf]  ;;  %v1983_v13 = vld [vmem:[%s2655_s9 + $0x14c] sm:$0xf0] }
  0x4c   : > { %1517 = vmatpush.bf16.msra.mxu2 %v2533_v2  ;;  %1468 = vmatpush.bf16.msra.mxu1 %v2525_v3  ;;  %v1950_v2 = vor.u32 %v2434_v60, %v1947_v61  ;;  %v1954_v3 = vor.u32 %v2439_v63, %v1953_v62  ;;  %v2089_v60 = vld [vmem:[%s2655_s9 + $0x200] sm:$0xf]  ;;  %v2474_v61 = vld [vmem:[%s2655_s9 + $0x220] sm:$0xf0]  ;;  %v2091_v63 = vld [vmem:[%s2655_s9 + $0x224] sm:$0xf0] }
  0x4d   : > { %1378 = vmatmul.bf16.vlgmr.msrb.gmra.mxu3 %v1842_v14  ;;  %1427 = vmatmul.bf16.vlgmr.msrb.gmra.mxu0 %v1846_v15  ;;  %v1989_v14 = vld [vmem:[%s2655_s9 + $0x130] sm:$0xf]  ;;  %v2448_v15 = vld [vmem:[%s2655_s9 + $0x150] sm:$0xf0]  ;;  %v2470_v62 = vld [vmem:[%s2655_s9 + $0x204] sm:$0xf] }
  0x4e   : > { %1566 = vmatpush.bf16.msra.mxu3 %v2541_v10  ;;  %1615 = vmatpush.bf16.msra.mxu0 %v2549_v11  ;;  %v1981_v10 = vld [vmem:[%s2655_s9 + $0x128] sm:$0xf]  ;;  %v2447_v11 = vld [vmem:[%s2655_s9 + $0x148] sm:$0xf0] }
  0x50   : > { %1518 = vmatpush.bf16.msra.mxu2 %v2532_v16  ;;  %1469 = vmatpush.bf16.msra.mxu1 %v2524_v17  ;;  %v1978_v16 = vor.u32 %v2442_v8, %v1975_v9  ;;  %v1982_v17 = vor.u32 %v2447_v11, %v1981_v10 }
  0x52   : > { %1567 = vmatpush.bf16.msra.mxu3 %v2540_v18  ;;  %1616 = vmatpush.bf16.msra.mxu0 %v2548_v19  ;;  %v1986_v18 = vor.u32 %v2443_v12, %v1983_v13  ;;  %v1990_v19 = vor.u32 %v2448_v15, %v1989_v14  ;;  %v2408_v14 = vld [vmem:[%s2655_s9 + $0x14] sm:$0xf]  ;;  %v1847_v15 = vld [vmem:[%s2655_s9 + $0x34] sm:$0xf0] }
  0x54   : > { %1519 = vmatpush.bf16.msra.mxu2 %v2531_v20  ;;  %1470 = vmatpush.bf16.msra.mxu1 %v2523_v21  ;;  %v2527_v20 = vld [vmem:[%s3204_s1 + $0x188] sm:$0xff] }
  0x55   : > { %v2535_v21 = vld [vmem:[%s3204_s1 + $0x1c8] sm:$0xff] }
  0x56   : > { %1568 = vmatpush.bf16.msra.mxu3 %v2539_v22  ;;  %1617 = vmatpush.bf16.msra.mxu0 %v2547_v23  ;;  %v2519_v22 = vld [vmem:[%s3204_s1 + $0x148] sm:$0xff] }
  0x57   : > { %v2543_v23 = vld [vmem:[%s3204_s1 + $0x208] sm:$0xff] }
  0x58   : > { %1520 = vmatpush.bf16.msra.mxu2 %v2530_v36  ;;  %1471 = vmatpush.bf16.msra.mxu1 %v2522_v38  ;;  %v2526_v36 = vld [vmem:[%s3204_s1 + $0x180] sm:$0xff] }
  0x59   : > { %v2518_v38 = vld [vmem:[%s3204_s1 + $0x140] sm:$0xff] }
  0x5a   : > { %1569 = vmatpush.bf16.msra.mxu3 %v2538_v37  ;;  %1618 = vmatpush.bf16.msra.mxu0 %v2546_v39  ;;  %v2534_v37 = vld [vmem:[%s3204_s1 + $0x1c0] sm:$0xff] }
  0x5b   : > { %1285 = vmatmul.bf16.gmra.mxu1 %v1870_v32  ;;  %1334 = vmatmul.bf16.gmra.mxu2 %v1874_v33  ;;  %v2014_v32 = vor.u32 %v2451_v24, %v2011_v25  ;;  %v2018_v33 = vor.u32 %v2456_v27, %v2017_v26  ;;  %v2542_v39 = vld [vmem:[%s3204_s1 + $0x200] sm:$0xff]  ;;  %v1850_v24 = vor.u32 %v2408_v14, %v1847_v15  ;;  %v1919_v14 = vld [vmem:[%s2655_s9 + $0xc4] sm:$0xf0] }
  0x5c   : > { %1521 = vmatpush.bf16.msra.mxu2 %v2529_v52  ;;  %1472 = vmatpush.bf16.msra.mxu1 %v2521_v54  ;;  %v2062_v52 = vor.u32 %v2466_v47, %v2061_v46  ;;  %v2423_v46 = vld [vmem:[%s2655_s9 + $0x88] sm:$0xf0] }
  0x5d   : > { %1383 = vmatmul.bf16.gmra.mxu3 %v1878_v34  ;;  %1432 = vmatmul.bf16.gmra.mxu0 %v1882_v35  ;;  %v2022_v34 = vor.u32 %v2452_v28, %v2019_v29  ;;  %v2026_v35 = vor.u32 %v2457_v31, %v2025_v30 }
  0x5e   : > { %1570 = vmatpush.bf16.msra.mxu3 %v2537_v53  ;;  %1619 = vmatpush.bf16.msra.mxu0 %v2545_v55 }
  0x60   : > { %1522 = vmatpush.bf16.msra.mxu2 %v2528_v4  ;;  %1473 = vmatpush.bf16.msra.mxu1 %v2520_v6  ;;  %v2086_v4 = vor.u32 %v2469_v58, %v2083_v59 }
  0x62   : > { %1571 = vmatpush.bf16.msra.mxu3 %v2536_v5  ;;  %1620 = vmatpush.bf16.msra.mxu0 %v2544_v7  ;;  %v2090_v5 = vor.u32 %v2474_v61, %v2089_v60  ;;  %v2094_v7 = vor.u32 %v2470_v62, %v2091_v63 }
  0x64   : > { %1523 = vmatpush.bf16.msra.mxu2 %v2527_v20  ;;  %1474 = vmatpush.bf16.msra.mxu1 %v2519_v22  ;;  %v1861_v20 = vld [vmem:[%s2655_s9 + $0x20] sm:$0xf] }
  0x66   : > { %1572 = vmatpush.bf16.msra.mxu3 %v2535_v21  ;;  %1621 = vmatpush.bf16.msra.mxu0 %v2543_v23  ;;  %v2414_v21 = vld [vmem:[%s2655_s9 + $0x40] sm:$0xf0] }
  0x67   : > { %v1862_v28 = vor.u32 %v2414_v21, %v1861_v20  ;;  %v1933_v20 = vld [vmem:[%s2655_s9 + $0xb0] sm:$0xf]  ;;  %v2432_v21 = vld [vmem:[%s2655_s9 + $0xd0] sm:$0xf0] }
  0x68   : > { %1524 = vmatpush.bf16.msra.mxu2 %v2526_v36  ;;  %1475 = vmatpush.bf16.msra.mxu1 %v2518_v38  ;;  %v2417_v38 = vld [vmem:[%s2655_s9 + $0x5c] sm:$0xf] }
  0x6a   : > { %1573 = vmatpush.bf16.msra.mxu3 %v2534_v37  ;;  %1622 = vmatpush.bf16.msra.mxu0 %v2542_v39  ;;  %v1883_v39 = vld [vmem:[%s2655_s9 + $0x7c] sm:$0xf0] }
  0x6b   : > { %1290 = vmatmul.bf16.gmra.mxu1 %v1906_v48  ;;  %1339 = vmatmul.bf16.gmra.mxu2 %v1910_v49  ;;  %v2050_v48 = vor.u32 %v2460_v40, %v2047_v41  ;;  %v2054_v49 = vor.u32 %v2465_v43, %v2053_v42  ;;  %v1889_v41 = vld [vmem:[%s2655_s9 + $0x60] sm:$0xf]  ;;  %v2422_v42 = vld [vmem:[%s2655_s9 + $0x80] sm:$0xf0] }
  0x6c   : > { %v2418_v43 = vld [vmem:[%s2655_s9 + $0x64] sm:$0xf] }
  0x6d   : > { %1388 = vmatmul.bf16.gmra.mxu3 %v1914_v50  ;;  %1437 = vmatmul.bf16.gmra.mxu0 %v1918_v51  ;;  %v2058_v51 = vor.u32 %v2461_v44, %v2055_v45  ;;  %v1891_v44 = vld [vmem:[%s2655_s9 + $0x84] sm:$0xf0] }
  0x6e   : > { %v1897_v45 = vld [vmem:[%s2655_s9 + $0x68] sm:$0xf]  ;;  %v1894_v58 = vor.u32 %v2418_v43, %v1891_v44  ;;  %v1955_v43 = vld [vmem:[%s2655_s9 + $0x10c] sm:$0xf0] }
  0x6f   : > { %v1898_v59 = vor.u32 %v2423_v46, %v1897_v45  ;;  %v1961_v45 = vld [vmem:[%s2655_s9 + $0xf0] sm:$0xf]  ;;  %v2440_v46 = vld [vmem:[%s2655_s9 + $0x110] sm:$0xf0] }
  0x7b   : > { %1295 = vmatmul.bf16.gmra.mxu1 %v1942_v0  ;;  %1344 = vmatmul.bf16.gmra.mxu2 %v1946_v1  ;;  %v2097_v0 = vld [vmem:[%s2655_s9 + $0x208] sm:$0xf]  ;;  %v2475_v1 = vld [vmem:[%s2655_s9 + $0x228] sm:$0xf0] }
  0x7c   : > { %v2098_v8 = vor.u32 %v2475_v1, %v2097_v0 }
  0x7d   : > { %1393 = vmatmul.bf16.gmra.mxu3 %v1950_v2  ;;  %1442 = vmatmul.bf16.gmra.mxu0 %v1954_v3 }
  0x8b   : > { %1300 = vmatmul.bf16.gmra.mxu1 %v1978_v16  ;;  %1349 = vmatmul.bf16.gmra.mxu2 %v1982_v17  ;;  %v1853_v16 = vld [vmem:[%s2655_s9 + $0x18] sm:$0xf]  ;;  %v2413_v17 = vld [vmem:[%s2655_s9 + $0x38] sm:$0xf0] }
  0x8c   : > { %v1854_v25 = vor.u32 %v2413_v17, %v1853_v16  ;;  %v1925_v16 = vld [vmem:[%s2655_s9 + $0xa8] sm:$0xf]  ;;  %v2431_v17 = vld [vmem:[%s2655_s9 + $0xc8] sm:$0xf0] }
  0x8d   : > { %1398 = vmatmul.bf16.gmra.mxu3 %v1986_v18  ;;  %1447 = vmatmul.bf16.gmra.mxu0 %v1990_v19  ;;  %v2409_v18 = vld [vmem:[%s2655_s9 + $0x1c] sm:$0xf]  ;;  %v1855_v19 = vld [vmem:[%s2655_s9 + $0x3c] sm:$0xf0] }
  0x8e   : > { %v1858_v27 = vor.u32 %v2409_v18, %v1855_v19  ;;  %v2427_v18 = vld [vmem:[%s2655_s9 + $0xac] sm:$0xf]  ;;  %v1927_v19 = vld [vmem:[%s2655_s9 + $0xcc] sm:$0xf0] }
  0x9b   : > { %1305 = vmatmul.bf16.gmra.mxu1 %v2014_v32  ;;  %1354 = vmatmul.bf16.gmra.mxu2 %v2018_v33 }
  0x9d   : > { %1403 = vmatmul.bf16.gmra.mxu3 %v2022_v34  ;;  %1452 = vmatmul.bf16.gmra.mxu0 %v2026_v35 }
  0xa8   : > { %v2924_v50 = vpop.f32.mrf.mxu1 }
  0xaa   : > { %v1232_v53 = vpop.f32.mrf.mxu0 }
  0xab   : > { %1310 = vmatmul.bf16.gmra.mxu1 %v2050_v48  ;;  %1359 = vmatmul.bf16.gmra.mxu2 %v2054_v49 }
  0xad   : > { %1408 = vmatmul.bf16.gmra.mxu3 %v2058_v51  ;;  %1457 = vmatmul.bf16.gmra.mxu0 %v2062_v52  ;;  %v1886_v51 = vor.u32 %v2417_v38, %v1883_v39  ;;  %v1890_v52 = vor.u32 %v2422_v42, %v1889_v41  ;;  %v2435_v42 = vld [vmem:[%s2655_s9 + $0xec] sm:$0xf] }
  0xae   : > { %v2926_v54 = vpop.f32.mrf.mxu2 }
  0xb0   : > { %v2928_v55 = vpop.f32.mrf.mxu3  ;;  %v2930_v56 = vpop.f32.mrf.mxu1 }
  0xb2   : > { %v1234_v57 = vpop.f32.mrf.mxu0 }
  0xb6   : > { %v2940_v2 = vpop.f32.mrf.mxu2 }
  0xb8   : > { %v2942_v3 = vpop.f32.mrf.mxu3  ;;  %v2944_v6 = vpop.f32.mrf.mxu1 }
  0xba   : > { %v1237_v9 = vpop.f32.mrf.mxu0 }
  0xbb   : > { %1315 = vmatmul.bf16.gmra.mxu1 %v2086_v4  ;;  %1364 = vmatmul.bf16.gmra.mxu2 %v2090_v5 }
  0xbd   : > { %1413 = vmatmul.bf16.gmra.mxu3 %v2094_v7  ;;  %1462 = vmatmul.bf16.gmra.mxu0 %v2098_v8 }
  0xbe   : > { %v2946_v10 = vpop.f32.mrf.mxu2 }
  0xc0   : > { %v2948_v11 = vpop.f32.mrf.mxu3  ;;  %v2950_v12 = vpop.f32.mrf.mxu1 }
  0xc2   : > { %v1239_v13 = vpop.f32.mrf.mxu0 }
  0xc6   : > { %v2960_v22 = vpop.f32.mrf.mxu2 }
  0xc8   : > { %v2962_v23 = vpop.f32.mrf.mxu3  ;;  %v1281_v26 = vpop.f32.mrf.mxu1 }
  0xc9   : > { %v1282_v29 = vadd.f32 %v1281_v26, %v1232_v53 }
  0xca   : > { %v1428_v30 = vpop.f32.mrf.mxu0 }
  0xcb   : > { %1476 = vmatmul.bf16.vlgmr.msra.gmra.mxu1 %v1850_v24  ;;  %1525 = vmatmul.bf16.vlgmr.msra.gmra.mxu2 %v1854_v25 }
  0xcd   : > { %1574 = vmatmul.bf16.vlgmr.msra.gmra.mxu3 %v1858_v27  ;;  %1623 = vmatmul.bf16.vlgmr.msra.gmra.mxu0 %v1862_v28  ;;  %v1926_v28 = vor.u32 %v2431_v17, %v1925_v16  ;;  %v2444_v17 = vld [vmem:[%s2655_s9 + $0x134] sm:$0xf] }
  0xce   : > { %v1330_v31 = vpop.f32.mrf.mxu2 }
  0xcf   : > { %v1331_v32 = vadd.f32 %v1330_v31, %v1282_v29  ;;  %v1934_v31 = vor.u32 %v2432_v21, %v1933_v20  ;;  %v1997_v20 = vld [vmem:[%s2655_s9 + $0x138] sm:$0xf]  ;;  %v2449_v21 = vld [vmem:[%s2655_s9 + $0x158] sm:$0xf0] }
  0xd0   : > { %v1379_v33 = vpop.f32.mrf.mxu3  ;;  %v1283_v34 = vpop.f32.mrf.mxu1 }
  0xd1   : > { %v1380_v35 = vadd.f32 %v1379_v33, %v1331_v32  ;;  %v1284_v36 = vadd.f32 %v1283_v34, %v1234_v57 }
  0xd2   : > { %v1430_v37 = vpop.f32.mrf.mxu0 }
  0xd3   : > { %v2966_v40 = vadd.f32 %v1428_v30, %v1380_v35  ;;  %v1930_v30 = vor.u32 %v2427_v18, %v1927_v19  ;;  %v1991_v18 = vld [vmem:[%s2655_s9 + $0x154] sm:$0xf0] }
  0xd6   : > { %v1332_v47 = vpop.f32.mrf.mxu2 }
  0xd7   : > { %v1333_v48 = vadd.f32 %v1332_v47, %v1284_v36  ;;  %v2436_v47 = vld [vmem:[%s2655_s9 + $0xf4] sm:$0xf] }
  0xd8   : > { %v1381_v49 = vpop.f32.mrf.mxu3  ;;  %v1286_v53 = vpop.f32.mrf.mxu1 }
  0xd9   : > { %v1382_v57 = vadd.f32 %v1381_v49, %v1333_v48  ;;  %v1287_v60 = vadd.f32 %v1286_v53, %v1237_v9  ;;  %v2426_v9 = vld [vmem:[%s2655_s9 + $0xa4] sm:$0xf]  ;;  %v1963_v48 = vld [vmem:[%s2655_s9 + $0x114] sm:$0xf0] }
  0xda   : > { %v1433_v61 = vpop.f32.mrf.mxu0  ;;  %v1922_v27 = vor.u32 %v2426_v9, %v1919_v14  ;;  %v1969_v49 = vld [vmem:[%s2655_s9 + $0xf8] sm:$0xf] }
  0xdb   : > { %1481 = vmatmul.bf16.gmra.mxu1 %v1886_v51  ;;  %1530 = vmatmul.bf16.gmra.mxu2 %v1890_v52  ;;  %v2974_v62 = vadd.f32 %v1430_v37, %v1382_v57  ;;  %v2441_v51 = vld [vmem:[%s2655_s9 + $0x118] sm:$0xf0]  ;;  %v1962_v57 = vor.u32 %v2440_v46, %v1961_v45 }
  0xdc   : > { %v2453_v46 = vld [vmem:[%s2655_s9 + $0x17c] sm:$0xf] }
  0xdd   : > { %1579 = vmatmul.bf16.gmra.mxu3 %v1894_v58  ;;  %1628 = vmatmul.bf16.gmra.mxu0 %v1898_v59  ;;  %v1958_v59 = vor.u32 %v2435_v42, %v1955_v43 }
  0xde   : > { %v1335_v63 = vpop.f32.mrf.mxu2 }
  0xdf   : > { %v1336_v0 = vadd.f32 %v1335_v63, %v1287_v60  ;;  %v1970_v63 = vor.u32 %v2441_v51, %v1969_v49  ;;  %v2033_v49 = vld [vmem:[%s2655_s9 + $0x180] sm:$0xf]  ;;  %v2458_v51 = vld [vmem:[%s2655_s9 + $0x1a0] sm:$0xf0] }
  0xe0   : > { %v1384_v1 = vpop.f32.mrf.mxu3  ;;  %v1288_v4 = vpop.f32.mrf.mxu1 }
  0xe1   : > { %v1385_v5 = vadd.f32 %v1384_v1, %v1336_v0  ;;  %v1289_v7 = vadd.f32 %v1288_v4, %v1239_v13 }
  0xe2   : > { %v1435_v8 = vpop.f32.mrf.mxu0 }
  0xe3   : > { %v2978_v15 = vadd.f32 %v1433_v61, %v1385_v5  ;;  %v1966_v61 = vor.u32 %v2436_v47, %v1963_v48  ;;  %v2027_v47 = vld [vmem:[%s2655_s9 + $0x19c] sm:$0xf0] }
  0xe6   : > { %v1337_v24 = vpop.f32.mrf.mxu2 }
  0xe7   : > { %v1338_v25 = vadd.f32 %v1337_v24, %v1289_v7  ;;  %v2445_v24 = vld [vmem:[%s2655_s9 + $0x13c] sm:$0xf] }
  0xe8   : > { %v1386_v26 = vpop.f32.mrf.mxu3  ;;  %v1291_v29 = vpop.f32.mrf.mxu1 }
  0xe9   : > { %v1387_v13 = vadd.f32 %v1386_v26, %v1338_v25  ;;  %v1292_v32 = vadd.f32 %v1291_v29, %v2924_v50  ;;  %v1999_v25 = vld [vmem:[%s2655_s9 + $0x15c] sm:$0xf0] }
  0xea   : > { %v1438_v33 = vpop.f32.mrf.mxu0  ;;  %v2005_v26 = vld [vmem:[%s2655_s9 + $0x140] sm:$0xf] }
  0xeb   : > { %1486 = vmatmul.bf16.gmra.mxu1 %v1922_v27  ;;  %1535 = vmatmul.bf16.gmra.mxu2 %v1926_v28  ;;  %v2987_v34 = vadd.f32 %v1435_v8, %v1387_v13  ;;  %v2450_v27 = vld [vmem:[%s2655_s9 + $0x160] sm:$0xf0]  ;;  %v1998_v13 = vor.u32 %v2449_v21, %v1997_v20 }
  0xec   : > { %v2462_v21 = vld [vmem:[%s2655_s9 + $0x1c4] sm:$0xf] }
  0xed   : > { %1584 = vmatmul.bf16.gmra.mxu3 %v1930_v30  ;;  %1633 = vmatmul.bf16.gmra.mxu0 %v1934_v31  ;;  %v1994_v31 = vor.u32 %v2444_v17, %v1991_v18 }
  0xee   : > { %v1340_v35 = vpop.f32.mrf.mxu2 }
  0xef   : > { %v1341_v36 = vadd.f32 %v1340_v35, %v1292_v32 }
  0xf0   : > { %v1389_v37 = vpop.f32.mrf.mxu3  ;;  %v1293_v38 = vpop.f32.mrf.mxu1 }
  0xf1   : > { %v1390_v39 = vadd.f32 %v1389_v37, %v1341_v36  ;;  %v1294_v50 = vadd.f32 %v1293_v38, %v2930_v56 }
  0xf2   : > { %v1440_v41 = vpop.f32.mrf.mxu0 }
  0xf3   : > { %v2992_v44 = vadd.f32 %v1438_v33, %v1390_v39  ;;  %v2002_v33 = vor.u32 %v2445_v24, %v1999_v25  ;;  %v2063_v24 = vld [vmem:[%s2655_s9 + $0x1e4] sm:$0xf0] }
  0xf6   : > { %v1342_v52 = vpop.f32.mrf.mxu2 }
  0xf7   : > { %v1343_v53 = vadd.f32 %v1342_v52, %v1294_v50  ;;  %v2454_v52 = vld [vmem:[%s2655_s9 + $0x184] sm:$0xf] }
  0xf8   : > { %v1391_v58 = vpop.f32.mrf.mxu3  ;;  %v1296_v60 = vpop.f32.mrf.mxu1 }
  0xf9   : > { %v1392_v56 = vadd.f32 %v1391_v58, %v1343_v53  ;;  %v1297_v0 = vadd.f32 %v1296_v60, %v2944_v6  ;;  %v2035_v58 = vld [vmem:[%s2655_s9 + $0x1a4] sm:$0xf0] }
  0xfa   : > { %v1443_v1 = vpop.f32.mrf.mxu0 }
  0xfb   : > { %1491 = vmatmul.bf16.gmra.mxu1 %v1958_v59  ;;  %1540 = vmatmul.bf16.gmra.mxu2 %v1962_v57  ;;  %v3001_v4 = vadd.f32 %v1440_v41, %v1392_v56  ;;  %v2041_v59 = vld [vmem:[%s2655_s9 + $0x188] sm:$0xf]  ;;  %v2459_v57 = vld [vmem:[%s2655_s9 + $0x1a8] sm:$0xf0]  ;;  %v2034_v56 = vor.u32 %v2458_v51, %v2033_v49 }
  0xfd   : > { %1589 = vmatmul.bf16.gmra.mxu3 %v1966_v61  ;;  %1638 = vmatmul.bf16.gmra.mxu0 %v1970_v63  ;;  %v2030_v63 = vor.u32 %v2453_v46, %v2027_v47 }
  0xfe   : > { %v1345_v5 = vpop.f32.mrf.mxu2 }
  0xff   : > { %v1346_v7 = vadd.f32 %v1345_v5, %v1297_v0  ;;  %v2042_v5 = vor.u32 %v2459_v57, %v2041_v59  ;;  %v2105_v59 = vld [vmem:[%s2655_s9 + $0x210] sm:$0xf]  ;;  %v2476_v57 = vld [vmem:[%s2655_s9 + $0x230] sm:$0xf0] }
 0x100   : > { %v1394_v8 = vpop.f32.mrf.mxu3  ;;  %v1298_v9 = vpop.f32.mrf.mxu1 }
 0x101   : > { %v1395_v14 = vadd.f32 %v1394_v8, %v1346_v7  ;;  %v1299_v6 = vadd.f32 %v1298_v9, %v2950_v12  ;;  %v2006_v12 = vor.u32 %v2450_v27, %v2005_v26  ;;  %v2069_v26 = vld [vmem:[%s2655_s9 + $0x1c8] sm:$0xf]  ;;  %v2467_v27 = vld [vmem:[%s2655_s9 + $0x1e8] sm:$0xf0] }
 0x102   : > { %v1445_v16 = vpop.f32.mrf.mxu0 }
 0x103   : > { %v3006_v19 = vadd.f32 %v1443_v1, %v1395_v14  ;;  %v2038_v1 = vor.u32 %v2454_v52, %v2035_v58  ;;  %v2471_v52 = vld [vmem:[%s2655_s9 + $0x20c] sm:$0xf] }
 0x106   : > { %v1347_v28 = vpop.f32.mrf.mxu2 }
 0x107   : > { %v1348_v29 = vadd.f32 %v1347_v28, %v1299_v6  ;;  %v2463_v28 = vld [vmem:[%s2655_s9 + $0x1cc] sm:$0xf] }
 0x108   : > { %v1396_v30 = vpop.f32.mrf.mxu3  ;;  %v1301_v32 = vpop.f32.mrf.mxu1 }
 0x109   : > { %v1397_v35 = vadd.f32 %v1396_v30, %v1348_v29  ;;  %v1302_v38 = vadd.f32 %v1301_v32, %v2926_v54  ;;  %v2071_v30 = vld [vmem:[%s2655_s9 + $0x1ec] sm:$0xf0] }
 0x10a   : > { %v1448_v36 = vpop.f32.mrf.mxu0 }
 0x10b   : > { %1496 = vmatmul.bf16.gmra.mxu1 %v1994_v31  ;;  %1545 = vmatmul.bf16.gmra.mxu2 %v1998_v13  ;;  %v3014_v37 = vadd.f32 %v1445_v16, %v1397_v35  ;;  %v2077_v31 = vld [vmem:[%s2655_s9 + $0x1d0] sm:$0xf]  ;;  %v2468_v13 = vld [vmem:[%s2655_s9 + $0x1f0] sm:$0xf0]  ;;  %v2070_v35 = vor.u32 %v2467_v27, %v2069_v26 }
 0x10d   : > { %1594 = vmatmul.bf16.gmra.mxu3 %v2002_v33  ;;  %1643 = vmatmul.bf16.gmra.mxu0 %v2006_v12  ;;  %v2066_v12 = vor.u32 %v2462_v21, %v2063_v24 }
 0x10e   : > { %v1350_v39 = vpop.f32.mrf.mxu2 }
 0x10f   : > { %v1351_v50 = vadd.f32 %v1350_v39, %v1302_v38  ;;  %v2074_v38 = vor.u32 %v2463_v28, %v2071_v30  ;;  %v2078_v39 = vor.u32 %v2468_v13, %v2077_v31 }
 0x110   : > { %v1399_v41 = vpop.f32.mrf.mxu3  ;;  %v1303_v42 = vpop.f32.mrf.mxu1 }
 0x111   : > { %v1400_v43 = vadd.f32 %v1399_v41, %v1351_v50  ;;  %v1304_v53 = vadd.f32 %v1303_v42, %v2940_v2 }
 0x112   : > { %v1450_v45 = vpop.f32.mrf.mxu0 }
 0x113   : > { %v3019_v48 = vadd.f32 %v1448_v36, %v1400_v43 }
 0x116   : > { %v1352_v54 = vpop.f32.mrf.mxu2 }
 0x117   : > { %v1353_v60 = vadd.f32 %v1352_v54, %v1304_v53  ;;  %v2099_v53 = vld [vmem:[%s2655_s9 + $0x22c] sm:$0xf0]  ;;  %v2472_v54 = vld [vmem:[%s2655_s9 + $0x214] sm:$0xf] }
 0x118   : > { %v1401_v61 = vpop.f32.mrf.mxu3  ;;  %v1306_v0 = vpop.f32.mrf.mxu1 }
 0x119   : > { %v1402_v7 = vadd.f32 %v1401_v61, %v1353_v60  ;;  %v1307_v9 = vadd.f32 %v1306_v0, %v2946_v10  ;;  %v2107_v61 = vld [vmem:[%s2655_s9 + $0x234] sm:$0xf0] }
 0x11a   : > { %v1453_v8 = vpop.f32.mrf.mxu0 }
 0x11b   : > { %1501 = vmatmul.bf16.gmra.mxu1 %v2030_v63  ;;  %1550 = vmatmul.bf16.gmra.mxu2 %v2034_v56  ;;  %v3028_v2 = vadd.f32 %v1450_v45, %v1402_v7  ;;  %v2113_v63 = vld [vmem:[%s2655_s9 + $0x218] sm:$0xf]  ;;  %v2477_v56 = vld [vmem:[%s2655_s9 + $0x238] sm:$0xf0]  ;;  %v2106_v7 = vor.u32 %v2476_v57, %v2105_v59  ;;  %s1826_s9 = sshll.u32 %s3209_s23, 3 }
 0x11c   : > { %s3069_s10 = scalar_lea.vmem %s3205_s2, %s1826_s9 }
 0x11d   : > { %1599 = vmatmul.bf16.gmra.mxu3 %v2038_v1  ;;  %1648 = vmatmul.bf16.gmra.mxu0 %v2042_v5  ;;  %v2102_v5 = vor.u32 %v2471_v52, %v2099_v53 }
 0x11e   : > { %v1355_v14 = vpop.f32.mrf.mxu2 }
 0x11f   : > { %v1356_v6 = vadd.f32 %v1355_v14, %v1307_v9  ;;  %v2110_v9 = vor.u32 %v2472_v54, %v2107_v61  ;;  %v2114_v14 = vor.u32 %v2477_v56, %v2113_v63 }
 0x120   : > { %v1404_v16 = vpop.f32.mrf.mxu3  ;;  %v1308_v17 = vpop.f32.mrf.mxu1 }
 0x121   : > { %v1405_v18 = vadd.f32 %v1404_v16, %v1356_v6  ;;  %v1309_v29 = vadd.f32 %v1308_v17, %v2960_v22 }
 0x122   : > { %v1455_v20 = vpop.f32.mrf.mxu0 }
 0x123   : > { %v3033_v25 = vadd.f32 %v1453_v8, %v1405_v18 }
 0x126   : > { %v1357_v10 = vpop.f32.mrf.mxu2 }
 0x127   : > { %v1358_v32 = vadd.f32 %v1357_v10, %v1309_v29 }
 0x128   : > { %v1406_v33 = vpop.f32.mrf.mxu3  ;;  %v1311_v36 = vpop.f32.mrf.mxu1 }
 0x129   : > { %v1407_v50 = vadd.f32 %v1406_v33, %v1358_v32  ;;  %v1312_v42 = vadd.f32 %v1311_v36, %v2928_v55 }
 0x12a   : > { %v1458_v41 = vpop.f32.mrf.mxu0 }
 0x12b   : > { %1506 = vmatmul.bf16.gmra.mxu1 %v2066_v12  ;;  %1555 = vmatmul.bf16.gmra.mxu2 %v2070_v35  ;;  %v3042_v22 = vadd.f32 %v1455_v20, %v1407_v50 }
 0x12d   : > { %1604 = vmatmul.bf16.gmra.mxu3 %v2074_v38  ;;  %1653 = vmatmul.bf16.gmra.mxu0 %v2078_v39 }
 0x12e   : > { %v1360_v43 = vpop.f32.mrf.mxu2 }
 0x12f   : > { %v1361_v45 = vadd.f32 %v1360_v43, %v1312_v42 }
 0x130   : > { %v1409_v46 = vpop.f32.mrf.mxu3  ;;  %v1313_v47 = vpop.f32.mrf.mxu1 }
 0x131   : > { %v1410_v49 = vadd.f32 %v1409_v46, %v1361_v45  ;;  %v1314_v60 = vadd.f32 %v1313_v47, %v2942_v3 }
 0x132   : > { %v1460_v51 = vpop.f32.mrf.mxu0 }
 0x133   : > { %v3047_v58 = vadd.f32 %v1458_v41, %v1410_v49 }
 0x136   : > { %v1362_v55 = vpop.f32.mrf.mxu2 }
 0x137   : > { %v1363_v0 = vadd.f32 %v1362_v55, %v1314_v60 }
 0x138   : > { %v1411_v1 = vpop.f32.mrf.mxu3  ;;  %v1316_v8 = vpop.f32.mrf.mxu1 }
 0x139   : > { %v1412_v6 = vadd.f32 %v1411_v1, %v1363_v0  ;;  %v1317_v3 = vadd.f32 %v1316_v8, %v2948_v11 }
 0x13a   : > { %v1463_v16 = vpop.f32.mrf.mxu0 }
 0x13b   : > { %1511 = vmatmul.bf16.gmra.mxu1 %v2102_v5  ;;  %1560 = vmatmul.bf16.gmra.mxu2 %v2106_v7  ;;  %v3056_v17 = vadd.f32 %v1460_v51, %v1412_v6 }
 0x13d   : > { %1609 = vmatmul.bf16.gmra.mxu3 %v2110_v9  ;;  %1658 = vmatmul.bf16.gmra.mxu0 %v2114_v14 }
 0x13e   : > { %v1365_v18 = vpop.f32.mrf.mxu2 }
 0x13f   : > { %v1366_v20 = vadd.f32 %v1365_v18, %v1317_v3 }
 0x140   : > { %v1414_v21 = vpop.f32.mrf.mxu3  ;;  %v1318_v24 = vpop.f32.mrf.mxu1 }
 0x141   : > { %v1415_v26 = vadd.f32 %v1414_v21, %v1366_v20  ;;  %v1319_v29 = vadd.f32 %v1318_v24, %v2962_v23 }
 0x142   : > { %v1465_v27 = vpop.f32.mrf.mxu0 }
 0x143   : > { %v3059_v28 = vadd.f32 %v1463_v16, %v1415_v26 }
 0x146   : > { %v1367_v30 = vpop.f32.mrf.mxu2 }
 0x147   : > { %v1368_v31 = vadd.f32 %v1367_v30, %v1319_v29 }
 0x148   : > { %v1416_v13 = vpop.f32.mrf.mxu3  ;;  %v1477_v10 = vpop.f32.mrf.mxu1 }
 0x149   : > { %v1417_v32 = vadd.f32 %v1416_v13, %v1368_v31  ;;  %v1478_v11 = vadd.f32 %v1477_v10, %v2966_v40 }
 0x14a   : > { %v1624_v33 = vpop.f32.mrf.mxu0 }
 0x14b   : > { %v3062_v12 = vadd.f32 %v1465_v27, %v1417_v32 }
 0x14e   : > { %v1526_v35 = vpop.f32.mrf.mxu2 }
 0x14f   : > { %v1527_v36 = vadd.f32 %v1526_v35, %v1478_v11 }
 0x150   : > { %v1575_v38 = vpop.f32.mrf.mxu3  ;;  %v1479_v39 = vpop.f32.mrf.mxu1 }
 0x151   : > { %v1576_v50 = vadd.f32 %v1575_v38, %v1527_v36  ;;  %v1480_v40 = vadd.f32 %v1479_v39, %v2974_v62 }
 0x152   : > { %v1626_v41 = vpop.f32.mrf.mxu0 }
 0x153   : > { %v3071_v23 = vadd.f32 %v1624_v33, %v1576_v50 }
 0x155   : > { %1664 = vst [vmem:[%s3069_s10] sm:$0xff] %v3071_v23 }
 0x156   : > { %v1528_v42 = vpop.f32.mrf.mxu2 }
 0x157   : > { %v1529_v43 = vadd.f32 %v1528_v42, %v1480_v40 }
 0x158   : > { %v1577_v45 = vpop.f32.mrf.mxu3  ;;  %v1482_v46 = vpop.f32.mrf.mxu1 }
 0x159   : > { %v1578_v47 = vadd.f32 %v1577_v45, %v1529_v43  ;;  %v1483_v52 = vadd.f32 %v1482_v46, %v2978_v15 }
 0x15a   : > { %v1629_v49 = vpop.f32.mrf.mxu0 }
 0x15b   : > { %v3076_v51 = vadd.f32 %v1626_v41, %v1578_v47 }
 0x15d   : > { %1665 = vst [vmem:[%s3069_s10 + $0x8] sm:$0xff] %v3076_v51 }
 0x15e   : > { %v1531_v53 = vpop.f32.mrf.mxu2 }
 0x15f   : > { %v1532_v59 = vadd.f32 %v1531_v53, %v1483_v52 }
 0x160   : > { %v1580_v57 = vpop.f32.mrf.mxu3  ;;  %v1484_v54 = vpop.f32.mrf.mxu1 }
 0x161   : > { %v1581_v60 = vadd.f32 %v1580_v57, %v1532_v59  ;;  %v1485_v63 = vadd.f32 %v1484_v54, %v2987_v34 }
 0x162   : > { %v1631_v62 = vpop.f32.mrf.mxu0 }
 0x163   : > { %v3081_v61 = vadd.f32 %v1629_v49, %v1581_v60 }
 0x165   : > { %1666 = vst [vmem:[%s3069_s10 + $0x10] sm:$0xff] %v3081_v61 }
 0x166   : > { %v1533_v56 = vpop.f32.mrf.mxu2 }
 0x167   : > { %v1534_v55 = vadd.f32 %v1533_v56, %v1485_v63 }
 0x168   : > { %v1582_v0 = vpop.f32.mrf.mxu3  ;;  %v1487_v1 = vpop.f32.mrf.mxu1 }
 0x169   : > { %v1583_v5 = vadd.f32 %v1582_v0, %v1534_v55  ;;  %v1488_v8 = vadd.f32 %v1487_v1, %v2992_v44 }
 0x16a   : > { %v1634_v15 = vpop.f32.mrf.mxu0 }
 0x16b   : > { %v3086_v7 = vadd.f32 %v1631_v62, %v1583_v5 }
 0x16d   : > { %1667 = vst [vmem:[%s3069_s10 + $0x18] sm:$0xff] %v3086_v7 }
 0x16e   : > { %v1536_v9 = vpop.f32.mrf.mxu2 }
 0x16f   : > { %v1537_v14 = vadd.f32 %v1536_v9, %v1488_v8 }
 0x170   : > { %v1585_v6 = vpop.f32.mrf.mxu3  ;;  %v1489_v16 = vpop.f32.mrf.mxu1 }
 0x171   : > { %v1586_v3 = vadd.f32 %v1585_v6, %v1537_v14  ;;  %v1490_v20 = vadd.f32 %v1489_v16, %v3001_v4 }
 0x172   : > { %v1636_v34 = vpop.f32.mrf.mxu0 }
 0x173   : > { %v3091_v18 = vadd.f32 %v1634_v15, %v1586_v3 }
 0x175   : > { %1668 = vst [vmem:[%s3069_s10 + $0x20] sm:$0xff] %v3091_v18 }
 0x176   : > { %v1538_v21 = vpop.f32.mrf.mxu2 }
 0x177   : > { %v1539_v24 = vadd.f32 %v1538_v21, %v1490_v20 }
 0x178   : > { %v1587_v26 = vpop.f32.mrf.mxu3  ;;  %v1492_v27 = vpop.f32.mrf.mxu1 }
 0x179   : > { %v1588_v29 = vadd.f32 %v1587_v26, %v1539_v24  ;;  %v1493_v31 = vadd.f32 %v1492_v27, %v3006_v19 }
 0x17a   : > { %v1639_v44 = vpop.f32.mrf.mxu0 }
 0x17b   : > { %v3096_v30 = vadd.f32 %v1636_v34, %v1588_v29 }
 0x17d   : > { %1669 = vst [vmem:[%s3069_s10 + $0x28] sm:$0xff] %v3096_v30 }
 0x17e   : > { %v1541_v13 = vpop.f32.mrf.mxu2 }
 0x17f   : > { %v1542_v10 = vadd.f32 %v1541_v13, %v1493_v31 }
 0x180   : > { %v1590_v32 = vpop.f32.mrf.mxu3  ;;  %v1494_v33 = vpop.f32.mrf.mxu1 }
 0x181   : > { %v1591_v11 = vadd.f32 %v1590_v32, %v1542_v10  ;;  %v1495_v36 = vadd.f32 %v1494_v33, %v3014_v37 }
 0x182   : > { %v1641_v4 = vpop.f32.mrf.mxu0 }
 0x183   : > { %v3101_v35 = vadd.f32 %v1639_v44, %v1591_v11 }
 0x185   : > { %1670 = vst [vmem:[%s3069_s10 + $0x30] sm:$0xff] %v3101_v35 }
 0x186   : > { %v1543_v38 = vpop.f32.mrf.mxu2 }
 0x187   : > { %v1544_v39 = vadd.f32 %v1543_v38, %v1495_v36 }
 0x188   : > { %v1592_v50 = vpop.f32.mrf.mxu3  ;;  %v1497_v41 = vpop.f32.mrf.mxu1 }
 0x189   : > { %v1593_v40 = vadd.f32 %v1592_v50, %v1544_v39  ;;  %v1498_v43 = vadd.f32 %v1497_v41, %v3019_v48 }
 0x18a   : > { %v1644_v19 = vpop.f32.mrf.mxu0 }
 0x18b   : > { %v3106_v42 = vadd.f32 %v1641_v4, %v1593_v40 }
 0x18d   : > { %1671 = vst [vmem:[%s3069_s10 + $0x38] sm:$0xff] %v3106_v42 }
 0x18e   : > { %v1546_v45 = vpop.f32.mrf.mxu2 }
 0x18f   : > { %v1547_v46 = vadd.f32 %v1546_v45, %v1498_v43 }
 0x190   : > { %v1595_v47 = vpop.f32.mrf.mxu3  ;;  %v1499_v49 = vpop.f32.mrf.mxu1 }
 0x191   : > { %v1596_v52 = vadd.f32 %v1595_v47, %v1547_v46  ;;  %v1500_v59 = vadd.f32 %v1499_v49, %v3028_v2 }
 0x192   : > { %v1646_v37 = vpop.f32.mrf.mxu0 }
 0x193   : > { %v3111_v53 = vadd.f32 %v1644_v19, %v1596_v52 }
 0x195   : > { %1672 = vst [vmem:[%s3069_s10 + $0x40] sm:$0xff] %v3111_v53 }
 0x196   : > { %v1548_v57 = vpop.f32.mrf.mxu2 }
 0x197   : > { %v1549_v54 = vadd.f32 %v1548_v57, %v1500_v59 }
 0x198   : > { %v1597_v60 = vpop.f32.mrf.mxu3  ;;  %v1502_v62 = vpop.f32.mrf.mxu1 }
 0x199   : > { %v1598_v63 = vadd.f32 %v1597_v60, %v1549_v54  ;;  %v1503_v55 = vadd.f32 %v1502_v62, %v3033_v25 }
 0x19a   : > { %v1649_v48 = vpop.f32.mrf.mxu0 }
 0x19b   : > { %v3116_v56 = vadd.f32 %v1646_v37, %v1598_v63 }
 0x19d   : > { %1673 = vst [vmem:[%s3069_s10 + $0x48] sm:$0xff] %v3116_v56 }
 0x19e   : > { %v1551_v0 = vpop.f32.mrf.mxu2 }
 0x19f   : > { %v1552_v1 = vadd.f32 %v1551_v0, %v1503_v55 }
 0x1a0   : > { %v1600_v5 = vpop.f32.mrf.mxu3  ;;  %v1504_v15 = vpop.f32.mrf.mxu1 }
 0x1a1   : > { %v1601_v8 = vadd.f32 %v1600_v5, %v1552_v1  ;;  %v1505_v14 = vadd.f32 %v1504_v15, %v3042_v22 }
 0x1a2   : > { %v1651_v2 = vpop.f32.mrf.mxu0 }
 0x1a3   : > { %v3121_v9 = vadd.f32 %v1649_v48, %v1601_v8 }
 0x1a5   : > { %1674 = vst [vmem:[%s3069_s10 + $0x50] sm:$0xff] %v3121_v9 }
 0x1a6   : > { %v1553_v6 = vpop.f32.mrf.mxu2 }
 0x1a7   : > { %v1554_v16 = vadd.f32 %v1553_v6, %v1505_v14 }
 0x1a8   : > { %v1602_v3 = vpop.f32.mrf.mxu3  ;;  %v1507_v34 = vpop.f32.mrf.mxu1 }
 0x1a9   : > { %v1603_v20 = vadd.f32 %v1602_v3, %v1554_v16  ;;  %v1508_v24 = vadd.f32 %v1507_v34, %v3047_v58 }
 0x1aa   : > { %v1654_v21 = vpop.f32.mrf.mxu0 }
 0x1ab   : > { %v3126_v25 = vadd.f32 %v1651_v2, %v1603_v20 }
 0x1ad   : > { %1675 = vst [vmem:[%s3069_s10 + $0x58] sm:$0xff] %v3126_v25 }
 0x1ae   : > { %v1556_v26 = vpop.f32.mrf.mxu2 }
 0x1af   : > { %v1557_v27 = vadd.f32 %v1556_v26, %v1508_v24 }
 0x1b0   : > { %v1605_v29 = vpop.f32.mrf.mxu3  ;;  %v1509_v44 = vpop.f32.mrf.mxu1 }
 0x1b1   : > { %v1606_v31 = vadd.f32 %v1605_v29, %v1557_v27  ;;  %v1510_v13 = vadd.f32 %v1509_v44, %v3056_v17 }
 0x1b2   : > { %v1656_v10 = vpop.f32.mrf.mxu0 }
 0x1b3   : > { %v3131_v22 = vadd.f32 %v1654_v21, %v1606_v31 }
 0x1b5   : > { %1676 = vst [vmem:[%s3069_s10 + $0x60] sm:$0xff] %v3131_v22 }
 0x1b6   : > { %v1558_v32 = vpop.f32.mrf.mxu2 }
 0x1b7   : > { %v1559_v33 = vadd.f32 %v1558_v32, %v1510_v13 }
 0x1b8   : > { %v1607_v11 = vpop.f32.mrf.mxu3  ;;  %v1512_v4 = vpop.f32.mrf.mxu1 }
 0x1b9   : > { %v1608_v36 = vadd.f32 %v1607_v11, %v1559_v33  ;;  %v1513_v38 = vadd.f32 %v1512_v4, %v3059_v28 }
 0x1ba   : > { %v1659_v40 = vpop.f32.mrf.mxu0 }
 0x1bb   : > { %v1657_v58 = vadd.f32 %v1656_v10, %v1608_v36 }
 0x1bd   : > { %1677 = vst [vmem:[%s3069_s10 + $0x68] sm:$0xff] %v1657_v58 }
 0x1be   : > { %v1561_v39 = vpop.f32.mrf.mxu2 }
 0x1bf   : > { %v1562_v50 = vadd.f32 %v1561_v39, %v1513_v38 }
 0x1c0   : > { %v1610_v41 = vpop.f32.mrf.mxu3  ;;  %v1514_v43 = vpop.f32.mrf.mxu1 }
 0x1c1   : > { %v1611_v19 = vadd.f32 %v1610_v41, %v1562_v50  ;;  %v1515_v17 = vadd.f32 %v1514_v43, %v3062_v12 }
 0x1c2   : > { %v1661_v37 = vpop.f32.mrf.mxu0 }
 0x1c3   : > { %v1660_v45 = vadd.f32 %v1659_v40, %v1611_v19 }
 0x1c5   : > { %1678 = vst [vmem:[%s3069_s10 + $0x70] sm:$0xff] %v1660_v45 }
 0x1c6   : > { %v1563_v46 = vpop.f32.mrf.mxu2 }
 0x1c7   : > { %v1564_v47 = vadd.f32 %v1563_v46, %v1515_v17 }
 0x1c8   : > { %v1612_v49 = vpop.f32.mrf.mxu3 }
 0x1c9   : > { %v1613_v52 = vadd.f32 %v1612_v49, %v1564_v47  ;;  %1683 = sbr.rel (%p2403_p4) target bundleno = 465 (0x1d1), region = 32 }
 0x1cb   : > { %v1662_v59 = vadd.f32 %v1661_v37, %v1613_v52 }
 0x1cd   : > { %1679 = vst [vmem:[%s3069_s10 + $0x78] sm:$0xff] %v1662_v59 }
 0x1ce   : > { %v2592_v28 = vmov 0.0  }
 0x1cf   : > { %1684 = vst [vmem:[%s3206_s3] sm:$0x1] %v2592_v28 }
 0x1d0   : > { %1685 = vst [vmem:[%s3207_s4] sm:$0x1] %v2592_v28 }
 0x1d1 PF: > { %v1687_v12 = vadd.f32 %v3076_v51, %v3071_v23  ;;  %v1711_v57 = vmul.f32 %v3071_v23, %v3071_v23  ;;  %v1712_v54 = vmul.f32 %v3076_v51, %v3076_v51  ;;  %v1713_v62 = vmul.f32 %v3081_v61, %v3081_v61 }
 0x1d2   : > { %v1714_v48 = vmul.f32 %v3086_v7, %v3086_v7  ;;  %v1715_v1 = vmul.f32 %v3091_v18, %v3091_v18  ;;  %v1716_v51 = vmul.f32 %v3096_v30, %v3096_v30  ;;  %v1717_v8 = vmul.f32 %v3101_v35, %v3101_v35 }
 0x1d3   : > { %v1688_v60 = vadd.f32 %v1687_v12, %v3081_v61  ;;  %v1727_v55 = vadd.f32 %v1712_v54, %v1711_v57  ;;  %v1718_v14 = vmul.f32 %v3106_v42, %v3106_v42  ;;  %v1719_v16 = vmul.f32 %v3111_v53, %v3111_v53 }
 0x1d4   : > { %v1720_v34 = vmul.f32 %v3116_v56, %v3116_v56  ;;  %v1721_v21 = vmul.f32 %v3121_v9, %v3121_v9  ;;  %v1722_v26 = vmul.f32 %v3126_v25, %v3126_v25  ;;  %v1723_v29 = vmul.f32 %v3131_v22, %v3131_v22 }
 0x1d5   : > { %v1689_v63 = vadd.f32 %v1688_v60, %v3086_v7  ;;  %v1728_v23 = vadd.f32 %v1727_v55, %v1713_v62  ;;  %v1724_v31 = vmul.f32 %v1657_v58, %v1657_v58  ;;  %v1725_v32 = vmul.f32 %v1660_v45, %v1660_v45 }
 0x1d6   : > { %v1726_v11 = vmul.f32 %v1662_v59, %v1662_v59 }
 0x1d7   : > { %v1690_v0 = vadd.f32 %v1689_v63, %v3091_v18  ;;  %v1729_v15 = vadd.f32 %v1728_v23, %v1714_v48  ;;  %v1710_v49 = vld [vmem:[%s3207_s4] sm:$0x1] }
 0x1d9   : > { %v1691_v5 = vadd.f32 %v1690_v0, %v3096_v30  ;;  %v1730_v2 = vadd.f32 %v1729_v15, %v1715_v1 }
 0x1db   : > { %v1692_v61 = vadd.f32 %v1691_v5, %v3101_v35  ;;  %v1731_v6 = vadd.f32 %v1730_v2, %v1716_v51 }
 0x1dd   : > { %v1693_v7 = vadd.f32 %v1692_v61, %v3106_v42  ;;  %v1732_v3 = vadd.f32 %v1731_v6, %v1717_v8 }
 0x1df   : > { %v1694_v18 = vadd.f32 %v1693_v7, %v3111_v53  ;;  %v1733_v20 = vadd.f32 %v1732_v3, %v1718_v14 }
 0x1e1   : > { %v1695_v30 = vadd.f32 %v1694_v18, %v3116_v56  ;;  %v1734_v24 = vadd.f32 %v1733_v20, %v1719_v16 }
 0x1e3   : > { %v1696_v35 = vadd.f32 %v1695_v30, %v3121_v9  ;;  %v1735_v27 = vadd.f32 %v1734_v24, %v1720_v34 }
 0x1e5   : > { %v1697_v42 = vadd.f32 %v1696_v35, %v3126_v25  ;;  %v1736_v44 = vadd.f32 %v1735_v27, %v1721_v21 }
 0x1e7   : > { %v1698_v53 = vadd.f32 %v1697_v42, %v3131_v22  ;;  %v1737_v13 = vadd.f32 %v1736_v44, %v1722_v26 }
 0x1e9   : > { %v1699_v56 = vadd.f32 %v1698_v53, %v1657_v58  ;;  %v1738_v33 = vadd.f32 %v1737_v13, %v1723_v29  ;;  %v1686_v58 = vld [vmem:[%s3206_s3] sm:$0x1] }
 0x1eb   : > { %v1700_v10 = vadd.f32 %v1699_v56, %v1660_v45  ;;  %v1739_v4 = vadd.f32 %v1738_v33, %v1724_v31 }
 0x1ed   : > { %v1701_v9 = vadd.f32 %v1700_v10, %v1662_v59  ;;  %v1740_v38 = vadd.f32 %v1739_v4, %v1725_v32 }
 0x1ef   : > { %v1702_v36 = vrot.slane %v1701_v9, 4  ;;  %v1741_v25 = vadd.f32 %v1740_v38, %v1726_v11 }
 0x1f1   : > { %v1703_v39 = vadd.f32 %v1702_v36, %v1701_v9  ;;  %v1742_v41 = vrot.slane %v1741_v25, 4 }
 0x1f3   : > { %v1704_v50 = vrot.slane %v1703_v39, 2  ;;  %v1743_v19 = vadd.f32 %v1742_v41, %v1741_v25 }
 0x1f5   : > { %v1705_v40 = vadd.f32 %v1704_v50, %v1703_v39  ;;  %v1744_v22 = vrot.slane %v1743_v19, 2 }
 0x1f7   : > { %v1706_v43 = vrot.slane %v1705_v40, 1  ;;  %v1745_v45 = vadd.f32 %v1744_v22, %v1743_v19 }
 0x1f9   : > { %v1707_v17 = vadd.f32 %v1706_v43, %v1705_v40  ;;  %v1746_v47 = vrot.slane %v1745_v45, 1 }
 0x1fb   : > { %v1708_v46 = vadd.f32 %v1707_v17, %v1686_v58  ;;  %v1747_v52 = vadd.f32 %v1746_v47, %v1745_v45 }
 0x1fd   : > { %1709 = vst [vmem:[%s3206_s3] sm:$0x1] %v1708_v46  ;;  %v1748_v37 = vadd.f32 %v1747_v52, %v1710_v49 }
 0x1ff   : > { %1749 = vst [vmem:[%s3207_s4] sm:$0x1] %v1748_v37 }
 0x200 PF: > { %s15_s15 = sadd.s32 1, %s2590_s15  }
 0x201   : > { %p12_p5 = scmp.ge.s32.totalorder %s15_s15, 6  }
 0x203   :  { %14 = sbr.rel (!%p12_p5) target bundleno = 1 (0x1), region = 78 }

// kernel: _lambda_.23
= control target key start
LH: loop header
LB: loop body
LE: loop exit
PB: predicated region body
PF: predicated region fallthrough
CT: control target
= control target key end

     0   :  { %s691_s21 = smov 0   ;;  %s841_s0 = inlined_call_operand.vmem [shape: f32[512,128], index: 0, kind: input, shape index: {}]   ;;  %s842_s1 = inlined_call_operand.vmem [shape: f32[1,128], index: 1, kind: input, shape index: {}]   ;;  %s843_s2 = inlined_call_operand.vmem [shape: f32[1,128], index: 2, kind: input, shape index: {}]   ;;  %s844_s3 = inlined_call_operand.vmem [shape: bf16[512,128], index: 3, kind: input, shape index: {}]   ;;  %s845_s4 = inlined_call_operand.vmem [shape: f32[1,128], index: 4, kind: input, shape index: {}]   ;;  %s846_s5 = inlined_call_operand.vmem [shape: f32[1,128], index: 5, kind: input, shape index: {}]   ;;  %s847_s6 = inlined_call_operand.vmem [shape: bf16[512,128], index: 6, kind: output, shape index: {}]  }
   0x1 LB: > { %s537_s22 = sadd.s32 4294967295, %s654_s21   ;;  %p541_p0 = scmp.ge.s32.totalorder %s654_s21, 1  ;;  %s654_s21 = sphi %s691_s21, %s16_s21  }
   0x2   : > { %p224_p1 = scmp.lt.s32.totalorder %s654_s21, 5 }
   0x4   : > { %p225_p2 = pnand %p541_p0, %p224_p1 }
   0x5   : > { %s542_s23 = sshll.u32 (!%p225_p2), %s537_s22, 4 }
   0x6   : > { %228 = sbr.rel (%p225_p2) target bundleno = 53 (0x35), region = 44  ;;  %p260_p3 = scmp.lt.s32.totalorder (!%p225_p2), %s542_s23, 63 }
   0xb   : > { %s849_s23 = smov (!%p260_p3, %s542_s23), 63  ;;  %v704_v0 = vld [vmem:[%s842_s1] ss:$0 sm:$0xff] }
   0xc   : > { %s543_s26 = sshll.u32 %s849_s23, 3  ;;  %s545_s27 = sshll.u32 %s849_s23, 2  ;;  %v723_v1 = vld [vmem:[%s843_s2] ss:$0 sm:$0xff] }
   0xd   : > { %s711_s30 = scalar_lea.vmem %s841_s0, %s543_s26  ;;  %s718_s9 = scalar_lea.vmem %s844_s3, %s545_s27  ;;  %v728_v2 = vld [vmem:[%s845_s4] ss:$0 sm:$0xff] }
   0xe   : > { %v733_v3 = vld [vmem:[%s846_s5] ss:$0 sm:$0xff]  ;;  %v278_v5 = vld [vmem:[%s711_s30 + $0x8] sm:$0xff]  ;;  %v279_v11 = vld [vmem:[%s711_s30 + $0x10] sm:$0xff]  ;;  %s776_s18 = scalar_lea.vmem %s847_s6, %s545_s27 }
   0xf   : > { %v277_v4 = vld [vmem:[%s711_s30] sm:$0xff]  ;;  %v298_v8 = vmul.f32 %v704_v0, %v278_v5  ;;  %v280_v12 = vld [vmem:[%s711_s30 + $0x18] sm:$0xff]  ;;  %v622_v13 = vld [vmem:[%s718_s9 + $0x8] sm:$0xff]   ;;  %v299_v14 = vmul.f32 %v704_v0, %v279_v11 }
  0x10   : > { %v551_v6 = vld [vmem:[%s718_s9] sm:$0xff]   ;;  %v297_v7 = vmul.f32 %v704_v0, %v277_v4  ;;  %v300_v15 = vmul.f32 %v704_v0, %v280_v12  ;;  %v556_v16 = vunpack.c.l.bf16 %v622_v13  ;;  %v557_v17 = vunpack.c.h.bf16 %v622_v13  ;;  %v282_v19 = vld [vmem:[%s711_s30 + $0x28] sm:$0xff]  ;;  %v623_v24 = vld [vmem:[%s718_s9 + $0x10] sm:$0xff]  }
  0x11   : > { %v552_v9 = vunpack.c.l.bf16 %v551_v6  ;;  %v553_v10 = vunpack.c.h.bf16 %v551_v6  ;;  %v281_v18 = vld [vmem:[%s711_s30 + $0x20] sm:$0xff]  ;;  %v318_v21 = vadd.f32 %v723_v1, %v298_v8  ;;  %v319_v25 = vadd.f32 %v723_v1, %v299_v14  ;;  %v283_v37 = vld [vmem:[%s711_s30 + $0x30] sm:$0xff]  ;;  %v284_v38 = vld [vmem:[%s711_s30 + $0x38] sm:$0xff] }
  0x12   : > { %v317_v20 = vadd.f32 %v723_v1, %v297_v7  ;;  %v320_v26 = vadd.f32 %v723_v1, %v300_v15  ;;  %v371_v27 = vmul.f32 %v728_v2, %v556_v16  ;;  %v372_v28 = vmul.f32 %v728_v2, %v557_v17  ;;  %v624_v47 = vld [vmem:[%s718_s9 + $0x18] sm:$0xff]   ;;  %v285_v56 = vld [vmem:[%s711_s30 + $0x40] sm:$0xff]  ;;  %v286_v57 = vld [vmem:[%s711_s30 + $0x48] sm:$0xff] }
  0x13   : > { %v369_v22 = vmul.f32 %v728_v2, %v552_v9  ;;  %v370_v23 = vmul.f32 %v728_v2, %v553_v10  ;;  %v301_v31 = vmul.f32 %v704_v0, %v281_v18  ;;  %v302_v32 = vmul.f32 %v704_v0, %v282_v19  ;;  %v625_v58 = vld [vmem:[%s718_s9 + $0x20] sm:$0xff]   ;;  %v287_v11 = vld [vmem:[%s711_s30 + $0x50] sm:$0xff]  ;;  %v288_v16 = vld [vmem:[%s711_s30 + $0x58] sm:$0xff] }
  0x14   : > { %v391_v33 = vadd.f32 %v733_v3, %v371_v27  ;;  %v392_v34 = vadd.f32 %v733_v3, %v372_v28  ;;  %v560_v35 = vunpack.c.l.bf16 %v623_v24  ;;  %v561_v36 = vunpack.c.h.bf16 %v623_v24  ;;  %v626_v17 = vld [vmem:[%s718_s9 + $0x28] sm:$0xff]  }
  0x15   : > { %v389_v29 = vadd.f32 %v733_v3, %v369_v22  ;;  %v390_v30 = vadd.f32 %v733_v3, %v370_v23  ;;  %v321_v41 = vadd.f32 %v723_v1, %v301_v31  ;;  %v322_v42 = vadd.f32 %v723_v1, %v302_v32 }
  0x16   : > { %v407_v43 = vadd.f32 %v391_v33, %v319_v25  ;;  %v408_v44 = vadd.f32 %v392_v34, %v320_v26  ;;  %v373_v45 = vmul.f32 %v728_v2, %v560_v35  ;;  %v374_v46 = vmul.f32 %v728_v2, %v561_v36  ;;  %v290_v35 = vld [vmem:[%s711_s30 + $0x68] sm:$0xff]  ;;  %v627_v36 = vld [vmem:[%s718_s9 + $0x30] sm:$0xff]  }
  0x17   : > { %v405_v39 = vadd.f32 %v389_v29, %v317_v20  ;;  %v406_v40 = vadd.f32 %v390_v30, %v318_v21  ;;  %v303_v50 = vmul.f32 %v704_v0, %v283_v37  ;;  %v304_v51 = vmul.f32 %v704_v0, %v284_v38  ;;  %v289_v30 = vld [vmem:[%s711_s30 + $0x60] sm:$0xff] }
  0x18   : > { %v423_v52 = vmax.f32 %v407_v43, 0.0  ;;  %v424_v53 = vmax.f32 %v408_v44, 0.0  ;;  %v393_v54 = vadd.f32 %v733_v3, %v373_v45  ;;  %v394_v55 = vadd.f32 %v733_v3, %v374_v46 }
  0x19   : > { %v421_v48 = vmax.f32 %v405_v39, 0.0  ;;  %v422_v49 = vmax.f32 %v406_v40, 0.0  ;;  %v323_v60 = vadd.f32 %v723_v1, %v303_v50  ;;  %v324_v61 = vadd.f32 %v723_v1, %v304_v51  ;;  %v292_v50 = vld [vmem:[%s711_s30 + $0x78] sm:$0xff] }
  0x1a   : > { %v564_v62 = vunpack.c.l.bf16 %v624_v47  ;;  %v590_v63 = vpack.c.bf16 %v424_v53, %v423_v52  ;;  %v409_v4 = vadd.f32 %v393_v54, %v321_v41  ;;  %v410_v5 = vadd.f32 %v394_v55, %v322_v42  ;;  %v628_v55 = vld [vmem:[%s718_s9 + $0x38] sm:$0xff]  }
  0x1b   : > { %v585_v59 = vpack.c.bf16 %v422_v49, %v421_v48  ;;  %v565_v6 = vunpack.c.h.bf16 %v624_v47  ;;  %v305_v8 = vmul.f32 %v704_v0, %v285_v56  ;;  %v306_v9 = vmul.f32 %v704_v0, %v286_v57  ;;  %v291_v49 = vld [vmem:[%s711_s30 + $0x70] sm:$0xff] }
  0x1c   : > { %v375_v7 = vmul.f32 %v728_v2, %v564_v62  ;;  %v568_v10 = vunpack.c.l.bf16 %v625_v58  ;;  %629 = vst [vmem:[%s776_s18 + $0x8] sm:$0xff] %v590_v63   ;;  %v425_v12 = vmax.f32 %v409_v4, 0.0  ;;  %v426_v13 = vmax.f32 %v410_v5, 0.0 }
  0x1d   : > { %586 = vst [vmem:[%s776_s18] sm:$0xff] %v585_v59   ;;  %v376_v14 = vmul.f32 %v728_v2, %v565_v6  ;;  %v569_v15 = vunpack.c.h.bf16 %v625_v58  ;;  %v325_v19 = vadd.f32 %v723_v1, %v305_v8  ;;  %v326_v20 = vadd.f32 %v723_v1, %v306_v9 }
  0x1e   : > { %v395_v18 = vadd.f32 %v733_v3, %v375_v7  ;;  %v377_v21 = vmul.f32 %v728_v2, %v568_v10  ;;  %v595_v22 = vpack.c.bf16 %v426_v13, %v425_v12  ;;  %v307_v25 = vmul.f32 %v704_v0, %v287_v11 }
  0x1f   : > { %v396_v23 = vadd.f32 %v733_v3, %v376_v14  ;;  %v378_v24 = vmul.f32 %v728_v2, %v569_v15  ;;  %v308_v28 = vmul.f32 %v704_v0, %v288_v16  ;;  %v572_v29 = vunpack.c.l.bf16 %v626_v17 }
  0x20   : > { %v411_v26 = vadd.f32 %v395_v18, %v323_v60  ;;  %v397_v27 = vadd.f32 %v733_v3, %v377_v21  ;;  %630 = vst [vmem:[%s776_s18 + $0x10] sm:$0xff] %v595_v22   ;;  %v327_v33 = vadd.f32 %v723_v1, %v307_v25  ;;  %v573_v34 = vunpack.c.h.bf16 %v626_v17 }
  0x21   : > { %v412_v31 = vadd.f32 %v396_v23, %v324_v61  ;;  %v398_v32 = vadd.f32 %v733_v3, %v378_v24  ;;  %v328_v39 = vadd.f32 %v723_v1, %v308_v28  ;;  %v379_v40 = vmul.f32 %v728_v2, %v572_v29 }
  0x22   : > { %v427_v37 = vmax.f32 %v411_v26, 0.0  ;;  %v413_v38 = vadd.f32 %v397_v27, %v325_v19  ;;  %v380_v43 = vmul.f32 %v728_v2, %v573_v34  ;;  %v309_v44 = vmul.f32 %v704_v0, %v289_v30 }
  0x23   : > { %v428_v41 = vmax.f32 %v412_v31, 0.0  ;;  %v414_v42 = vadd.f32 %v398_v32, %v326_v20  ;;  %v399_v46 = vadd.f32 %v733_v3, %v379_v40  ;;  %v310_v47 = vmul.f32 %v704_v0, %v290_v35 }
  0x24   : > { %v429_v45 = vmax.f32 %v413_v38, 0.0  ;;  %v576_v48 = vunpack.c.l.bf16 %v627_v36  ;;  %v400_v53 = vadd.f32 %v733_v3, %v380_v43  ;;  %v329_v54 = vadd.f32 %v723_v1, %v309_v44 }
  0x25   : > { %v600_v51 = vpack.c.bf16 %v428_v41, %v427_v37  ;;  %v430_v52 = vmax.f32 %v414_v42, 0.0  ;;  %v415_v56 = vadd.f32 %v399_v46, %v327_v33  ;;  %v330_v57 = vadd.f32 %v723_v1, %v310_v47 }
  0x26   : > { %v577_v58 = vunpack.c.h.bf16 %v627_v36  ;;  %v381_v59 = vmul.f32 %v728_v2, %v576_v48  ;;  %v416_v61 = vadd.f32 %v400_v53, %v328_v39  ;;  %v311_v62 = vmul.f32 %v704_v0, %v291_v49 }
  0x27   : > { %631 = vst [vmem:[%s776_s18 + $0x18] sm:$0xff] %v600_v51   ;;  %v605_v60 = vpack.c.bf16 %v430_v52, %v429_v45  ;;  %v312_v63 = vmul.f32 %v704_v0, %v292_v50  ;;  %v431_v4 = vmax.f32 %v415_v56, 0.0  ;;  %v580_v7 = vunpack.c.l.bf16 %v628_v55 }
  0x28   : > { %v382_v5 = vmul.f32 %v728_v2, %v577_v58  ;;  %v401_v6 = vadd.f32 %v733_v3, %v381_v59  ;;  %v432_v8 = vmax.f32 %v416_v61, 0.0  ;;  %v581_v9 = vunpack.c.h.bf16 %v628_v55 }
  0x29   : > { %632 = vst [vmem:[%s776_s18 + $0x20] sm:$0xff] %v605_v60   ;;  %v331_v12 = vadd.f32 %v723_v1, %v311_v62  ;;  %v383_v13 = vmul.f32 %v728_v2, %v580_v7  ;;  %v332_v0 = vadd.f32 %v723_v1, %v312_v63 }
  0x2a   : > { %v402_v10 = vadd.f32 %v733_v3, %v382_v5  ;;  %v417_v11 = vadd.f32 %v401_v6, %v329_v54  ;;  %v610_v14 = vpack.c.bf16 %v432_v8, %v431_v4  ;;  %v384_v15 = vmul.f32 %v728_v2, %v581_v9 }
  0x2b   : > { %v403_v18 = vadd.f32 %v733_v3, %v383_v13 }
  0x2c   : > { %v418_v16 = vadd.f32 %v402_v10, %v330_v57  ;;  %v433_v17 = vmax.f32 %v417_v11, 0.0  ;;  %633 = vst [vmem:[%s776_s18 + $0x28] sm:$0xff] %v610_v14   ;;  %v404_v19 = vadd.f32 %v733_v3, %v384_v15 }
  0x2d   : > { %v419_v21 = vadd.f32 %v403_v18, %v331_v12 }
  0x2e   : > { %v434_v20 = vmax.f32 %v418_v16, 0.0  ;;  %v420_v22 = vadd.f32 %v404_v19, %v332_v0 }
  0x2f   : > { %v435_v24 = vmax.f32 %v419_v21, 0.0 }
  0x30   : > { %v615_v23 = vpack.c.bf16 %v434_v20, %v433_v17  ;;  %v436_v25 = vmax.f32 %v420_v22, 0.0 }
  0x32   : > { %634 = vst [vmem:[%s776_s18 + $0x30] sm:$0xff] %v615_v23   ;;  %v620_v26 = vpack.c.bf16 %v436_v25, %v435_v24 }
  0x34   : > { %635 = vst [vmem:[%s776_s18 + $0x38] sm:$0xff] %v620_v26  }
  0x35 PF: > { %s16_s21 = sadd.s32 1, %s654_s21  }
  0x36   : > { %p13_p4 = scmp.ge.s32.totalorder %s16_s21, 6  }
  0x38   :  { %15 = sbr.rel (!%p13_p4) target bundleno = 1 (0x1), region = 77 }

// kernel: _lambda_.25
= control target key start
LH: loop header
LB: loop body
LE: loop exit
PB: predicated region body
PF: predicated region fallthrough
CT: control target
= control target key end

     0   :  { %s287_s0 = inlined_call_operand.vmem [shape: f32[128,128], index: 0, kind: input, shape index: {}]   ;;  %s288_s1 = inlined_call_operand.vmem [shape: f32[1,128], index: 1, kind: input, shape index: {}]   ;;  %s289_s2 = inlined_call_operand.vmem [shape: f32[1,128], index: 2, kind: input, shape index: {}]   ;;  %s290_s3 = inlined_call_operand.vmem [shape: bf16[128,128], index: 3, kind: output, shape index: {}]  }
   0x1   :  { %v14_v0 = vld [vmem:[%s287_s0] sm:$0xff]  ;;  %v15_v1 = vld [vmem:[%s287_s0 + $0x8] sm:$0xff]  ;;  %v16_v4 = vld [vmem:[%s287_s0 + $0x10] sm:$0xff] }
   0x2   :  { %v169_v2 = vld [vmem:[%s288_s1] ss:$0 sm:$0xff]  ;;  %v17_v5 = vld [vmem:[%s287_s0 + $0x18] sm:$0xff]  ;;  %v19_v11 = vld [vmem:[%s287_s0 + $0x28] sm:$0xff] }
   0x3   :  { %v203_v3 = vld [vmem:[%s289_s2] ss:$0 sm:$0xff]  ;;  %v34_v7 = vmul.f32 %v169_v2, %v14_v0  ;;  %v35_v8 = vmul.f32 %v169_v2, %v15_v1  ;;  %v36_v9 = vmul.f32 %v169_v2, %v16_v4  ;;  %v37_v10 = vmul.f32 %v169_v2, %v17_v5  ;;  %v20_v12 = vld [vmem:[%s287_s0 + $0x30] sm:$0xff]  ;;  %v21_v13 = vld [vmem:[%s287_s0 + $0x38] sm:$0xff] }
   0x4   :  { %v18_v6 = vld [vmem:[%s287_s0 + $0x20] sm:$0xff]  ;;  %v39_v15 = vmul.f32 %v169_v2, %v19_v11  ;;  %v40_v16 = vmul.f32 %v169_v2, %v20_v12  ;;  %v41_v17 = vmul.f32 %v169_v2, %v21_v13  ;;  %v23_v27 = vld [vmem:[%s287_s0 + $0x48] sm:$0xff]  ;;  %v24_v32 = vld [vmem:[%s287_s0 + $0x50] sm:$0xff] }
   0x5   :  { %v38_v14 = vmul.f32 %v169_v2, %v18_v6  ;;  %v54_v18 = vadd.f32 %v203_v3, %v34_v7  ;;  %v55_v19 = vadd.f32 %v203_v3, %v35_v8  ;;  %v56_v20 = vadd.f32 %v203_v3, %v36_v9  ;;  %v22_v26 = vld [vmem:[%s287_s0 + $0x40] sm:$0xff]  ;;  %v25_v33 = vld [vmem:[%s287_s0 + $0x58] sm:$0xff]  ;;  %v27_v39 = vld [vmem:[%s287_s0 + $0x68] sm:$0xff] }
   0x6   :  { %v57_v21 = vadd.f32 %v203_v3, %v37_v10  ;;  %v59_v23 = vadd.f32 %v203_v3, %v39_v15  ;;  %v60_v24 = vadd.f32 %v203_v3, %v40_v16  ;;  %v61_v25 = vadd.f32 %v203_v3, %v41_v17  ;;  %v26_v38 = vld [vmem:[%s287_s0 + $0x60] sm:$0xff]  ;;  %v28_v44 = vld [vmem:[%s287_s0 + $0x70] sm:$0xff]  ;;  %v29_v45 = vld [vmem:[%s287_s0 + $0x78] sm:$0xff] }
   0x7   :  { %v58_v22 = vadd.f32 %v203_v3, %v38_v14  ;;  %v70_v28 = vmax.f32 %v54_v18, 0.0  ;;  %v71_v29 = vmax.f32 %v55_v19, 0.0  ;;  %v72_v30 = vmax.f32 %v56_v20, 0.0 }
   0x8   :  { %v73_v31 = vmax.f32 %v57_v21, 0.0  ;;  %v75_v35 = vmax.f32 %v59_v23, 0.0  ;;  %v76_v36 = vmax.f32 %v60_v24, 0.0  ;;  %v77_v37 = vmax.f32 %v61_v25, 0.0 }
   0x9   :  { %v74_v34 = vmax.f32 %v58_v22, 0.0  ;;  %v125_v40 = vpack.c.bf16 %v71_v29, %v70_v28  ;;  %v42_v42 = vmul.f32 %v169_v2, %v22_v26  ;;  %v43_v43 = vmul.f32 %v169_v2, %v23_v27 }
   0xa   :  { %v130_v41 = vpack.c.bf16 %v73_v31, %v72_v30  ;;  %v140_v47 = vpack.c.bf16 %v77_v37, %v76_v36  ;;  %v44_v48 = vmul.f32 %v169_v2, %v24_v32  ;;  %v45_v49 = vmul.f32 %v169_v2, %v25_v33 }
   0xb   :  { %v135_v46 = vpack.c.bf16 %v75_v35, %v74_v34  ;;  %126 = vst [vmem:[%s290_s3] sm:$0xff] %v125_v40   ;;  %v62_v50 = vadd.f32 %v203_v3, %v42_v42  ;;  %v63_v51 = vadd.f32 %v203_v3, %v43_v43  ;;  %v46_v52 = vmul.f32 %v169_v2, %v26_v38 }
   0xc   :  { %v47_v53 = vmul.f32 %v169_v2, %v27_v39  ;;  %162 = vst [vmem:[%s290_s3 + $0x8] sm:$0xff] %v130_v41   ;;  %v64_v54 = vadd.f32 %v203_v3, %v44_v48  ;;  %v65_v55 = vadd.f32 %v203_v3, %v45_v49  ;;  %v48_v56 = vmul.f32 %v169_v2, %v28_v44 }
   0xd   :  { %v49_v57 = vmul.f32 %v169_v2, %v29_v45  ;;  %163 = vst [vmem:[%s290_s3 + $0x10] sm:$0xff] %v135_v46   ;;  %v78_v58 = vmax.f32 %v62_v50, 0.0  ;;  %v79_v59 = vmax.f32 %v63_v51, 0.0  ;;  %v66_v60 = vadd.f32 %v203_v3, %v46_v52 }
   0xe   :  { %v67_v61 = vadd.f32 %v203_v3, %v47_v53  ;;  %164 = vst [vmem:[%s290_s3 + $0x18] sm:$0xff] %v140_v47   ;;  %v80_v62 = vmax.f32 %v64_v54, 0.0  ;;  %v81_v63 = vmax.f32 %v65_v55, 0.0  ;;  %v68_v0 = vadd.f32 %v203_v3, %v48_v56 }
   0xf   :  { %v69_v1 = vadd.f32 %v203_v3, %v49_v57  ;;  %v145_v2 = vpack.c.bf16 %v79_v59, %v78_v58  ;;  %v82_v4 = vmax.f32 %v66_v60, 0.0 }
  0x10   :  { %v83_v5 = vmax.f32 %v67_v61, 0.0  ;;  %v150_v6 = vpack.c.bf16 %v81_v63, %v80_v62  ;;  %v84_v7 = vmax.f32 %v68_v0, 0.0 }
  0x11   :  { %v85_v8 = vmax.f32 %v69_v1, 0.0  ;;  %165 = vst [vmem:[%s290_s3 + $0x20] sm:$0xff] %v145_v2  }
  0x12   :  { %v155_v9 = vpack.c.bf16 %v83_v5, %v82_v4  ;;  %166 = vst [vmem:[%s290_s3 + $0x28] sm:$0xff] %v150_v6  }
  0x13   :  { %v160_v10 = vpack.c.bf16 %v85_v8, %v84_v7 }
  0x14   :  { %167 = vst [vmem:[%s290_s3 + $0x30] sm:$0xff] %v155_v9  }
  0x15   :  { %168 = vst [vmem:[%s290_s3 + $0x38] sm:$0xff] %v160_v10  }

// kernel: _lambda_.24
= control target key start
LH: loop header
LB: loop body
LE: loop exit
PB: predicated region body
PF: predicated region fallthrough
CT: control target
= control target key end

     0   :  { %s3146_s1 = inlined_call_operand.vmem [shape: bf16[1152,128], index: 1, kind: input, shape index: {}]   ;;  %s3147_s0 = inlined_call_operand.vmem [shape: bf16[128,1152], index: 0, kind: input, shape index: {}]   ;;  %s3148_s2 = inlined_call_operand.vmem [shape: f32[128,128], index: 2, kind: output, shape index: {0}]   ;;  %s3149_s3 = inlined_call_operand.vmem [shape: f32[1,128], index: 3, kind: output, shape index: {1}]   ;;  %s3150_s4 = inlined_call_operand.vmem [shape: f32[1,128], index: 4, kind: output, shape index: {2}]  }
   0x1   :  { %v2232_v0 = vld [vmem:[%s3146_s1 + $0x38] sm:$0xff]  ;;  %v2231_v1 = vld [vmem:[%s3146_s1 + $0x30] sm:$0xff]  ;;  %v2230_v2 = vld [vmem:[%s3146_s1 + $0x28] sm:$0xff] }
   0x2   :  { %2297 = vmatpush.bf16.msra.mxu1 %v2232_v0  ;;  %2298 = vmatpush.bf16.msra.mxu2 %v2232_v0  ;;  %v2229_v3 = vld [vmem:[%s3146_s1 + $0x20] sm:$0xff]  ;;  %v2228_v4 = vld [vmem:[%s3146_s1 + $0x18] sm:$0xff]  ;;  %v2227_v5 = vld [vmem:[%s3146_s1 + $0x10] sm:$0xff] }
   0x3   :  { %2299 = vmatpush.bf16.msra.mxu3 %v2232_v0  ;;  %1038 = vmatpush.bf16.msra.mxu0 %v2232_v0  ;;  %v2226_v6 = vld [vmem:[%s3146_s1 + $0x8] sm:$0xff]  ;;  %v2225_v7 = vld [vmem:[%s3146_s1] sm:$0xff]  ;;  %v1651_v8 = vld [vmem:[%s3147_s0 + $0x90] sm:$0xf] }
   0x4   :  { %v2175_v9 = vld [vmem:[%s3147_s0 + $0xb0] sm:$0xf0]  ;;  %v1723_v10 = vld [vmem:[%s3147_s0 + $0x120] sm:$0xf]  ;;  %v2193_v11 = vld [vmem:[%s3147_s0 + $0x140] sm:$0xf0] }
   0x5   :  { %v1795_v12 = vld [vmem:[%s3147_s0 + $0x1b0] sm:$0xf]  ;;  %v2211_v13 = vld [vmem:[%s3147_s0 + $0x1d0] sm:$0xf0]  ;;  %v1579_v14 = vld [vmem:[%s3147_s0] sm:$0xf]  ;;  %v1652_v18 = vor.u32 %v2175_v9, %v1651_v8  ;;  %v1724_v19 = vor.u32 %v2193_v11, %v1723_v10 }
   0x6   :  { %2300 = vmatpush.bf16.msra.mxu1 %v2231_v1  ;;  %2301 = vmatpush.bf16.msra.mxu2 %v2231_v1  ;;  %v2157_v15 = vld [vmem:[%s3147_s0 + $0x20] sm:$0xf0]  ;;  %v2248_v16 = vld [vmem:[%s3146_s1 + $0xb8] sm:$0xff]  ;;  %v1796_v20 = vor.u32 %v2211_v13, %v1795_v12  ;;  %v2247_v24 = vld [vmem:[%s3146_s1 + $0xb0] sm:$0xff] }
   0x7   :  { %2302 = vmatpush.bf16.msra.mxu3 %v2231_v1  ;;  %1039 = vmatpush.bf16.msra.mxu0 %v2231_v1  ;;  %v2240_v17 = vld [vmem:[%s3146_s1 + $0x78] sm:$0xff]  ;;  %v1580_v21 = vor.u32 %v2157_v15, %v1579_v14  ;;  %v2239_v25 = vld [vmem:[%s3146_s1 + $0x70] sm:$0xff]  ;;  %v2246_v28 = vld [vmem:[%s3146_s1 + $0xa8] sm:$0xff] }
   0x8   :  { %v2256_v22 = vld [vmem:[%s3146_s1 + $0xf8] sm:$0xff]  ;;  %v2255_v26 = vld [vmem:[%s3146_s1 + $0xf0] sm:$0xff]  ;;  %v2238_v29 = vld [vmem:[%s3146_s1 + $0x68] sm:$0xff] }
   0x9   :  { %v2264_v23 = vld [vmem:[%s3146_s1 + $0x138] sm:$0xff]  ;;  %v2263_v27 = vld [vmem:[%s3146_s1 + $0x130] sm:$0xff]  ;;  %v2254_v30 = vld [vmem:[%s3146_s1 + $0xe8] sm:$0xff] }
   0xa   :  { %2303 = vmatpush.bf16.msra.mxu1 %v2230_v2  ;;  %2304 = vmatpush.bf16.msra.mxu2 %v2230_v2  ;;  %v2262_v31 = vld [vmem:[%s3146_s1 + $0x128] sm:$0xff]  ;;  %v2245_v32 = vld [vmem:[%s3146_s1 + $0xa0] sm:$0xff]  ;;  %v1687_v36 = vld [vmem:[%s3147_s0 + $0xd8] sm:$0xf] }
   0xb   :  { %2305 = vmatpush.bf16.msra.mxu3 %v2230_v2  ;;  %1040 = vmatpush.bf16.msra.mxu0 %v2230_v2  ;;  %v2237_v33 = vld [vmem:[%s3146_s1 + $0x60] sm:$0xff]  ;;  %v2184_v37 = vld [vmem:[%s3147_s0 + $0xf8] sm:$0xf0]  ;;  %v1759_v38 = vld [vmem:[%s3147_s0 + $0x168] sm:$0xf] }
   0xc   :  { %v2253_v34 = vld [vmem:[%s3146_s1 + $0xe0] sm:$0xff]  ;;  %v2202_v39 = vld [vmem:[%s3147_s0 + $0x188] sm:$0xf0]  ;;  %v1831_v40 = vld [vmem:[%s3147_s0 + $0x1f8] sm:$0xf]  ;;  %v1688_v46 = vor.u32 %v2184_v37, %v1687_v36 }
   0xd   :  { %v2261_v35 = vld [vmem:[%s3146_s1 + $0x120] sm:$0xff]  ;;  %v2220_v41 = vld [vmem:[%s3147_s0 + $0x218] sm:$0xf0]  ;;  %v1615_v42 = vld [vmem:[%s3147_s0 + $0x48] sm:$0xf]  ;;  %v1760_v47 = vor.u32 %v2202_v39, %v1759_v38 }
   0xe   :  { %2306 = vmatpush.bf16.msra.mxu1 %v2229_v3  ;;  %2307 = vmatpush.bf16.msra.mxu2 %v2229_v3  ;;  %v2166_v43 = vld [vmem:[%s3147_s0 + $0x68] sm:$0xf0]  ;;  %v2244_v44 = vld [vmem:[%s3146_s1 + $0x98] sm:$0xff]  ;;  %v1832_v48 = vor.u32 %v2220_v41, %v1831_v40  ;;  %v2243_v52 = vld [vmem:[%s3146_s1 + $0x90] sm:$0xff] }
   0xf   :  { %2308 = vmatpush.bf16.msra.mxu3 %v2229_v3  ;;  %1041 = vmatpush.bf16.msra.mxu0 %v2229_v3  ;;  %v2236_v45 = vld [vmem:[%s3146_s1 + $0x58] sm:$0xff]  ;;  %v1616_v49 = vor.u32 %v2166_v43, %v1615_v42  ;;  %v2235_v53 = vld [vmem:[%s3146_s1 + $0x50] sm:$0xff]  ;;  %v2242_v56 = vld [vmem:[%s3146_s1 + $0x88] sm:$0xff] }
  0x10   :  { %v2252_v50 = vld [vmem:[%s3146_s1 + $0xd8] sm:$0xff]  ;;  %v2251_v54 = vld [vmem:[%s3146_s1 + $0xd0] sm:$0xff]  ;;  %v2234_v57 = vld [vmem:[%s3146_s1 + $0x48] sm:$0xff] }
  0x11   :  { %v2260_v51 = vld [vmem:[%s3146_s1 + $0x118] sm:$0xff]  ;;  %v2259_v55 = vld [vmem:[%s3146_s1 + $0x110] sm:$0xff]  ;;  %v2250_v58 = vld [vmem:[%s3146_s1 + $0xc8] sm:$0xff] }
  0x12   :  { %2309 = vmatpush.bf16.msra.mxu1 %v2228_v4  ;;  %2310 = vmatpush.bf16.msra.mxu2 %v2228_v4  ;;  %v2258_v59 = vld [vmem:[%s3146_s1 + $0x108] sm:$0xff]  ;;  %v2241_v60 = vld [vmem:[%s3146_s1 + $0x80] sm:$0xff]  ;;  %v2280_v2 = vld [vmem:[%s3146_s1 + $0x1b8] sm:$0xff] }
  0x13   :  { %2311 = vmatpush.bf16.msra.mxu3 %v2228_v4  ;;  %1042 = vmatpush.bf16.msra.mxu0 %v2228_v4  ;;  %v2233_v61 = vld [vmem:[%s3146_s1 + $0x40] sm:$0xff]  ;;  %v1581_v1 = vld [vmem:[%s3147_s0 + $0x24] sm:$0xf0]  ;;  %v2272_v3 = vld [vmem:[%s3146_s1 + $0x178] sm:$0xff] }
  0x14   :  { %v2153_v62 = vld [vmem:[%s3147_s0 + $0x4] sm:$0xf]  ;;  %v1587_v4 = vld [vmem:[%s3147_s0 + $0x8] sm:$0xf]  ;;  %v1595_v8 = vld [vmem:[%s3147_s0 + $0x10] sm:$0xf] }
  0x15   :  { %v2249_v63 = vld [vmem:[%s3146_s1 + $0xc0] sm:$0xff]  ;;  %v2159_v9 = vld [vmem:[%s3147_s0 + $0x30] sm:$0xf0]  ;;  %v2288_v10 = vld [vmem:[%s3146_s1 + $0x1f8] sm:$0xff]  ;;  %v1584_v12 = vor.u32 %v2153_v62, %v1581_v1 }
  0x16   :  { %2312 = vmatpush.bf16.msra.mxu1 %v2227_v5  ;;  %2313 = vmatpush.bf16.msra.mxu2 %v2227_v5  ;;  %v2257_v0 = vld [vmem:[%s3146_s1 + $0x100] sm:$0xff]  ;;  %v2296_v11 = vld [vmem:[%s3146_s1 + $0x238] sm:$0xff]  ;;  %v1596_v15 = vor.u32 %v2159_v9, %v1595_v8  ;;  %v2171_v40 = vld [vmem:[%s3147_s0 + $0x94] sm:$0xf] }
  0x17   :  { %2314 = vmatpush.bf16.msra.mxu3 %v2227_v5  ;;  %1043 = vmatpush.bf16.msra.mxu0 %v2227_v5  ;;  %v2158_v5 = vld [vmem:[%s3147_s0 + $0x28] sm:$0xf0]  ;;  %v2277_v36 = vld [vmem:[%s3146_s1 + $0x1a0] sm:$0xff]  ;;  %v1653_v41 = vld [vmem:[%s3147_s0 + $0xb4] sm:$0xf0] }
  0x18   :  { %v1588_v13 = vor.u32 %v2158_v5, %v1587_v4  ;;  %v2285_v37 = vld [vmem:[%s3146_s1 + $0x1e0] sm:$0xff]  ;;  %v1659_v42 = vld [vmem:[%s3147_s0 + $0x98] sm:$0xf]  ;;  %v2176_v43 = vld [vmem:[%s3147_s0 + $0xb8] sm:$0xf0] }
  0x19   :  { %v2269_v38 = vld [vmem:[%s3146_s1 + $0x160] sm:$0xff]  ;;  %v1703_v62 = vld [vmem:[%s3147_s0 + $0xe8] sm:$0xf]  ;;  %v2275_v4 = vld [vmem:[%s3146_s1 + $0x190] sm:$0xff] }
  0x1a   :  { %2315 = vmatpush.bf16.msra.mxu1 %v2226_v6  ;;  %2316 = vmatpush.bf16.msra.mxu2 %v2226_v6  ;;  %v2293_v39 = vld [vmem:[%s3146_s1 + $0x220] sm:$0xff]  ;;  %v2283_v5 = vld [vmem:[%s3146_s1 + $0x1d0] sm:$0xff]  ;;  %v1725_v9 = vld [vmem:[%s3147_s0 + $0x144] sm:$0xf0] }
  0x1b   :  { %2317 = vmatpush.bf16.msra.mxu3 %v2226_v6  ;;  %1044 = vmatpush.bf16.msra.mxu0 %v2226_v6  ;;  %v2154_v6 = vld [vmem:[%s3147_s0 + $0xc] sm:$0xf]  ;;  %v2189_v8 = vld [vmem:[%s3147_s0 + $0x124] sm:$0xf] }
  0x1e   :  { %2318 = vmatpush.bf16.msra.mxu1 %v2225_v7  ;;  %2319 = vmatpush.bf16.msra.mxu2 %v2225_v7 }
  0x1f   :  { %2320 = vmatpush.bf16.msra.mxu3 %v2225_v7  ;;  %1045 = vmatpush.bf16.msra.mxu0 %v2225_v7  ;;  %v1589_v7 = vld [vmem:[%s3147_s0 + $0x2c] sm:$0xf0] }
  0x20   :  { %v1592_v14 = vor.u32 %v2154_v6, %v1589_v7  ;;  %v2267_v6 = vld [vmem:[%s3146_s1 + $0x150] sm:$0xff] }
  0x21   :  { %1056 = vmatmul.bf16.vlgmr.msra.gmra.mxu1 %v1652_v18  ;;  %1066 = vmatmul.bf16.vlgmr.msra.gmra.mxu2 %v1724_v19  ;;  %v2287_v18 = vld [vmem:[%s3146_s1 + $0x1f0] sm:$0xff] }
  0x22   :  { %1136 = vmatpush.bf16.msrb.mxu2 %v2248_v16  ;;  %1087 = vmatpush.bf16.msrb.mxu1 %v2240_v17  ;;  %v2279_v16 = vld [vmem:[%s3146_s1 + $0x1b0] sm:$0xff] }
  0x23   :  { %1076 = vmatmul.bf16.vlgmr.msra.gmra.mxu3 %v1796_v20  ;;  %1046 = vmatmul.bf16.vlgmr.msra.gmra.mxu0 %v1580_v21  ;;  %v2271_v17 = vld [vmem:[%s3146_s1 + $0x170] sm:$0xff]  ;;  %v2278_v20 = vld [vmem:[%s3146_s1 + $0x1a8] sm:$0xff] }
  0x24   :  { %1185 = vmatpush.bf16.msrb.mxu3 %v2256_v22  ;;  %1234 = vmatpush.bf16.msrb.mxu0 %v2264_v23  ;;  %v2295_v19 = vld [vmem:[%s3146_s1 + $0x230] sm:$0xff]  ;;  %v2270_v21 = vld [vmem:[%s3146_s1 + $0x168] sm:$0xff] }
  0x25   :  { %v2286_v22 = vld [vmem:[%s3146_s1 + $0x1e8] sm:$0xff]  ;;  %v2291_v7 = vld [vmem:[%s3146_s1 + $0x210] sm:$0xff] }
  0x26   :  { %1137 = vmatpush.bf16.msrb.mxu2 %v2247_v24  ;;  %1088 = vmatpush.bf16.msrb.mxu1 %v2239_v25  ;;  %v2294_v23 = vld [vmem:[%s3146_s1 + $0x228] sm:$0xff]  ;;  %v1617_v25 = vld [vmem:[%s3147_s0 + $0x6c] sm:$0xf0] }
  0x27   :  { %v2162_v24 = vld [vmem:[%s3147_s0 + $0x4c] sm:$0xf] }
  0x28   :  { %1186 = vmatpush.bf16.msrb.mxu3 %v2255_v26  ;;  %1235 = vmatpush.bf16.msrb.mxu0 %v2263_v27  ;;  %v1623_v26 = vld [vmem:[%s3147_s0 + $0x50] sm:$0xf]  ;;  %v2167_v27 = vld [vmem:[%s3147_s0 + $0x70] sm:$0xf0] }
  0x2a   :  { %1138 = vmatpush.bf16.msrb.mxu2 %v2246_v28  ;;  %1089 = vmatpush.bf16.msrb.mxu1 %v2238_v29  ;;  %v2163_v28 = vld [vmem:[%s3147_s0 + $0x54] sm:$0xf]  ;;  %v1625_v29 = vld [vmem:[%s3147_s0 + $0x74] sm:$0xf0] }
  0x2c   :  { %1187 = vmatpush.bf16.msrb.mxu3 %v2254_v30  ;;  %1236 = vmatpush.bf16.msrb.mxu0 %v2262_v31  ;;  %v1631_v30 = vld [vmem:[%s3147_s0 + $0x58] sm:$0xf]  ;;  %v2168_v31 = vld [vmem:[%s3147_s0 + $0x78] sm:$0xf0] }
  0x2e   :  { %1139 = vmatpush.bf16.msrb.mxu2 %v2245_v32  ;;  %1090 = vmatpush.bf16.msrb.mxu1 %v2237_v33  ;;  %v1620_v32 = vor.u32 %v2162_v24, %v1617_v25  ;;  %v1624_v33 = vor.u32 %v2167_v27, %v1623_v26  ;;  %v2198_v24 = vld [vmem:[%s3147_s0 + $0x16c] sm:$0xf]  ;;  %v1761_v25 = vld [vmem:[%s3147_s0 + $0x18c] sm:$0xf0]  ;;  %v2203_v27 = vld [vmem:[%s3147_s0 + $0x190] sm:$0xf0] }
  0x2f   :  { %v1767_v26 = vld [vmem:[%s3147_s0 + $0x170] sm:$0xf] }
  0x30   :  { %1188 = vmatpush.bf16.msrb.mxu3 %v2253_v34  ;;  %1237 = vmatpush.bf16.msrb.mxu0 %v2261_v35  ;;  %v1628_v34 = vor.u32 %v2163_v28, %v1625_v29  ;;  %v1632_v35 = vor.u32 %v2168_v31, %v1631_v30  ;;  %v2199_v28 = vld [vmem:[%s3147_s0 + $0x174] sm:$0xf]  ;;  %v1769_v29 = vld [vmem:[%s3147_s0 + $0x194] sm:$0xf0]  ;;  %v2204_v31 = vld [vmem:[%s3147_s0 + $0x198] sm:$0xf0] }
  0x31   :  { %1061 = vmatmul.bf16.gmra.mxu1 %v1688_v46  ;;  %1071 = vmatmul.bf16.gmra.mxu2 %v1760_v47  ;;  %v1667_v46 = vld [vmem:[%s3147_s0 + $0xa0] sm:$0xf]  ;;  %v2177_v47 = vld [vmem:[%s3147_s0 + $0xc0] sm:$0xf0]  ;;  %v1775_v30 = vld [vmem:[%s3147_s0 + $0x178] sm:$0xf] }
  0x32   :  { %1140 = vmatpush.bf16.msrb.mxu2 %v2244_v44  ;;  %1091 = vmatpush.bf16.msrb.mxu1 %v2236_v45  ;;  %v2172_v44 = vld [vmem:[%s3147_s0 + $0x9c] sm:$0xf]  ;;  %v1661_v45 = vld [vmem:[%s3147_s0 + $0xbc] sm:$0xf0] }
  0x33   :  { %1081 = vmatmul.bf16.gmra.mxu3 %v1832_v48  ;;  %1051 = vmatmul.bf16.gmra.mxu0 %v1616_v49  ;;  %v1656_v48 = vor.u32 %v2171_v40, %v1653_v41  ;;  %v1660_v49 = vor.u32 %v2176_v43, %v1659_v42  ;;  %v2207_v40 = vld [vmem:[%s3147_s0 + $0x1b4] sm:$0xf]  ;;  %v1797_v41 = vld [vmem:[%s3147_s0 + $0x1d4] sm:$0xf0]  ;;  %v2212_v43 = vld [vmem:[%s3147_s0 + $0x1d8] sm:$0xf0] }
  0x34   :  { %1189 = vmatpush.bf16.msrb.mxu3 %v2252_v50  ;;  %1238 = vmatpush.bf16.msrb.mxu0 %v2260_v51  ;;  %v1664_v50 = vor.u32 %v2172_v44, %v1661_v45  ;;  %v1668_v51 = vor.u32 %v2177_v47, %v1667_v46  ;;  %v1803_v42 = vld [vmem:[%s3147_s0 + $0x1b8] sm:$0xf]  ;;  %v2208_v44 = vld [vmem:[%s3147_s0 + $0x1bc] sm:$0xf]  ;;  %v1805_v45 = vld [vmem:[%s3147_s0 + $0x1dc] sm:$0xf0] }
  0x35   :  { %v1811_v46 = vld [vmem:[%s3147_s0 + $0x1c0] sm:$0xf]  ;;  %v2213_v47 = vld [vmem:[%s3147_s0 + $0x1e0] sm:$0xf0] }
  0x36   :  { %1141 = vmatpush.bf16.msrb.mxu2 %v2243_v52  ;;  %1092 = vmatpush.bf16.msrb.mxu1 %v2235_v53  ;;  %v2276_v52 = vld [vmem:[%s3146_s1 + $0x198] sm:$0xff] }
  0x37   :  { %v2284_v53 = vld [vmem:[%s3146_s1 + $0x1d8] sm:$0xff] }
  0x38   :  { %1190 = vmatpush.bf16.msrb.mxu3 %v2251_v54  ;;  %1239 = vmatpush.bf16.msrb.mxu0 %v2259_v55  ;;  %v2268_v54 = vld [vmem:[%s3146_s1 + $0x158] sm:$0xff] }
  0x39   :  { %v2292_v55 = vld [vmem:[%s3146_s1 + $0x218] sm:$0xff] }
  0x3a   :  { %1142 = vmatpush.bf16.msrb.mxu2 %v2242_v56  ;;  %1093 = vmatpush.bf16.msrb.mxu1 %v2234_v57  ;;  %v2180_v56 = vld [vmem:[%s3147_s0 + $0xdc] sm:$0xf]  ;;  %v1689_v57 = vld [vmem:[%s3147_s0 + $0xfc] sm:$0xf0] }
  0x3c   :  { %1191 = vmatpush.bf16.msrb.mxu3 %v2250_v58  ;;  %1240 = vmatpush.bf16.msrb.mxu0 %v2258_v59  ;;  %v1695_v58 = vld [vmem:[%s3147_s0 + $0xe0] sm:$0xf]  ;;  %v2185_v59 = vld [vmem:[%s3147_s0 + $0x100] sm:$0xf0] }
  0x3d   :  { %v1696_v1 = vor.u32 %v2185_v59, %v1695_v58  ;;  %v2216_v58 = vld [vmem:[%s3147_s0 + $0x1fc] sm:$0xf]  ;;  %v1833_v59 = vld [vmem:[%s3147_s0 + $0x21c] sm:$0xf0] }
  0x3e   :  { %1143 = vmatpush.bf16.msrb.mxu2 %v2241_v60  ;;  %1094 = vmatpush.bf16.msrb.mxu1 %v2233_v61  ;;  %v2181_v60 = vld [vmem:[%s3147_s0 + $0xe4] sm:$0xf]  ;;  %v1697_v61 = vld [vmem:[%s3147_s0 + $0x104] sm:$0xf0] }
  0x40   :  { %1192 = vmatpush.bf16.msrb.mxu3 %v2249_v63  ;;  %1241 = vmatpush.bf16.msrb.mxu0 %v2257_v0  ;;  %v2186_v63 = vld [vmem:[%s3147_s0 + $0x108] sm:$0xf0]  ;;  %v1692_v0 = vor.u32 %v2180_v56, %v1689_v57 }
  0x41   :  { %1095 = vmatmul.bf16.vlgmr.msrb.gmra.mxu1 %v1584_v12  ;;  %1144 = vmatmul.bf16.vlgmr.msrb.gmra.mxu2 %v1588_v13  ;;  %v2190_v12 = vld [vmem:[%s3147_s0 + $0x12c] sm:$0xf]  ;;  %v1733_v13 = vld [vmem:[%s3147_s0 + $0x14c] sm:$0xf0] }
  0x42   :  { %1332 = vmatpush.bf16.msra.mxu2 %v2280_v2  ;;  %1283 = vmatpush.bf16.msra.mxu1 %v2272_v3  ;;  %v1700_v2 = vor.u32 %v2181_v60, %v1697_v61  ;;  %v1704_v3 = vor.u32 %v2186_v63, %v1703_v62  ;;  %v1839_v60 = vld [vmem:[%s3147_s0 + $0x200] sm:$0xf]  ;;  %v2221_v61 = vld [vmem:[%s3147_s0 + $0x220] sm:$0xf0]  ;;  %v1841_v63 = vld [vmem:[%s3147_s0 + $0x224] sm:$0xf0] }
  0x43   :  { %1193 = vmatmul.bf16.vlgmr.msrb.gmra.mxu3 %v1592_v14  ;;  %1242 = vmatmul.bf16.vlgmr.msrb.gmra.mxu0 %v1596_v15  ;;  %v1739_v14 = vld [vmem:[%s3147_s0 + $0x130] sm:$0xf]  ;;  %v2195_v15 = vld [vmem:[%s3147_s0 + $0x150] sm:$0xf0]  ;;  %v2217_v62 = vld [vmem:[%s3147_s0 + $0x204] sm:$0xf] }
  0x44   :  { %1381 = vmatpush.bf16.msra.mxu3 %v2288_v10  ;;  %1430 = vmatpush.bf16.msra.mxu0 %v2296_v11  ;;  %v1731_v10 = vld [vmem:[%s3147_s0 + $0x128] sm:$0xf]  ;;  %v2194_v11 = vld [vmem:[%s3147_s0 + $0x148] sm:$0xf0] }
  0x46   :  { %1333 = vmatpush.bf16.msra.mxu2 %v2279_v16  ;;  %1284 = vmatpush.bf16.msra.mxu1 %v2271_v17  ;;  %v1728_v16 = vor.u32 %v2189_v8, %v1725_v9  ;;  %v1732_v17 = vor.u32 %v2194_v11, %v1731_v10 }
  0x48   :  { %1382 = vmatpush.bf16.msra.mxu3 %v2287_v18  ;;  %1431 = vmatpush.bf16.msra.mxu0 %v2295_v19  ;;  %v1736_v18 = vor.u32 %v2190_v12, %v1733_v13  ;;  %v1740_v19 = vor.u32 %v2195_v15, %v1739_v14  ;;  %v2155_v14 = vld [vmem:[%s3147_s0 + $0x14] sm:$0xf]  ;;  %v1597_v15 = vld [vmem:[%s3147_s0 + $0x34] sm:$0xf0] }
  0x4a   :  { %1334 = vmatpush.bf16.msra.mxu2 %v2278_v20  ;;  %1285 = vmatpush.bf16.msra.mxu1 %v2270_v21  ;;  %v2274_v20 = vld [vmem:[%s3146_s1 + $0x188] sm:$0xff] }
  0x4b   :  { %v2282_v21 = vld [vmem:[%s3146_s1 + $0x1c8] sm:$0xff] }
  0x4c   :  { %1383 = vmatpush.bf16.msra.mxu3 %v2286_v22  ;;  %1432 = vmatpush.bf16.msra.mxu0 %v2294_v23  ;;  %v2266_v22 = vld [vmem:[%s3146_s1 + $0x148] sm:$0xff] }
  0x4d   :  { %v2290_v23 = vld [vmem:[%s3146_s1 + $0x208] sm:$0xff] }
  0x4e   :  { %1335 = vmatpush.bf16.msra.mxu2 %v2277_v36  ;;  %1286 = vmatpush.bf16.msra.mxu1 %v2269_v38  ;;  %v2273_v36 = vld [vmem:[%s3146_s1 + $0x180] sm:$0xff] }
  0x4f   :  { %v2265_v38 = vld [vmem:[%s3146_s1 + $0x140] sm:$0xff] }
  0x50   :  { %1384 = vmatpush.bf16.msra.mxu3 %v2285_v37  ;;  %1433 = vmatpush.bf16.msra.mxu0 %v2293_v39  ;;  %v2281_v37 = vld [vmem:[%s3146_s1 + $0x1c0] sm:$0xff] }
  0x51   :  { %1100 = vmatmul.bf16.gmra.mxu1 %v1620_v32  ;;  %1149 = vmatmul.bf16.gmra.mxu2 %v1624_v33  ;;  %v1764_v32 = vor.u32 %v2198_v24, %v1761_v25  ;;  %v1768_v33 = vor.u32 %v2203_v27, %v1767_v26  ;;  %v2289_v39 = vld [vmem:[%s3146_s1 + $0x200] sm:$0xff]  ;;  %v1600_v24 = vor.u32 %v2155_v14, %v1597_v15 }
  0x52   :  { %1336 = vmatpush.bf16.msra.mxu2 %v2276_v52  ;;  %1287 = vmatpush.bf16.msra.mxu1 %v2268_v54  ;;  %v1812_v52 = vor.u32 %v2213_v47, %v1811_v46  ;;  %v2170_v46 = vld [vmem:[%s3147_s0 + $0x88] sm:$0xf0]  ;;  %v2173_v14 = vld [vmem:[%s3147_s0 + $0xa4] sm:$0xf] }
  0x53   :  { %1198 = vmatmul.bf16.gmra.mxu3 %v1628_v34  ;;  %1247 = vmatmul.bf16.gmra.mxu0 %v1632_v35  ;;  %v1772_v34 = vor.u32 %v2199_v28, %v1769_v29  ;;  %v1776_v35 = vor.u32 %v2204_v31, %v1775_v30 }
  0x54   :  { %1385 = vmatpush.bf16.msra.mxu3 %v2284_v53  ;;  %1434 = vmatpush.bf16.msra.mxu0 %v2292_v55 }
  0x56   :  { %1337 = vmatpush.bf16.msra.mxu2 %v2275_v4  ;;  %1288 = vmatpush.bf16.msra.mxu1 %v2267_v6  ;;  %v1836_v4 = vor.u32 %v2216_v58, %v1833_v59 }
  0x58   :  { %1386 = vmatpush.bf16.msra.mxu3 %v2283_v5  ;;  %1435 = vmatpush.bf16.msra.mxu0 %v2291_v7  ;;  %v1840_v5 = vor.u32 %v2221_v61, %v1839_v60  ;;  %v1844_v7 = vor.u32 %v2217_v62, %v1841_v63 }
  0x5a   :  { %1338 = vmatpush.bf16.msra.mxu2 %v2274_v20  ;;  %1289 = vmatpush.bf16.msra.mxu1 %v2266_v22  ;;  %v1611_v20 = vld [vmem:[%s3147_s0 + $0x20] sm:$0xf] }
  0x5c   :  { %1387 = vmatpush.bf16.msra.mxu3 %v2282_v21  ;;  %1436 = vmatpush.bf16.msra.mxu0 %v2290_v23  ;;  %v2161_v21 = vld [vmem:[%s3147_s0 + $0x40] sm:$0xf0] }
  0x5d   :  { %v1612_v28 = vor.u32 %v2161_v21, %v1611_v20  ;;  %v2179_v20 = vld [vmem:[%s3147_s0 + $0xd0] sm:$0xf0] }
  0x5e   :  { %1339 = vmatpush.bf16.msra.mxu2 %v2273_v36  ;;  %1290 = vmatpush.bf16.msra.mxu1 %v2265_v38  ;;  %v2164_v38 = vld [vmem:[%s3147_s0 + $0x5c] sm:$0xf] }
  0x60   :  { %1388 = vmatpush.bf16.msra.mxu3 %v2281_v37  ;;  %1437 = vmatpush.bf16.msra.mxu0 %v2289_v39  ;;  %v1633_v39 = vld [vmem:[%s3147_s0 + $0x7c] sm:$0xf0] }
  0x61   :  { %1105 = vmatmul.bf16.gmra.mxu1 %v1656_v48  ;;  %1154 = vmatmul.bf16.gmra.mxu2 %v1660_v49  ;;  %v1800_v48 = vor.u32 %v2207_v40, %v1797_v41  ;;  %v1804_v49 = vor.u32 %v2212_v43, %v1803_v42  ;;  %v1639_v41 = vld [vmem:[%s3147_s0 + $0x60] sm:$0xf]  ;;  %v2169_v42 = vld [vmem:[%s3147_s0 + $0x80] sm:$0xf0] }
  0x62   :  { %v2165_v43 = vld [vmem:[%s3147_s0 + $0x64] sm:$0xf] }
  0x63   :  { %1203 = vmatmul.bf16.gmra.mxu3 %v1664_v50  ;;  %1252 = vmatmul.bf16.gmra.mxu0 %v1668_v51  ;;  %v1808_v51 = vor.u32 %v2208_v44, %v1805_v45  ;;  %v1641_v44 = vld [vmem:[%s3147_s0 + $0x84] sm:$0xf0] }
  0x64   :  { %v1647_v45 = vld [vmem:[%s3147_s0 + $0x68] sm:$0xf] }
  0x65   :  { %v1648_v58 = vor.u32 %v2170_v46, %v1647_v45  ;;  %v1711_v45 = vld [vmem:[%s3147_s0 + $0xf0] sm:$0xf]  ;;  %v2187_v46 = vld [vmem:[%s3147_s0 + $0x110] sm:$0xf0] }
  0x71   :  { %1110 = vmatmul.bf16.gmra.mxu1 %v1692_v0  ;;  %1159 = vmatmul.bf16.gmra.mxu2 %v1696_v1  ;;  %v1847_v0 = vld [vmem:[%s3147_s0 + $0x208] sm:$0xf]  ;;  %v2222_v1 = vld [vmem:[%s3147_s0 + $0x228] sm:$0xf0] }
  0x72   :  { %v1848_v8 = vor.u32 %v2222_v1, %v1847_v0 }
  0x73   :  { %1208 = vmatmul.bf16.gmra.mxu3 %v1700_v2  ;;  %1257 = vmatmul.bf16.gmra.mxu0 %v1704_v3 }
  0x81   :  { %1115 = vmatmul.bf16.gmra.mxu1 %v1728_v16  ;;  %1164 = vmatmul.bf16.gmra.mxu2 %v1732_v17  ;;  %v1603_v16 = vld [vmem:[%s3147_s0 + $0x18] sm:$0xf]  ;;  %v2160_v17 = vld [vmem:[%s3147_s0 + $0x38] sm:$0xf0] }
  0x82   :  { %v1604_v25 = vor.u32 %v2160_v17, %v1603_v16  ;;  %v1675_v16 = vld [vmem:[%s3147_s0 + $0xa8] sm:$0xf]  ;;  %v2178_v17 = vld [vmem:[%s3147_s0 + $0xc8] sm:$0xf0] }
  0x83   :  { %1213 = vmatmul.bf16.gmra.mxu3 %v1736_v18  ;;  %1262 = vmatmul.bf16.gmra.mxu0 %v1740_v19  ;;  %v2156_v18 = vld [vmem:[%s3147_s0 + $0x1c] sm:$0xf]  ;;  %v1605_v19 = vld [vmem:[%s3147_s0 + $0x3c] sm:$0xf0] }
  0x84   :  { %v1608_v27 = vor.u32 %v2156_v18, %v1605_v19  ;;  %v1677_v18 = vld [vmem:[%s3147_s0 + $0xcc] sm:$0xf0] }
  0x85   :  { %v1683_v19 = vld [vmem:[%s3147_s0 + $0xb0] sm:$0xf] }
  0x91   :  { %1120 = vmatmul.bf16.gmra.mxu1 %v1764_v32  ;;  %1169 = vmatmul.bf16.gmra.mxu2 %v1768_v33 }
  0x93   :  { %1218 = vmatmul.bf16.gmra.mxu3 %v1772_v34  ;;  %1267 = vmatmul.bf16.gmra.mxu0 %v1776_v35 }
  0x9e   :  { %v2780_v50 = vpop.f32.mrf.mxu1 }
  0xa0   :  { %v1047_v53 = vpop.f32.mrf.mxu0 }
  0xa1   :  { %1125 = vmatmul.bf16.gmra.mxu1 %v1800_v48  ;;  %1174 = vmatmul.bf16.gmra.mxu2 %v1804_v49 }
  0xa3   :  { %1223 = vmatmul.bf16.gmra.mxu3 %v1808_v51  ;;  %1272 = vmatmul.bf16.gmra.mxu0 %v1812_v52  ;;  %v1636_v51 = vor.u32 %v2164_v38, %v1633_v39  ;;  %v1640_v52 = vor.u32 %v2169_v42, %v1639_v41 }
  0xa4   :  { %v2782_v54 = vpop.f32.mrf.mxu2 }
  0xa6   :  { %v2784_v55 = vpop.f32.mrf.mxu3  ;;  %v2786_v56 = vpop.f32.mrf.mxu1 }
  0xa8   :  { %v1049_v57 = vpop.f32.mrf.mxu0 }
  0xac   :  { %v2812_v2 = vpop.f32.mrf.mxu2 }
  0xae   :  { %v2814_v3 = vpop.f32.mrf.mxu3  ;;  %v2816_v6 = vpop.f32.mrf.mxu1 }
  0xb0   :  { %v1052_v9 = vpop.f32.mrf.mxu0 }
  0xb1   :  { %1130 = vmatmul.bf16.gmra.mxu1 %v1836_v4  ;;  %1179 = vmatmul.bf16.gmra.mxu2 %v1840_v5 }
  0xb3   :  { %1228 = vmatmul.bf16.gmra.mxu3 %v1844_v7  ;;  %1277 = vmatmul.bf16.gmra.mxu0 %v1848_v8 }
  0xb4   :  { %v2818_v10 = vpop.f32.mrf.mxu2 }
  0xb6   :  { %v2820_v11 = vpop.f32.mrf.mxu3  ;;  %v2822_v12 = vpop.f32.mrf.mxu1 }
  0xb8   :  { %v1054_v13 = vpop.f32.mrf.mxu0 }
  0xbc   :  { %v2848_v22 = vpop.f32.mrf.mxu2 }
  0xbe   :  { %v2850_v23 = vpop.f32.mrf.mxu3  ;;  %v1096_v26 = vpop.f32.mrf.mxu1 }
  0xbf   :  { %v1097_v29 = vadd.f32 %v1096_v26, %v1047_v53 }
  0xc0   :  { %v1243_v30 = vpop.f32.mrf.mxu0 }
  0xc1   :  { %1291 = vmatmul.bf16.vlgmr.msra.gmra.mxu1 %v1600_v24  ;;  %1340 = vmatmul.bf16.vlgmr.msra.gmra.mxu2 %v1604_v25 }
  0xc3   :  { %1389 = vmatmul.bf16.vlgmr.msra.gmra.mxu3 %v1608_v27  ;;  %1438 = vmatmul.bf16.vlgmr.msra.gmra.mxu0 %v1612_v28  ;;  %v1676_v27 = vor.u32 %v2178_v17, %v1675_v16 }
  0xc4   :  { %v1145_v31 = vpop.f32.mrf.mxu2 }
  0xc5   :  { %v1146_v32 = vadd.f32 %v1145_v31, %v1097_v29 }
  0xc6   :  { %v1194_v33 = vpop.f32.mrf.mxu3  ;;  %v1098_v34 = vpop.f32.mrf.mxu1 }
  0xc7   :  { %v1195_v35 = vadd.f32 %v1194_v33, %v1146_v32  ;;  %v1099_v36 = vadd.f32 %v1098_v34, %v1049_v57  ;;  %v1644_v57 = vor.u32 %v2165_v43, %v1641_v44  ;;  %v2182_v43 = vld [vmem:[%s3147_s0 + $0xec] sm:$0xf] }
  0xc8   :  { %v1245_v37 = vpop.f32.mrf.mxu0 }
  0xc9   :  { %v2858_v40 = vadd.f32 %v1243_v30, %v1195_v35  ;;  %v1684_v30 = vor.u32 %v2179_v20, %v1683_v19  ;;  %v1747_v19 = vld [vmem:[%s3147_s0 + $0x138] sm:$0xf]  ;;  %v2196_v20 = vld [vmem:[%s3147_s0 + $0x158] sm:$0xf0] }
  0xcc   :  { %v1147_v47 = vpop.f32.mrf.mxu2 }
  0xcd   :  { %v1148_v48 = vadd.f32 %v1147_v47, %v1099_v36  ;;  %v1713_v47 = vld [vmem:[%s3147_s0 + $0x114] sm:$0xf0] }
  0xce   :  { %v1196_v49 = vpop.f32.mrf.mxu3  ;;  %v1101_v53 = vpop.f32.mrf.mxu1 }
  0xcf   :  { %v1197_v59 = vadd.f32 %v1196_v49, %v1148_v48  ;;  %v1102_v60 = vadd.f32 %v1101_v53, %v1052_v9  ;;  %v1669_v9 = vld [vmem:[%s3147_s0 + $0xc4] sm:$0xf0]  ;;  %v1719_v48 = vld [vmem:[%s3147_s0 + $0xf8] sm:$0xf]  ;;  %v2188_v49 = vld [vmem:[%s3147_s0 + $0x118] sm:$0xf0] }
  0xd0   :  { %v1248_v61 = vpop.f32.mrf.mxu0  ;;  %v1672_v26 = vor.u32 %v2173_v14, %v1669_v9 }
  0xd1   :  { %1296 = vmatmul.bf16.gmra.mxu1 %v1636_v51  ;;  %1345 = vmatmul.bf16.gmra.mxu2 %v1640_v52  ;;  %v2878_v62 = vadd.f32 %v1245_v37, %v1197_v59 }
  0xd3   :  { %1394 = vmatmul.bf16.gmra.mxu3 %v1644_v57  ;;  %1443 = vmatmul.bf16.gmra.mxu0 %v1648_v58  ;;  %v1712_v58 = vor.u32 %v2187_v46, %v1711_v45  ;;  %v2200_v46 = vld [vmem:[%s3147_s0 + $0x17c] sm:$0xf] }
  0xd4   :  { %v1150_v63 = vpop.f32.mrf.mxu2 }
  0xd5   :  { %v1151_v0 = vadd.f32 %v1150_v63, %v1102_v60 }
  0xd6   :  { %v1199_v1 = vpop.f32.mrf.mxu3  ;;  %v1103_v4 = vpop.f32.mrf.mxu1 }
  0xd7   :  { %v1200_v5 = vadd.f32 %v1199_v1, %v1151_v0  ;;  %v1104_v7 = vadd.f32 %v1103_v4, %v1054_v13  ;;  %v2174_v13 = vld [vmem:[%s3147_s0 + $0xac] sm:$0xf] }
  0xd8   :  { %v1250_v8 = vpop.f32.mrf.mxu0  ;;  %v1680_v29 = vor.u32 %v2174_v13, %v1677_v18  ;;  %v2191_v13 = vld [vmem:[%s3147_s0 + $0x134] sm:$0xf] }
  0xd9   :  { %v2886_v15 = vadd.f32 %v1248_v61, %v1200_v5  ;;  %v1720_v61 = vor.u32 %v2188_v49, %v1719_v48  ;;  %v2205_v48 = vld [vmem:[%s3147_s0 + $0x1a0] sm:$0xf0] }
  0xda   :  { %v2201_v49 = vld [vmem:[%s3147_s0 + $0x184] sm:$0xf] }
  0xdc   :  { %v1152_v21 = vpop.f32.mrf.mxu2 }
  0xdd   :  { %v1153_v24 = vadd.f32 %v1152_v21, %v1104_v7  ;;  %v1749_v21 = vld [vmem:[%s3147_s0 + $0x15c] sm:$0xf0] }
  0xde   :  { %v1201_v25 = vpop.f32.mrf.mxu3  ;;  %v1106_v28 = vpop.f32.mrf.mxu1 }
  0xdf   :  { %v1202_v31 = vadd.f32 %v1201_v25, %v1153_v24  ;;  %v1107_v32 = vadd.f32 %v1106_v28, %v2780_v50  ;;  %v1705_v50 = vld [vmem:[%s3147_s0 + $0x10c] sm:$0xf0]  ;;  %v1755_v24 = vld [vmem:[%s3147_s0 + $0x140] sm:$0xf]  ;;  %v2197_v25 = vld [vmem:[%s3147_s0 + $0x160] sm:$0xf0] }
  0xe0   :  { %v1253_v33 = vpop.f32.mrf.mxu0  ;;  %v1708_v57 = vor.u32 %v2182_v43, %v1705_v50 }
  0xe1   :  { %1301 = vmatmul.bf16.gmra.mxu1 %v1672_v26  ;;  %1350 = vmatmul.bf16.gmra.mxu2 %v1676_v27  ;;  %v2907_v34 = vadd.f32 %v1250_v8, %v1202_v31 }
  0xe3   :  { %1399 = vmatmul.bf16.gmra.mxu3 %v1680_v29  ;;  %1448 = vmatmul.bf16.gmra.mxu0 %v1684_v30  ;;  %v1748_v30 = vor.u32 %v2196_v20, %v1747_v19  ;;  %v2209_v20 = vld [vmem:[%s3147_s0 + $0x1c4] sm:$0xf] }
  0xe4   :  { %v1155_v35 = vpop.f32.mrf.mxu2 }
  0xe5   :  { %v1156_v36 = vadd.f32 %v1155_v35, %v1107_v32 }
  0xe6   :  { %v1204_v37 = vpop.f32.mrf.mxu3  ;;  %v1108_v38 = vpop.f32.mrf.mxu1 }
  0xe7   :  { %v1205_v39 = vadd.f32 %v1204_v37, %v1156_v36  ;;  %v1109_v41 = vadd.f32 %v1108_v38, %v2786_v56  ;;  %v2183_v56 = vld [vmem:[%s3147_s0 + $0xf4] sm:$0xf] }
  0xe8   :  { %v1255_v42 = vpop.f32.mrf.mxu0  ;;  %v1716_v60 = vor.u32 %v2183_v56, %v1713_v47  ;;  %v1777_v56 = vld [vmem:[%s3147_s0 + $0x19c] sm:$0xf0] }
  0xe9   :  { %v2916_v44 = vadd.f32 %v1253_v33, %v1205_v39  ;;  %v1756_v33 = vor.u32 %v2197_v25, %v1755_v24  ;;  %v2214_v24 = vld [vmem:[%s3147_s0 + $0x1e8] sm:$0xf0] }
  0xea   :  { %v2210_v25 = vld [vmem:[%s3147_s0 + $0x1cc] sm:$0xf] }
  0xec   :  { %v1157_v51 = vpop.f32.mrf.mxu2 }
  0xed   :  { %v1158_v52 = vadd.f32 %v1157_v51, %v1109_v41 }
  0xee   :  { %v1206_v53 = vpop.f32.mrf.mxu3  ;;  %v1111_v59 = vpop.f32.mrf.mxu1 }
  0xef   :  { %v1207_v63 = vadd.f32 %v1206_v53, %v1158_v52  ;;  %v1112_v0 = vadd.f32 %v1111_v59, %v2816_v6  ;;  %v1741_v6 = vld [vmem:[%s3147_s0 + $0x154] sm:$0xf0]  ;;  %v1785_v52 = vld [vmem:[%s3147_s0 + $0x1a4] sm:$0xf0] }
  0xf0   :  { %v1258_v1 = vpop.f32.mrf.mxu0  ;;  %v1744_v29 = vor.u32 %v2191_v13, %v1741_v6  ;;  %v1791_v53 = vld [vmem:[%s3147_s0 + $0x188] sm:$0xf] }
  0xf1   :  { %1306 = vmatmul.bf16.gmra.mxu1 %v1708_v57  ;;  %1355 = vmatmul.bf16.gmra.mxu2 %v1712_v58  ;;  %v2937_v4 = vadd.f32 %v1255_v42, %v1207_v63  ;;  %v2206_v57 = vld [vmem:[%s3147_s0 + $0x1a8] sm:$0xf0] }
  0xf3   :  { %1404 = vmatmul.bf16.gmra.mxu3 %v1716_v60  ;;  %1453 = vmatmul.bf16.gmra.mxu0 %v1720_v61  ;;  %v1780_v61 = vor.u32 %v2200_v46, %v1777_v56 }
  0xf4   :  { %v1160_v5 = vpop.f32.mrf.mxu2 }
  0xf5   :  { %v1161_v7 = vadd.f32 %v1160_v5, %v1112_v0 }
  0xf6   :  { %v1209_v8 = vpop.f32.mrf.mxu3  ;;  %v1113_v14 = vpop.f32.mrf.mxu1 }
  0xf7   :  { %v1210_v9 = vadd.f32 %v1209_v8, %v1161_v7  ;;  %v1114_v16 = vadd.f32 %v1113_v14, %v2822_v12  ;;  %v2192_v12 = vld [vmem:[%s3147_s0 + $0x13c] sm:$0xf] }
  0xf8   :  { %v1260_v17 = vpop.f32.mrf.mxu0  ;;  %v1752_v32 = vor.u32 %v2192_v12, %v1749_v21  ;;  %v1813_v12 = vld [vmem:[%s3147_s0 + $0x1e4] sm:$0xf0] }
  0xf9   :  { %v2946_v18 = vadd.f32 %v1258_v1, %v1210_v9  ;;  %v1788_v1 = vor.u32 %v2201_v49, %v1785_v52  ;;  %v2218_v49 = vld [vmem:[%s3147_s0 + $0x20c] sm:$0xf] }
  0xfc   :  { %v1162_v26 = vpop.f32.mrf.mxu2 }
  0xfd   :  { %v1163_v27 = vadd.f32 %v1162_v26, %v1114_v16 }
  0xfe   :  { %v1211_v28 = vpop.f32.mrf.mxu3  ;;  %v1116_v31 = vpop.f32.mrf.mxu1 }
  0xff   :  { %v1212_v35 = vadd.f32 %v1211_v28, %v1163_v27  ;;  %v1117_v38 = vadd.f32 %v1116_v31, %v2782_v54  ;;  %v1783_v54 = vld [vmem:[%s3147_s0 + $0x180] sm:$0xf]  ;;  %v1821_v27 = vld [vmem:[%s3147_s0 + $0x1ec] sm:$0xf0] }
 0x100   :  { %v1263_v36 = vpop.f32.mrf.mxu0  ;;  %v1784_v63 = vor.u32 %v2205_v48, %v1783_v54  ;;  %v1827_v28 = vld [vmem:[%s3147_s0 + $0x1d0] sm:$0xf] }
 0x101   :  { %1311 = vmatmul.bf16.gmra.mxu1 %v1744_v29  ;;  %1360 = vmatmul.bf16.gmra.mxu2 %v1748_v30  ;;  %v2966_v37 = vadd.f32 %v1260_v17, %v1212_v35  ;;  %v2215_v29 = vld [vmem:[%s3147_s0 + $0x1f0] sm:$0xf0] }
 0x103   :  { %1409 = vmatmul.bf16.gmra.mxu3 %v1752_v32  ;;  %1458 = vmatmul.bf16.gmra.mxu0 %v1756_v33  ;;  %v1816_v33 = vor.u32 %v2209_v20, %v1813_v12 }
 0x104   :  { %v1165_v39 = vpop.f32.mrf.mxu2 }
 0x105   :  { %v1166_v41 = vadd.f32 %v1165_v39, %v1117_v38  ;;  %v1824_v38 = vor.u32 %v2210_v25, %v1821_v27 }
 0x106   :  { %v1214_v42 = vpop.f32.mrf.mxu3  ;;  %v1118_v43 = vpop.f32.mrf.mxu1 }
 0x107   :  { %v1215_v50 = vadd.f32 %v1214_v42, %v1166_v41  ;;  %v1119_v51 = vadd.f32 %v1118_v43, %v2812_v2  ;;  %v1792_v2 = vor.u32 %v2206_v57, %v1791_v53  ;;  %v2223_v53 = vld [vmem:[%s3147_s0 + $0x230] sm:$0xf0] }
 0x108   :  { %v1265_v45 = vpop.f32.mrf.mxu0  ;;  %v2219_v57 = vld [vmem:[%s3147_s0 + $0x214] sm:$0xf] }
 0x109   :  { %v2975_v47 = vadd.f32 %v1263_v36, %v1215_v50 }
 0x10c   :  { %v1167_v58 = vpop.f32.mrf.mxu2 }
 0x10d   :  { %v1168_v59 = vadd.f32 %v1167_v58, %v1119_v51  ;;  %v1849_v51 = vld [vmem:[%s3147_s0 + $0x22c] sm:$0xf0] }
 0x10e   :  { %v1216_v60 = vpop.f32.mrf.mxu3  ;;  %v1121_v0 = vpop.f32.mrf.mxu1 }
 0x10f   :  { %v1217_v5 = vadd.f32 %v1216_v60, %v1168_v59  ;;  %v1122_v14 = vadd.f32 %v1121_v0, %v2818_v10  ;;  %v1819_v10 = vld [vmem:[%s3147_s0 + $0x1c8] sm:$0xf]  ;;  %v1857_v59 = vld [vmem:[%s3147_s0 + $0x234] sm:$0xf0] }
 0x110   :  { %v1268_v7 = vpop.f32.mrf.mxu0  ;;  %v1820_v35 = vor.u32 %v2214_v24, %v1819_v10  ;;  %v1863_v60 = vld [vmem:[%s3147_s0 + $0x218] sm:$0xf] }
 0x111   :  { %1316 = vmatmul.bf16.gmra.mxu1 %v1780_v61  ;;  %1365 = vmatmul.bf16.gmra.mxu2 %v1784_v63  ;;  %v2996_v8 = vadd.f32 %v1265_v45, %v1217_v5  ;;  %v2224_v61 = vld [vmem:[%s3147_s0 + $0x238] sm:$0xf0] }
 0x113   :  { %1414 = vmatmul.bf16.gmra.mxu3 %v1788_v1  ;;  %1463 = vmatmul.bf16.gmra.mxu0 %v1792_v2  ;;  %v1852_v2 = vor.u32 %v2218_v49, %v1849_v51 }
 0x114   :  { %v1170_v9 = vpop.f32.mrf.mxu2 }
 0x115   :  { %v1171_v16 = vadd.f32 %v1170_v9, %v1122_v14  ;;  %v1860_v14 = vor.u32 %v2219_v57, %v1857_v59 }
 0x116   :  { %v1219_v17 = vpop.f32.mrf.mxu3  ;;  %v1123_v13 = vpop.f32.mrf.mxu1 }
 0x117   :  { %v1220_v6 = vadd.f32 %v1219_v17, %v1171_v16  ;;  %v1124_v26 = vadd.f32 %v1123_v13, %v2848_v22  ;;  %v1828_v22 = vor.u32 %v2215_v29, %v1827_v28 }
 0x118   :  { %v1270_v19 = vpop.f32.mrf.mxu0 }
 0x119   :  { %v3005_v21 = vadd.f32 %v1268_v7, %v1220_v6 }
 0x11c   :  { %v1172_v30 = vpop.f32.mrf.mxu2 }
 0x11d   :  { %v1173_v31 = vadd.f32 %v1172_v30, %v1124_v26 }
 0x11e   :  { %v1221_v32 = vpop.f32.mrf.mxu3  ;;  %v1126_v36 = vpop.f32.mrf.mxu1 }
 0x11f   :  { %v1222_v39 = vadd.f32 %v1221_v32, %v1173_v31  ;;  %v1127_v43 = vadd.f32 %v1126_v36, %v2784_v55  ;;  %v1855_v55 = vld [vmem:[%s3147_s0 + $0x210] sm:$0xf] }
 0x120   :  { %v1273_v41 = vpop.f32.mrf.mxu0  ;;  %v1856_v5 = vor.u32 %v2223_v53, %v1855_v55 }
 0x121   :  { %1321 = vmatmul.bf16.gmra.mxu1 %v1816_v33  ;;  %1370 = vmatmul.bf16.gmra.mxu2 %v1820_v35  ;;  %v3026_v42 = vadd.f32 %v1270_v19, %v1222_v39 }
 0x123   :  { %1419 = vmatmul.bf16.gmra.mxu3 %v1824_v38  ;;  %1468 = vmatmul.bf16.gmra.mxu0 %v1828_v22 }
 0x124   :  { %v1175_v50 = vpop.f32.mrf.mxu2 }
 0x125   :  { %v1176_v45 = vadd.f32 %v1175_v50, %v1127_v43 }
 0x126   :  { %v1224_v46 = vpop.f32.mrf.mxu3  ;;  %v1128_v56 = vpop.f32.mrf.mxu1 }
 0x127   :  { %v1225_v54 = vadd.f32 %v1224_v46, %v1176_v45  ;;  %v1129_v58 = vadd.f32 %v1128_v56, %v2814_v3  ;;  %v1864_v3 = vor.u32 %v2224_v61, %v1863_v60 }
 0x128   :  { %v1275_v48 = vpop.f32.mrf.mxu0 }
 0x129   :  { %v3035_v52 = vadd.f32 %v1273_v41, %v1225_v54 }
 0x12c   :  { %v1177_v63 = vpop.f32.mrf.mxu2 }
 0x12d   :  { %v1178_v0 = vadd.f32 %v1177_v63, %v1129_v58 }
 0x12e   :  { %v1226_v1 = vpop.f32.mrf.mxu3  ;;  %v1131_v7 = vpop.f32.mrf.mxu1 }
 0x12f   :  { %v1227_v9 = vadd.f32 %v1226_v1, %v1178_v0  ;;  %v1132_v13 = vadd.f32 %v1131_v7, %v2820_v11 }
 0x130   :  { %v1278_v16 = vpop.f32.mrf.mxu0 }
 0x131   :  { %1326 = vmatmul.bf16.gmra.mxu1 %v1852_v2  ;;  %1375 = vmatmul.bf16.gmra.mxu2 %v1856_v5  ;;  %v3056_v17 = vadd.f32 %v1275_v48, %v1227_v9 }
 0x133   :  { %1424 = vmatmul.bf16.gmra.mxu3 %v1860_v14  ;;  %1473 = vmatmul.bf16.gmra.mxu0 %v1864_v3 }
 0x134   :  { %v1180_v6 = vpop.f32.mrf.mxu2 }
 0x135   :  { %v1181_v19 = vadd.f32 %v1180_v6, %v1132_v13 }
 0x136   :  { %v1229_v20 = vpop.f32.mrf.mxu3  ;;  %v1133_v12 = vpop.f32.mrf.mxu1 }
 0x137   :  { %v1230_v10 = vadd.f32 %v1229_v20, %v1181_v19  ;;  %v1134_v26 = vadd.f32 %v1133_v12, %v2850_v23 }
 0x138   :  { %v1280_v24 = vpop.f32.mrf.mxu0 }
 0x139   :  { %v3059_v25 = vadd.f32 %v1278_v16, %v1230_v10 }
 0x13c   :  { %v1182_v27 = vpop.f32.mrf.mxu2 }
 0x13d   :  { %v1183_v28 = vadd.f32 %v1182_v27, %v1134_v26 }
 0x13e   :  { %v1231_v29 = vpop.f32.mrf.mxu3  ;;  %v1292_v30 = vpop.f32.mrf.mxu1 }
 0x13f   :  { %v1232_v31 = vadd.f32 %v1231_v29, %v1183_v28  ;;  %v1293_v11 = vadd.f32 %v1292_v30, %v2858_v40 }
 0x140   :  { %v1439_v32 = vpop.f32.mrf.mxu0 }
 0x141   :  { %v3062_v33 = vadd.f32 %v1280_v24, %v1232_v31 }
 0x144   :  { %v1341_v35 = vpop.f32.mrf.mxu2 }
 0x145   :  { %v1342_v36 = vadd.f32 %v1341_v35, %v1293_v11 }
 0x146   :  { %v1390_v38 = vpop.f32.mrf.mxu3  ;;  %v1294_v22 = vpop.f32.mrf.mxu1 }
 0x147   :  { %v1391_v39 = vadd.f32 %v1390_v38, %v1342_v36  ;;  %v1295_v23 = vadd.f32 %v1294_v22, %v2878_v62 }
 0x148   :  { %v1441_v41 = vpop.f32.mrf.mxu0 }
 0x149   :  { %v1440_v43 = vadd.f32 %v1439_v32, %v1391_v39 }
 0x14b   :  { %1479 = vst [vmem:[%s3148_s2] sm:$0xff] %v1440_v43  ;;  %v1526_v49 = vmul.f32 %v1440_v43, %v1440_v43 }
 0x14c   :  { %v1343_v50 = vpop.f32.mrf.mxu2 }
 0x14d   :  { %v1344_v45 = vadd.f32 %v1343_v50, %v1295_v23 }
 0x14e   :  { %v1392_v46 = vpop.f32.mrf.mxu3  ;;  %v1297_v56 = vpop.f32.mrf.mxu1 }
 0x14f   :  { %v1393_v54 = vadd.f32 %v1392_v46, %v1344_v45  ;;  %v1298_v53 = vadd.f32 %v1297_v56, %v2886_v15 }
 0x150   :  { %v1444_v48 = vpop.f32.mrf.mxu0 }
 0x151   :  { %v1442_v40 = vadd.f32 %v1441_v41, %v1393_v54 }
 0x153   :  { %1480 = vst [vmem:[%s3148_s2 + $0x8] sm:$0xff] %v1442_v40  ;;  %v1502_v51 = vadd.f32 %v1442_v40, %v1440_v43  ;;  %v1527_v55 = vmul.f32 %v1442_v40, %v1442_v40 }
 0x154   :  { %v1346_v57 = vpop.f32.mrf.mxu2 }
 0x155   :  { %v1542_v58 = vadd.f32 %v1527_v55, %v1526_v49  ;;  %v1347_v59 = vadd.f32 %v1346_v57, %v1298_v53 }
 0x156   :  { %v1395_v62 = vpop.f32.mrf.mxu3  ;;  %v1299_v60 = vpop.f32.mrf.mxu1 }
 0x157   :  { %v1396_v61 = vadd.f32 %v1395_v62, %v1347_v59  ;;  %v1300_v5 = vadd.f32 %v1299_v60, %v2907_v34 }
 0x158   :  { %v1446_v63 = vpop.f32.mrf.mxu0 }
 0x159   :  { %v1445_v0 = vadd.f32 %v1444_v48, %v1396_v61 }
 0x15b   :  { %1481 = vst [vmem:[%s3148_s2 + $0x10] sm:$0xff] %v1445_v0  ;;  %v1503_v1 = vadd.f32 %v1502_v51, %v1445_v0  ;;  %v1528_v2 = vmul.f32 %v1445_v0, %v1445_v0 }
 0x15c   :  { %v1348_v7 = vpop.f32.mrf.mxu2 }
 0x15d   :  { %v1543_v14 = vadd.f32 %v1542_v58, %v1528_v2  ;;  %v1349_v3 = vadd.f32 %v1348_v7, %v1300_v5 }
 0x15e   :  { %v1397_v15 = vpop.f32.mrf.mxu3  ;;  %v1302_v9 = vpop.f32.mrf.mxu1 }
 0x15f   :  { %v1398_v16 = vadd.f32 %v1397_v15, %v1349_v3  ;;  %v1303_v12 = vadd.f32 %v1302_v9, %v2916_v44 }
 0x160   :  { %v1449_v13 = vpop.f32.mrf.mxu0 }
 0x161   :  { %v1447_v6 = vadd.f32 %v1446_v63, %v1398_v16 }
 0x163   :  { %1482 = vst [vmem:[%s3148_s2 + $0x18] sm:$0xff] %v1447_v6  ;;  %v1504_v19 = vadd.f32 %v1503_v1, %v1447_v6  ;;  %v1529_v20 = vmul.f32 %v1447_v6, %v1447_v6 }
 0x164   :  { %v1351_v10 = vpop.f32.mrf.mxu2 }
 0x165   :  { %v1544_v24 = vadd.f32 %v1543_v14, %v1529_v20  ;;  %v1352_v26 = vadd.f32 %v1351_v10, %v1303_v12 }
 0x166   :  { %v1400_v34 = vpop.f32.mrf.mxu3  ;;  %v1304_v27 = vpop.f32.mrf.mxu1 }
 0x167   :  { %v1401_v28 = vadd.f32 %v1400_v34, %v1352_v26  ;;  %v1305_v11 = vadd.f32 %v1304_v27, %v2937_v4 }
 0x168   :  { %v1451_v29 = vpop.f32.mrf.mxu0 }
 0x169   :  { %v1450_v30 = vadd.f32 %v1449_v13, %v1401_v28 }
 0x16b   :  { %1483 = vst [vmem:[%s3148_s2 + $0x20] sm:$0xff] %v1450_v30  ;;  %v1505_v31 = vadd.f32 %v1504_v19, %v1450_v30  ;;  %v1530_v32 = vmul.f32 %v1450_v30, %v1450_v30 }
 0x16c   :  { %v1353_v35 = vpop.f32.mrf.mxu2 }
 0x16d   :  { %v1545_v36 = vadd.f32 %v1544_v24, %v1530_v32  ;;  %v1354_v38 = vadd.f32 %v1353_v35, %v1305_v11 }
 0x16e   :  { %v1402_v44 = vpop.f32.mrf.mxu3  ;;  %v1307_v22 = vpop.f32.mrf.mxu1 }
 0x16f   :  { %v1403_v39 = vadd.f32 %v1402_v44, %v1354_v38  ;;  %v1308_v45 = vadd.f32 %v1307_v22, %v2946_v18 }
 0x170   :  { %v1454_v41 = vpop.f32.mrf.mxu0 }
 0x171   :  { %v1452_v43 = vadd.f32 %v1451_v29, %v1403_v39 }
 0x173   :  { %1484 = vst [vmem:[%s3148_s2 + $0x28] sm:$0xff] %v1452_v43  ;;  %v1506_v23 = vadd.f32 %v1505_v31, %v1452_v43  ;;  %v1531_v50 = vmul.f32 %v1452_v43, %v1452_v43 }
 0x174   :  { %v1356_v46 = vpop.f32.mrf.mxu2 }
 0x175   :  { %v1546_v56 = vadd.f32 %v1545_v36, %v1531_v50  ;;  %v1357_v54 = vadd.f32 %v1356_v46, %v1308_v45 }
 0x176   :  { %v1405_v4 = vpop.f32.mrf.mxu3  ;;  %v1309_v48 = vpop.f32.mrf.mxu1 }
 0x177   :  { %v1406_v40 = vadd.f32 %v1405_v4, %v1357_v54  ;;  %v1310_v57 = vadd.f32 %v1309_v48, %v2966_v37 }
 0x178   :  { %v1456_v49 = vpop.f32.mrf.mxu0 }
 0x179   :  { %v1455_v51 = vadd.f32 %v1454_v41, %v1406_v40 }
 0x17b   :  { %1485 = vst [vmem:[%s3148_s2 + $0x30] sm:$0xff] %v1455_v51  ;;  %v1507_v55 = vadd.f32 %v1506_v23, %v1455_v51  ;;  %v1532_v53 = vmul.f32 %v1455_v51, %v1455_v51 }
 0x17c   :  { %v1358_v58 = vpop.f32.mrf.mxu2 }
 0x17d   :  { %v1547_v59 = vadd.f32 %v1546_v56, %v1532_v53  ;;  %v1359_v62 = vadd.f32 %v1358_v58, %v1310_v57 }
 0x17e   :  { %v1407_v18 = vpop.f32.mrf.mxu3  ;;  %v1312_v60 = vpop.f32.mrf.mxu1 }
 0x17f   :  { %v1408_v61 = vadd.f32 %v1407_v18, %v1359_v62  ;;  %v1313_v5 = vadd.f32 %v1312_v60, %v2975_v47 }
 0x180   :  { %v1459_v63 = vpop.f32.mrf.mxu0 }
 0x181   :  { %v1457_v0 = vadd.f32 %v1456_v49, %v1408_v61 }
 0x183   :  { %1486 = vst [vmem:[%s3148_s2 + $0x38] sm:$0xff] %v1457_v0  ;;  %v1508_v1 = vadd.f32 %v1507_v55, %v1457_v0  ;;  %v1533_v2 = vmul.f32 %v1457_v0, %v1457_v0  ;;  %v2322_v55 = vmov 0.0  }
 0x184   :  { %v1361_v7 = vpop.f32.mrf.mxu2  ;;  %1499 = vst [vmem:[%s3149_s3] sm:$0x1] %v2322_v55 }
 0x185   :  { %v1548_v14 = vadd.f32 %v1547_v59, %v1533_v2  ;;  %v1362_v3 = vadd.f32 %v1361_v7, %v1313_v5  ;;  %1500 = vst [vmem:[%s3150_s4] sm:$0x1] %v2322_v55 }
 0x186   :  { %v1410_v37 = vpop.f32.mrf.mxu3  ;;  %v1314_v15 = vpop.f32.mrf.mxu1 }
 0x187   :  { %v1411_v9 = vadd.f32 %v1410_v37, %v1362_v3  ;;  %v1315_v20 = vadd.f32 %v1314_v15, %v2996_v8 }
 0x188   :  { %v1461_v16 = vpop.f32.mrf.mxu0 }
 0x189   :  { %v1460_v13 = vadd.f32 %v1459_v63, %v1411_v9 }
 0x18b   :  { %1487 = vst [vmem:[%s3148_s2 + $0x40] sm:$0xff] %v1460_v13  ;;  %v1509_v6 = vadd.f32 %v1508_v1, %v1460_v13  ;;  %v1534_v19 = vmul.f32 %v1460_v13, %v1460_v13 }
 0x18c   :  { %v1363_v12 = vpop.f32.mrf.mxu2 }
 0x18d   :  { %v1549_v10 = vadd.f32 %v1548_v14, %v1534_v19  ;;  %v1364_v24 = vadd.f32 %v1363_v12, %v1315_v20 }
 0x18e   :  { %v1412_v47 = vpop.f32.mrf.mxu3  ;;  %v1317_v26 = vpop.f32.mrf.mxu1 }
 0x18f   :  { %v1413_v34 = vadd.f32 %v1412_v47, %v1364_v24  ;;  %v1318_v31 = vadd.f32 %v1317_v26, %v3005_v21 }
 0x190   :  { %v1464_v27 = vpop.f32.mrf.mxu0 }
 0x191   :  { %v1462_v28 = vadd.f32 %v1461_v16, %v1413_v34 }
 0x193   :  { %1488 = vst [vmem:[%s3148_s2 + $0x48] sm:$0xff] %v1462_v28  ;;  %v1510_v29 = vadd.f32 %v1509_v6, %v1462_v28  ;;  %v1535_v30 = vmul.f32 %v1462_v28, %v1462_v28 }
 0x194   :  { %v1366_v32 = vpop.f32.mrf.mxu2 }
 0x195   :  { %v1550_v11 = vadd.f32 %v1549_v10, %v1535_v30  ;;  %v1367_v35 = vadd.f32 %v1366_v32, %v1318_v31 }
 0x196   :  { %v1415_v8 = vpop.f32.mrf.mxu3  ;;  %v1319_v36 = vpop.f32.mrf.mxu1 }
 0x197   :  { %v1416_v38 = vadd.f32 %v1415_v8, %v1367_v35  ;;  %v1320_v43 = vadd.f32 %v1319_v36, %v3026_v42 }
 0x198   :  { %v1466_v44 = vpop.f32.mrf.mxu0 }
 0x199   :  { %v1465_v22 = vadd.f32 %v1464_v27, %v1416_v38 }
 0x19b   :  { %1489 = vst [vmem:[%s3148_s2 + $0x50] sm:$0xff] %v1465_v22  ;;  %v1511_v39 = vadd.f32 %v1510_v29, %v1465_v22  ;;  %v1536_v41 = vmul.f32 %v1465_v22, %v1465_v22 }
 0x19c   :  { %v1368_v23 = vpop.f32.mrf.mxu2 }
 0x19d   :  { %v1551_v50 = vadd.f32 %v1550_v11, %v1536_v41  ;;  %v1369_v45 = vadd.f32 %v1368_v23, %v1320_v43  ;;  %v1501_v43 = vld [vmem:[%s3149_s3] sm:$0x1] }
 0x19e   :  { %v1417_v21 = vpop.f32.mrf.mxu3  ;;  %v1322_v46 = vpop.f32.mrf.mxu1 }
 0x19f   :  { %v1418_v56 = vadd.f32 %v1417_v21, %v1369_v45  ;;  %v1323_v49 = vadd.f32 %v1322_v46, %v3035_v52  ;;  %v1525_v45 = vld [vmem:[%s3150_s4] sm:$0x1] }
 0x1a0   :  { %v1469_v4 = vpop.f32.mrf.mxu0 }
 0x1a1   :  { %v1467_v54 = vadd.f32 %v1466_v44, %v1418_v56 }
 0x1a3   :  { %1490 = vst [vmem:[%s3148_s2 + $0x58] sm:$0xff] %v1467_v54  ;;  %v1512_v48 = vadd.f32 %v1511_v39, %v1467_v54  ;;  %v1537_v40 = vmul.f32 %v1467_v54, %v1467_v54 }
 0x1a4   :  { %v1371_v51 = vpop.f32.mrf.mxu2 }
 0x1a5   :  { %v1552_v42 = vadd.f32 %v1551_v50, %v1537_v40  ;;  %v1372_v53 = vadd.f32 %v1371_v51, %v1323_v49 }
 0x1a6   :  { %v1420_v57 = vpop.f32.mrf.mxu3  ;;  %v1324_v58 = vpop.f32.mrf.mxu1 }
 0x1a7   :  { %v1421_v59 = vadd.f32 %v1420_v57, %v1372_v53  ;;  %v1325_v60 = vadd.f32 %v1324_v58, %v3056_v17 }
 0x1a8   :  { %v1471_v61 = vpop.f32.mrf.mxu0 }
 0x1a9   :  { %v1470_v62 = vadd.f32 %v1469_v4, %v1421_v59 }
 0x1ab   :  { %1491 = vst [vmem:[%s3148_s2 + $0x60] sm:$0xff] %v1470_v62  ;;  %v1513_v52 = vadd.f32 %v1512_v48, %v1470_v62  ;;  %v1538_v18 = vmul.f32 %v1470_v62, %v1470_v62 }
 0x1ac   :  { %v1373_v63 = vpop.f32.mrf.mxu2 }
 0x1ad   :  { %v1553_v0 = vadd.f32 %v1552_v42, %v1538_v18  ;;  %v1374_v1 = vadd.f32 %v1373_v63, %v1325_v60 }
 0x1ae   :  { %v1422_v2 = vpop.f32.mrf.mxu3  ;;  %v1327_v5 = vpop.f32.mrf.mxu1 }
 0x1af   :  { %v1423_v7 = vadd.f32 %v1422_v2, %v1374_v1  ;;  %v1328_v15 = vadd.f32 %v1327_v5, %v3059_v25 }
 0x1b0   :  { %v1474_v6 = vpop.f32.mrf.mxu0 }
 0x1b1   :  { %v1472_v14 = vadd.f32 %v1471_v61, %v1423_v7 }
 0x1b3   :  { %1492 = vst [vmem:[%s3148_s2 + $0x68] sm:$0xff] %v1472_v14  ;;  %v1514_v3 = vadd.f32 %v1513_v52, %v1472_v14  ;;  %v1539_v37 = vmul.f32 %v1472_v14, %v1472_v14 }
 0x1b4   :  { %v1376_v9 = vpop.f32.mrf.mxu2 }
 0x1b5   :  { %v1554_v16 = vadd.f32 %v1553_v0, %v1539_v37  ;;  %v1377_v13 = vadd.f32 %v1376_v9, %v1328_v15 }
 0x1b6   :  { %v1425_v17 = vpop.f32.mrf.mxu3  ;;  %v1329_v20 = vpop.f32.mrf.mxu1 }
 0x1b7   :  { %v1426_v19 = vadd.f32 %v1425_v17, %v1377_v13  ;;  %v1330_v47 = vadd.f32 %v1329_v20, %v3062_v33 }
 0x1b8   :  { %v1476_v29 = vpop.f32.mrf.mxu0 }
 0x1b9   :  { %v1475_v12 = vadd.f32 %v1474_v6, %v1426_v19 }
 0x1bb   :  { %1493 = vst [vmem:[%s3148_s2 + $0x70] sm:$0xff] %v1475_v12  ;;  %v1515_v10 = vadd.f32 %v1514_v3, %v1475_v12  ;;  %v1540_v24 = vmul.f32 %v1475_v12, %v1475_v12 }
 0x1bc   :  { %v1378_v26 = vpop.f32.mrf.mxu2 }
 0x1bd   :  { %v1555_v34 = vadd.f32 %v1554_v16, %v1540_v24  ;;  %v1379_v27 = vadd.f32 %v1378_v26, %v1330_v47 }
 0x1be   :  { %v1427_v25 = vpop.f32.mrf.mxu3 }
 0x1bf   :  { %v1428_v28 = vadd.f32 %v1427_v25, %v1379_v27 }
 0x1c1   :  { %v1477_v30 = vadd.f32 %v1476_v29, %v1428_v28 }
 0x1c3   :  { %1494 = vst [vmem:[%s3148_s2 + $0x78] sm:$0xff] %v1477_v30  ;;  %v1516_v31 = vadd.f32 %v1515_v10, %v1477_v30  ;;  %v1541_v32 = vmul.f32 %v1477_v30, %v1477_v30 }
 0x1c5   :  { %v1517_v11 = vrot.slane %v1516_v31, 4  ;;  %v1556_v35 = vadd.f32 %v1555_v34, %v1541_v32 }
 0x1c7   :  { %v1518_v8 = vadd.f32 %v1517_v11, %v1516_v31  ;;  %v1557_v36 = vrot.slane %v1556_v35, 4 }
 0x1c9   :  { %v1519_v38 = vrot.slane %v1518_v8, 2  ;;  %v1558_v44 = vadd.f32 %v1557_v36, %v1556_v35 }
 0x1cb   :  { %v1520_v33 = vadd.f32 %v1519_v38, %v1518_v8  ;;  %v1559_v22 = vrot.slane %v1558_v44, 2 }
 0x1cd   :  { %v1521_v39 = vrot.slane %v1520_v33, 1  ;;  %v1560_v41 = vadd.f32 %v1559_v22, %v1558_v44 }
 0x1cf   :  { %v1522_v23 = vadd.f32 %v1521_v39, %v1520_v33  ;;  %v1561_v50 = vrot.slane %v1560_v41, 1 }
 0x1d1   :  { %v1523_v21 = vadd.f32 %v1522_v23, %v1501_v43  ;;  %v1562_v46 = vadd.f32 %v1561_v50, %v1560_v41 }
 0x1d3   :  { %1524 = vst [vmem:[%s3149_s3] sm:$0x1] %v1523_v21  ;;  %v1563_v56 = vadd.f32 %v1562_v46, %v1525_v45 }
 0x1d5   :  { %1564 = vst [vmem:[%s3150_s4] sm:$0x1] %v1563_v56 }

// kernel: _lambda_.27
= control target key start
LH: loop header
LB: loop body
LE: loop exit
PB: predicated region body
PF: predicated region fallthrough
CT: control target
= control target key end

     0   :  { %s493_s0 = inlined_call_operand.vmem [shape: f32[128,128], index: 0, kind: input, shape index: {}]   ;;  %s494_s1 = inlined_call_operand.vmem [shape: f32[1,128], index: 1, kind: input, shape index: {}]   ;;  %s495_s2 = inlined_call_operand.vmem [shape: f32[1,128], index: 2, kind: input, shape index: {}]   ;;  %s496_s3 = inlined_call_operand.vmem [shape: f32[128,128], index: 3, kind: input, shape index: {}]   ;;  %s497_s4 = inlined_call_operand.vmem [shape: f32[1,128], index: 4, kind: input, shape index: {}]   ;;  %s498_s5 = inlined_call_operand.vmem [shape: f32[1,128], index: 5, kind: input, shape index: {}]   ;;  %s499_s6 = inlined_call_operand.vmem [shape: bf16[128,128], index: 6, kind: output, shape index: {}]  }
   0x1   :  { %v23_v0 = vld [vmem:[%s493_s0] sm:$0xff]  ;;  %v24_v1 = vld [vmem:[%s493_s0 + $0x8] sm:$0xff]  ;;  %v25_v10 = vld [vmem:[%s493_s0 + $0x10] sm:$0xff] }
   0x2   :  { %v298_v2 = vld [vmem:[%s494_s1] ss:$0 sm:$0xff]  ;;  %v80_v5 = vld [vmem:[%s496_s3 + $0x8] sm:$0xff]  ;;  %v26_v11 = vld [vmem:[%s493_s0 + $0x18] sm:$0xff] }
   0x3   :  { %v303_v3 = vld [vmem:[%s495_s2] ss:$0 sm:$0xff]  ;;  %v43_v6 = vmul.f32 %v298_v2, %v23_v0  ;;  %v44_v7 = vmul.f32 %v298_v2, %v24_v1  ;;  %v81_v12 = vld [vmem:[%s496_s3 + $0x10] sm:$0xff]  ;;  %v82_v17 = vld [vmem:[%s496_s3 + $0x18] sm:$0xff]  ;;  %v45_v20 = vmul.f32 %v298_v2, %v25_v10  ;;  %v46_v21 = vmul.f32 %v298_v2, %v26_v11 }
   0x4   :  { %v79_v4 = vld [vmem:[%s496_s3] sm:$0xff]  ;;  %v28_v19 = vld [vmem:[%s493_s0 + $0x28] sm:$0xff]  ;;  %v29_v34 = vld [vmem:[%s493_s0 + $0x30] sm:$0xff] }
   0x5   :  { %v316_v8 = vld [vmem:[%s497_s4] ss:$0 sm:$0xff]  ;;  %v63_v13 = vadd.f32 %v303_v3, %v43_v6  ;;  %v64_v14 = vadd.f32 %v303_v3, %v44_v7  ;;  %v48_v27 = vmul.f32 %v298_v2, %v28_v19  ;;  %v84_v29 = vld [vmem:[%s496_s3 + $0x28] sm:$0xff]  ;;  %v65_v30 = vadd.f32 %v303_v3, %v45_v20  ;;  %v30_v35 = vld [vmem:[%s493_s0 + $0x38] sm:$0xff] }
   0x6   :  { %v321_v9 = vld [vmem:[%s498_s5] ss:$0 sm:$0xff]  ;;  %v99_v15 = vmul.f32 %v316_v8, %v79_v4  ;;  %v100_v16 = vmul.f32 %v316_v8, %v80_v5  ;;  %v101_v22 = vmul.f32 %v316_v8, %v81_v12  ;;  %v102_v23 = vmul.f32 %v316_v8, %v82_v17  ;;  %v85_v44 = vld [vmem:[%s496_s3 + $0x30] sm:$0xff]  ;;  %v86_v49 = vld [vmem:[%s496_s3 + $0x38] sm:$0xff] }
   0x7   :  { %v27_v18 = vld [vmem:[%s493_s0 + $0x20] sm:$0xff]  ;;  %v66_v31 = vadd.f32 %v303_v3, %v46_v21  ;;  %v68_v39 = vadd.f32 %v303_v3, %v48_v27  ;;  %v104_v43 = vmul.f32 %v316_v8, %v84_v29  ;;  %v49_v47 = vmul.f32 %v298_v2, %v29_v34  ;;  %v32_v55 = vld [vmem:[%s493_s0 + $0x48] sm:$0xff]  ;;  %v33_v10 = vld [vmem:[%s493_s0 + $0x50] sm:$0xff] }
   0x8   :  { %v119_v24 = vadd.f32 %v321_v9, %v99_v15  ;;  %v120_v25 = vadd.f32 %v321_v9, %v100_v16  ;;  %v47_v26 = vmul.f32 %v298_v2, %v27_v18  ;;  %v83_v28 = vld [vmem:[%s496_s3 + $0x20] sm:$0xff]  ;;  %v121_v32 = vadd.f32 %v321_v9, %v101_v22  ;;  %v88_v61 = vld [vmem:[%s496_s3 + $0x48] sm:$0xff]  ;;  %v34_v15 = vld [vmem:[%s493_s0 + $0x58] sm:$0xff] }
   0x9   :  { %v122_v33 = vadd.f32 %v321_v9, %v102_v23  ;;  %v103_v42 = vmul.f32 %v316_v8, %v83_v28  ;;  %v50_v48 = vmul.f32 %v298_v2, %v30_v35  ;;  %v124_v53 = vadd.f32 %v321_v9, %v104_v43  ;;  %v31_v54 = vld [vmem:[%s493_s0 + $0x40] sm:$0xff]  ;;  %v89_v16 = vld [vmem:[%s496_s3 + $0x50] sm:$0xff]  ;;  %v90_v21 = vld [vmem:[%s496_s3 + $0x58] sm:$0xff] }
   0xa   :  { %v135_v36 = vadd.f32 %v119_v24, %v63_v13  ;;  %v136_v37 = vadd.f32 %v120_v25, %v64_v14  ;;  %v67_v38 = vadd.f32 %v303_v3, %v47_v26  ;;  %v137_v40 = vadd.f32 %v121_v32, %v65_v30  ;;  %v87_v56 = vld [vmem:[%s496_s3 + $0x40] sm:$0xff] }
   0xb   :  { %v138_v41 = vadd.f32 %v122_v33, %v66_v31  ;;  %v123_v52 = vadd.f32 %v321_v9, %v103_v42  ;;  %v69_v58 = vadd.f32 %v303_v3, %v49_v47  ;;  %v70_v59 = vadd.f32 %v303_v3, %v50_v48  ;;  %v35_v26 = vld [vmem:[%s493_s0 + $0x60] sm:$0xff]  ;;  %v36_v31 = vld [vmem:[%s493_s0 + $0x68] sm:$0xff]  ;;  %v37_v42 = vld [vmem:[%s493_s0 + $0x70] sm:$0xff] }
   0xc   :  { %v151_v45 = vmax.f32 %v135_v36, 0.0  ;;  %v152_v46 = vmax.f32 %v136_v37, 0.0  ;;  %v153_v50 = vmax.f32 %v137_v40, 0.0  ;;  %v105_v60 = vmul.f32 %v316_v8, %v85_v44  ;;  %v91_v36 = vld [vmem:[%s496_s3 + $0x60] sm:$0xff]  ;;  %v92_v37 = vld [vmem:[%s496_s3 + $0x68] sm:$0xff]  ;;  %v38_v47 = vld [vmem:[%s493_s0 + $0x78] sm:$0xff] }
   0xd   :  { %v154_v51 = vmax.f32 %v138_v41, 0.0  ;;  %v139_v63 = vadd.f32 %v123_v52, %v67_v38  ;;  %v140_v0 = vadd.f32 %v124_v53, %v68_v39  ;;  %v106_v1 = vmul.f32 %v316_v8, %v86_v49  ;;  %v93_v52 = vld [vmem:[%s496_s3 + $0x70] sm:$0xff]  ;;  %v94_v53 = vld [vmem:[%s496_s3 + $0x78] sm:$0xff] }
   0xe   :  { %v206_v57 = vpack.c.bf16 %v152_v46, %v151_v45  ;;  %v125_v4 = vadd.f32 %v321_v9, %v105_v60  ;;  %v51_v5 = vmul.f32 %v298_v2, %v31_v54  ;;  %v52_v6 = vmul.f32 %v298_v2, %v32_v55 }
   0xf   :  { %v211_v62 = vpack.c.bf16 %v154_v51, %v153_v50  ;;  %v107_v7 = vmul.f32 %v316_v8, %v87_v56  ;;  %v155_v11 = vmax.f32 %v139_v63, 0.0  ;;  %v156_v12 = vmax.f32 %v140_v0, 0.0 }
  0x10   :  { %207 = vst [vmem:[%s499_s6] sm:$0xff] %v206_v57   ;;  %v126_v13 = vadd.f32 %v321_v9, %v106_v1  ;;  %v108_v14 = vmul.f32 %v316_v8, %v88_v61  ;;  %v141_v17 = vadd.f32 %v125_v4, %v69_v58  ;;  %v71_v18 = vadd.f32 %v303_v3, %v51_v5 }
  0x11   :  { %243 = vst [vmem:[%s499_s6 + $0x8] sm:$0xff] %v211_v62   ;;  %v72_v19 = vadd.f32 %v303_v3, %v52_v6  ;;  %v127_v20 = vadd.f32 %v321_v9, %v107_v7  ;;  %v216_v22 = vpack.c.bf16 %v156_v12, %v155_v11  ;;  %v53_v25 = vmul.f32 %v298_v2, %v33_v10 }
  0x12   :  { %v142_v23 = vadd.f32 %v126_v13, %v70_v59  ;;  %v128_v24 = vadd.f32 %v321_v9, %v108_v14  ;;  %v157_v27 = vmax.f32 %v141_v17, 0.0  ;;  %v54_v29 = vmul.f32 %v298_v2, %v34_v15 }
  0x13   :  { %v143_v28 = vadd.f32 %v127_v20, %v71_v18  ;;  %v109_v30 = vmul.f32 %v316_v8, %v89_v16  ;;  %244 = vst [vmem:[%s499_s6 + $0x10] sm:$0xff] %v216_v22   ;;  %v73_v34 = vadd.f32 %v303_v3, %v53_v25  ;;  %v110_v35 = vmul.f32 %v316_v8, %v90_v21 }
  0x14   :  { %v158_v32 = vmax.f32 %v142_v23, 0.0  ;;  %v144_v33 = vadd.f32 %v128_v24, %v72_v19  ;;  %v74_v39 = vadd.f32 %v303_v3, %v54_v29  ;;  %v55_v41 = vmul.f32 %v298_v2, %v35_v26 }
  0x15   :  { %v159_v38 = vmax.f32 %v143_v28, 0.0  ;;  %v129_v40 = vadd.f32 %v321_v9, %v109_v30  ;;  %v130_v45 = vadd.f32 %v321_v9, %v110_v35  ;;  %v56_v46 = vmul.f32 %v298_v2, %v36_v31 }
  0x16   :  { %v221_v43 = vpack.c.bf16 %v158_v32, %v157_v27  ;;  %v160_v44 = vmax.f32 %v144_v33, 0.0  ;;  %v75_v49 = vadd.f32 %v303_v3, %v55_v41  ;;  %v111_v50 = vmul.f32 %v316_v8, %v91_v36 }
  0x17   :  { %v145_v48 = vadd.f32 %v129_v40, %v73_v34  ;;  %v112_v51 = vmul.f32 %v316_v8, %v92_v37  ;;  %v146_v55 = vadd.f32 %v130_v45, %v74_v39  ;;  %v76_v56 = vadd.f32 %v303_v3, %v56_v46 }
  0x18   :  { %245 = vst [vmem:[%s499_s6 + $0x18] sm:$0xff] %v221_v43   ;;  %v226_v54 = vpack.c.bf16 %v160_v44, %v159_v38  ;;  %v57_v57 = vmul.f32 %v298_v2, %v37_v42  ;;  %v131_v59 = vadd.f32 %v321_v9, %v111_v50  ;;  %v58_v61 = vmul.f32 %v298_v2, %v38_v47 }
  0x19   :  { %v161_v58 = vmax.f32 %v145_v48, 0.0  ;;  %v132_v60 = vadd.f32 %v321_v9, %v112_v51  ;;  %v162_v62 = vmax.f32 %v146_v55, 0.0  ;;  %v113_v0 = vmul.f32 %v316_v8, %v93_v52 }
  0x1a   :  { %246 = vst [vmem:[%s499_s6 + $0x20] sm:$0xff] %v226_v54   ;;  %v77_v63 = vadd.f32 %v303_v3, %v57_v57  ;;  %v114_v1 = vmul.f32 %v316_v8, %v94_v53  ;;  %v147_v4 = vadd.f32 %v131_v59, %v75_v49  ;;  %v78_v6 = vadd.f32 %v303_v3, %v58_v61 }
  0x1b   :  { %v148_v5 = vadd.f32 %v132_v60, %v76_v56  ;;  %v231_v7 = vpack.c.bf16 %v162_v62, %v161_v58  ;;  %v133_v10 = vadd.f32 %v321_v9, %v113_v0 }
  0x1c   :  { %v134_v2 = vadd.f32 %v321_v9, %v114_v1  ;;  %v163_v11 = vmax.f32 %v147_v4, 0.0 }
  0x1d   :  { %v164_v12 = vmax.f32 %v148_v5, 0.0  ;;  %247 = vst [vmem:[%s499_s6 + $0x28] sm:$0xff] %v231_v7   ;;  %v149_v13 = vadd.f32 %v133_v10, %v77_v63 }
  0x1e   :  { %v150_v14 = vadd.f32 %v134_v2, %v78_v6 }
  0x1f   :  { %v236_v15 = vpack.c.bf16 %v164_v12, %v163_v11  ;;  %v165_v16 = vmax.f32 %v149_v13, 0.0 }
  0x20   :  { %v166_v8 = vmax.f32 %v150_v14, 0.0 }
  0x21   :  { %248 = vst [vmem:[%s499_s6 + $0x30] sm:$0xff] %v236_v15  }
  0x22   :  { %v241_v3 = vpack.c.bf16 %v166_v8, %v165_v16 }
  0x24   :  { %249 = vst [vmem:[%s499_s6 + $0x38] sm:$0xff] %v241_v3  }

// kernel: _lambda_.29
= control target key start
LH: loop header
LB: loop body
LE: loop exit
PB: predicated region body
PF: predicated region fallthrough
CT: control target
= control target key end

     0   :  { %s107_s0 = inlined_call_operand.vmem [shape: f32[32,128], index: 0, kind: input, shape index: {}]   ;;  %s108_s1 = inlined_call_operand.vmem [shape: f32[1,128], index: 1, kind: input, shape index: {}]   ;;  %s109_s2 = inlined_call_operand.vmem [shape: f32[1,128], index: 2, kind: input, shape index: {}]   ;;  %s110_s3 = inlined_call_operand.vmem [shape: bf16[32,128], index: 3, kind: output, shape index: {}]  }
   0x1   :  { %v14_v0 = vld [vmem:[%s107_s0] sm:$0xff]  ;;  %v15_v1 = vld [vmem:[%s107_s0 + $0x8] sm:$0xff]  ;;  %v16_v4 = vld [vmem:[%s107_s0 + $0x10] sm:$0xff] }
   0x2   :  { %v61_v2 = vld [vmem:[%s108_s1] ss:$0 sm:$0xff]  ;;  %v17_v5 = vld [vmem:[%s107_s0 + $0x18] sm:$0xff] }
   0x3   :  { %v62_v3 = vld [vmem:[%s109_s2] ss:$0 sm:$0xff]  ;;  %v22_v6 = vmul.f32 %v61_v2, %v14_v0  ;;  %v23_v7 = vmul.f32 %v61_v2, %v15_v1  ;;  %v24_v8 = vmul.f32 %v61_v2, %v16_v4  ;;  %v25_v9 = vmul.f32 %v61_v2, %v17_v5 }
   0x5   :  { %v30_v10 = vadd.f32 %v62_v3, %v22_v6  ;;  %v31_v11 = vadd.f32 %v62_v3, %v23_v7  ;;  %v32_v12 = vadd.f32 %v62_v3, %v24_v8  ;;  %v33_v13 = vadd.f32 %v62_v3, %v25_v9 }
   0x7   :  { %v34_v14 = vmax.f32 %v30_v10, 0.0  ;;  %v35_v15 = vmax.f32 %v31_v11, 0.0  ;;  %v36_v16 = vmax.f32 %v32_v12, 0.0  ;;  %v37_v17 = vmax.f32 %v33_v13, 0.0 }
   0x9   :  { %v53_v18 = vpack.c.bf16 %v35_v15, %v34_v14  ;;  %v58_v19 = vpack.c.bf16 %v37_v17, %v36_v16 }
   0xb   :  { %54 = vst [vmem:[%s110_s3] sm:$0xff] %v53_v18  }
   0xc   :  { %60 = vst [vmem:[%s110_s3 + $0x8] sm:$0xff] %v58_v19  }

// kernel: _lambda_.28
= control target key start
LH: loop header
LB: loop body
LE: loop exit
PB: predicated region body
PF: predicated region fallthrough
CT: control target
= control target key end

     0   :  { %s1762_s1 = inlined_call_operand.vmem [shape: bf16[1152,128], index: 1, kind: input, shape index: {}]   ;;  %s1763_s0 = inlined_call_operand.vmem [shape: bf16[32,1152], index: 0, kind: input, shape index: {}]   ;;  %s1764_s3 = inlined_call_operand.vmem [shape: f32[1,128], index: 3, kind: output, shape index: {1}]   ;;  %s1765_s4 = inlined_call_operand.vmem [shape: f32[1,128], index: 4, kind: output, shape index: {2}]   ;;  %s1766_s2 = inlined_call_operand.vmem [shape: f32[32,128], index: 2, kind: output, shape index: {0}]  }
   0x1   :  { %v1308_v0 = vld [vmem:[%s1762_s1 + $0x38] sm:$0xff]  ;;  %v1307_v4 = vld [vmem:[%s1762_s1 + $0x30] sm:$0xff]  ;;  %v1306_v8 = vld [vmem:[%s1762_s1 + $0x28] sm:$0xff] }
   0x2   :  { %v1316_v1 = vld [vmem:[%s1762_s1 + $0x78] sm:$0xff]  ;;  %702 = vmatpush.bf16.msra.mxu0 %v1308_v0  ;;  %v1315_v5 = vld [vmem:[%s1762_s1 + $0x70] sm:$0xff]  ;;  %v1314_v9 = vld [vmem:[%s1762_s1 + $0x68] sm:$0xff] }
   0x3   :  { %v1324_v2 = vld [vmem:[%s1762_s1 + $0xb8] sm:$0xff]  ;;  %721 = vmatpush.bf16.msra.mxu1 %v1316_v1  ;;  %v1323_v6 = vld [vmem:[%s1762_s1 + $0xb0] sm:$0xff]  ;;  %v1322_v10 = vld [vmem:[%s1762_s1 + $0xa8] sm:$0xff] }
   0x4   :  { %v1332_v3 = vld [vmem:[%s1762_s1 + $0xf8] sm:$0xff]  ;;  %740 = vmatpush.bf16.msra.mxu2 %v1324_v2  ;;  %v1331_v7 = vld [vmem:[%s1762_s1 + $0xf0] sm:$0xff]  ;;  %v1330_v11 = vld [vmem:[%s1762_s1 + $0xe8] sm:$0xff] }
   0x5   :  { %759 = vmatpush.bf16.msra.mxu3 %v1332_v3  ;;  %v1305_v12 = vld [vmem:[%s1762_s1 + $0x20] sm:$0xff]  ;;  %v1304_v16 = vld [vmem:[%s1762_s1 + $0x18] sm:$0xff]  ;;  %v1303_v20 = vld [vmem:[%s1762_s1 + $0x10] sm:$0xff] }
   0x6   :  { %703 = vmatpush.bf16.msra.mxu0 %v1307_v4  ;;  %v1313_v13 = vld [vmem:[%s1762_s1 + $0x60] sm:$0xff]  ;;  %v1312_v17 = vld [vmem:[%s1762_s1 + $0x58] sm:$0xff]  ;;  %v1311_v21 = vld [vmem:[%s1762_s1 + $0x50] sm:$0xff] }
   0x7   :  { %722 = vmatpush.bf16.msra.mxu1 %v1315_v5  ;;  %v1321_v14 = vld [vmem:[%s1762_s1 + $0xa0] sm:$0xff]  ;;  %v1320_v18 = vld [vmem:[%s1762_s1 + $0x98] sm:$0xff]  ;;  %v1319_v22 = vld [vmem:[%s1762_s1 + $0x90] sm:$0xff] }
   0x8   :  { %741 = vmatpush.bf16.msra.mxu2 %v1323_v6  ;;  %v1329_v15 = vld [vmem:[%s1762_s1 + $0xe0] sm:$0xff]  ;;  %v1328_v19 = vld [vmem:[%s1762_s1 + $0xd8] sm:$0xff]  ;;  %v1327_v23 = vld [vmem:[%s1762_s1 + $0xd0] sm:$0xff] }
   0x9   :  { %760 = vmatpush.bf16.msra.mxu3 %v1331_v7  ;;  %v1302_v24 = vld [vmem:[%s1762_s1 + $0x8] sm:$0xff]  ;;  %v1301_v28 = vld [vmem:[%s1762_s1] sm:$0xff]  ;;  %v935_v39 = vld [vmem:[%s1763_s0 + $0x2c] sm:$0xf0] }
   0xa   :  { %704 = vmatpush.bf16.msra.mxu0 %v1306_v8  ;;  %v1310_v25 = vld [vmem:[%s1762_s1 + $0x48] sm:$0xff]  ;;  %v1309_v29 = vld [vmem:[%s1762_s1 + $0x40] sm:$0xff]  ;;  %v1340_v40 = vld [vmem:[%s1762_s1 + $0x138] sm:$0xff] }
   0xb   :  { %723 = vmatpush.bf16.msra.mxu1 %v1314_v9  ;;  %v1318_v26 = vld [vmem:[%s1762_s1 + $0x88] sm:$0xff]  ;;  %v1317_v30 = vld [vmem:[%s1762_s1 + $0x80] sm:$0xff]  ;;  %v1348_v41 = vld [vmem:[%s1762_s1 + $0x178] sm:$0xff] }
   0xc   :  { %742 = vmatpush.bf16.msra.mxu2 %v1322_v10  ;;  %v1326_v27 = vld [vmem:[%s1762_s1 + $0xc8] sm:$0xff]  ;;  %v1325_v31 = vld [vmem:[%s1762_s1 + $0xc0] sm:$0xff]  ;;  %v1356_v46 = vld [vmem:[%s1762_s1 + $0x1b8] sm:$0xff] }
   0xd   :  { %761 = vmatpush.bf16.msra.mxu3 %v1330_v11  ;;  %v925_v32 = vld [vmem:[%s1763_s0] sm:$0xf]  ;;  %v1287_v33 = vld [vmem:[%s1763_s0 + $0x20] sm:$0xf0]  ;;  %v927_v35 = vld [vmem:[%s1763_s0 + $0x24] sm:$0xf0] }
   0xe   :  { %705 = vmatpush.bf16.msra.mxu0 %v1305_v12  ;;  %v1283_v34 = vld [vmem:[%s1763_s0 + $0x4] sm:$0xf]  ;;  %v933_v36 = vld [vmem:[%s1763_s0 + $0x8] sm:$0xf]  ;;  %v1288_v37 = vld [vmem:[%s1763_s0 + $0x28] sm:$0xf0]  ;;  %v926_v42 = vor.u32 %v1287_v33, %v925_v32 }
   0xf   :  { %724 = vmatpush.bf16.msra.mxu1 %v1313_v13  ;;  %v1284_v38 = vld [vmem:[%s1763_s0 + $0xc] sm:$0xf]  ;;  %v930_v43 = vor.u32 %v1283_v34, %v927_v35  ;;  %v934_v44 = vor.u32 %v1288_v37, %v933_v36  ;;  %v1364_v47 = vld [vmem:[%s1762_s1 + $0x1f8] sm:$0xff]  ;;  %v1339_v48 = vld [vmem:[%s1762_s1 + $0x130] sm:$0xff] }
  0x10   :  { %743 = vmatpush.bf16.msra.mxu2 %v1321_v14  ;;  %v938_v45 = vor.u32 %v1284_v38, %v935_v39  ;;  %v1347_v49 = vld [vmem:[%s1762_s1 + $0x170] sm:$0xff]  ;;  %v1338_v52 = vld [vmem:[%s1762_s1 + $0x128] sm:$0xff]  ;;  %v1337_v56 = vld [vmem:[%s1762_s1 + $0x120] sm:$0xff] }
  0x11   :  { %762 = vmatpush.bf16.msra.mxu3 %v1329_v15  ;;  %v1355_v50 = vld [vmem:[%s1762_s1 + $0x1b0] sm:$0xff]  ;;  %v1346_v53 = vld [vmem:[%s1762_s1 + $0x168] sm:$0xff]  ;;  %v1345_v57 = vld [vmem:[%s1762_s1 + $0x160] sm:$0xff] }
  0x12   :  { %706 = vmatpush.bf16.msra.mxu0 %v1304_v16  ;;  %v1363_v51 = vld [vmem:[%s1762_s1 + $0x1f0] sm:$0xff]  ;;  %v1354_v54 = vld [vmem:[%s1762_s1 + $0x1a8] sm:$0xff]  ;;  %v1353_v58 = vld [vmem:[%s1762_s1 + $0x1a0] sm:$0xff] }
  0x13   :  { %725 = vmatpush.bf16.msra.mxu1 %v1312_v17  ;;  %v1362_v55 = vld [vmem:[%s1762_s1 + $0x1e8] sm:$0xff]  ;;  %v1361_v59 = vld [vmem:[%s1762_s1 + $0x1e0] sm:$0xff]  ;;  %v963_v63 = vld [vmem:[%s1763_s0 + $0x6c] sm:$0xf0] }
  0x14   :  { %744 = vmatpush.bf16.msra.mxu2 %v1320_v18  ;;  %v961_v60 = vld [vmem:[%s1763_s0 + $0x48] sm:$0xf]  ;;  %v1296_v61 = vld [vmem:[%s1763_s0 + $0x68] sm:$0xf0]  ;;  %v969_v0 = vld [vmem:[%s1763_s0 + $0x50] sm:$0xf] }
  0x15   :  { %763 = vmatpush.bf16.msra.mxu3 %v1328_v19  ;;  %v1292_v62 = vld [vmem:[%s1763_s0 + $0x4c] sm:$0xf]  ;;  %v1297_v1 = vld [vmem:[%s1763_s0 + $0x70] sm:$0xf0]  ;;  %v971_v3 = vld [vmem:[%s1763_s0 + $0x74] sm:$0xf0]  ;;  %v962_v6 = vor.u32 %v1296_v61, %v961_v60 }
  0x16   :  { %707 = vmatpush.bf16.msra.mxu0 %v1303_v20  ;;  %v1293_v2 = vld [vmem:[%s1763_s0 + $0x54] sm:$0xf]  ;;  %v1336_v4 = vld [vmem:[%s1762_s1 + $0x118] sm:$0xff]  ;;  %v966_v7 = vor.u32 %v1292_v62, %v963_v63  ;;  %v970_v8 = vor.u32 %v1297_v1, %v969_v0  ;;  %v1334_v16 = vld [vmem:[%s1762_s1 + $0x108] sm:$0xff] }
  0x17   :  { %726 = vmatpush.bf16.msra.mxu1 %v1311_v21  ;;  %v1344_v5 = vld [vmem:[%s1762_s1 + $0x158] sm:$0xff]  ;;  %v974_v9 = vor.u32 %v1293_v2, %v971_v3  ;;  %v1335_v12 = vld [vmem:[%s1762_s1 + $0x110] sm:$0xff]  ;;  %v1342_v17 = vld [vmem:[%s1762_s1 + $0x148] sm:$0xff] }
  0x18   :  { %745 = vmatpush.bf16.msra.mxu2 %v1319_v22  ;;  %v1352_v10 = vld [vmem:[%s1762_s1 + $0x198] sm:$0xff]  ;;  %v1343_v13 = vld [vmem:[%s1762_s1 + $0x150] sm:$0xff]  ;;  %v1350_v18 = vld [vmem:[%s1762_s1 + $0x188] sm:$0xff] }
  0x19   :  { %764 = vmatpush.bf16.msra.mxu3 %v1327_v23  ;;  %v1360_v11 = vld [vmem:[%s1762_s1 + $0x1d8] sm:$0xff]  ;;  %v1351_v14 = vld [vmem:[%s1762_s1 + $0x190] sm:$0xff]  ;;  %v1358_v19 = vld [vmem:[%s1762_s1 + $0x1c8] sm:$0xff] }
  0x1a   :  { %708 = vmatpush.bf16.msra.mxu0 %v1302_v24  ;;  %v1359_v15 = vld [vmem:[%s1762_s1 + $0x1d0] sm:$0xff]  ;;  %v1333_v20 = vld [vmem:[%s1762_s1 + $0x100] sm:$0xff]  ;;  %v1370_v38 = vld [vmem:[%s1762_s1 + $0x228] sm:$0xff] }
  0x1b   :  { %727 = vmatpush.bf16.msra.mxu1 %v1310_v25  ;;  %v1341_v21 = vld [vmem:[%s1762_s1 + $0x140] sm:$0xff]  ;;  %v941_v24 = vld [vmem:[%s1763_s0 + $0x10] sm:$0xf]  ;;  %v1289_v25 = vld [vmem:[%s1763_s0 + $0x30] sm:$0xf0] }
  0x1c   :  { %746 = vmatpush.bf16.msra.mxu2 %v1318_v26  ;;  %v1349_v22 = vld [vmem:[%s1762_s1 + $0x180] sm:$0xff]  ;;  %v1372_v26 = vld [vmem:[%s1762_s1 + $0x238] sm:$0xff]  ;;  %v942_v33 = vor.u32 %v1289_v25, %v941_v24  ;;  %v1371_v37 = vld [vmem:[%s1762_s1 + $0x230] sm:$0xff] }
  0x1d   :  { %765 = vmatpush.bf16.msra.mxu3 %v1326_v27  ;;  %v1357_v23 = vld [vmem:[%s1762_s1 + $0x1c0] sm:$0xff]  ;;  %v1285_v27 = vld [vmem:[%s1763_s0 + $0x14] sm:$0xf] }
  0x1e   :  { %709 = vmatpush.bf16.msra.mxu0 %v1301_v28  ;;  %v943_v28 = vld [vmem:[%s1763_s0 + $0x34] sm:$0xf0]  ;;  %v951_v32 = vld [vmem:[%s1763_s0 + $0x3c] sm:$0xf0] }
  0x1f   :  { %728 = vmatpush.bf16.msra.mxu1 %v1309_v29  ;;  %v949_v29 = vld [vmem:[%s1763_s0 + $0x18] sm:$0xf]  ;;  %v946_v34 = vor.u32 %v1285_v27, %v943_v28  ;;  %v1369_v39 = vld [vmem:[%s1762_s1 + $0x220] sm:$0xff] }
  0x20   :  { %747 = vmatpush.bf16.msra.mxu2 %v1317_v30  ;;  %v1290_v30 = vld [vmem:[%s1763_s0 + $0x38] sm:$0xf0] }
  0x21   :  { %766 = vmatpush.bf16.msra.mxu3 %v1325_v31  ;;  %710 = vmatmul.bf16.vlgmr.msra.gmra.mxu0 %v926_v42  ;;  %v1286_v31 = vld [vmem:[%s1763_s0 + $0x1c] sm:$0xf]  ;;  %v950_v35 = vor.u32 %v1290_v30, %v949_v29 }
  0x22   :  { %778 = vmatpush.bf16.msrb.mxu0 %v1340_v40  ;;  %729 = vmatmul.bf16.vlgmr.msra.gmra.mxu1 %v930_v43  ;;  %v954_v36 = vor.u32 %v1286_v31, %v951_v32  ;;  %v977_v40 = vld [vmem:[%s1763_s0 + $0x58] sm:$0xf]  ;;  %v1294_v42 = vld [vmem:[%s1763_s0 + $0x5c] sm:$0xf]  ;;  %v979_v43 = vld [vmem:[%s1763_s0 + $0x7c] sm:$0xf0] }
  0x23   :  { %797 = vmatpush.bf16.msrb.mxu1 %v1348_v41  ;;  %748 = vmatmul.bf16.vlgmr.msra.gmra.mxu2 %v934_v44  ;;  %v1298_v41 = vld [vmem:[%s1763_s0 + $0x78] sm:$0xf0]  ;;  %v985_v44 = vld [vmem:[%s1763_s0 + $0x60] sm:$0xf] }
  0x24   :  { %767 = vmatmul.bf16.vlgmr.msra.gmra.mxu3 %v938_v45  ;;  %816 = vmatpush.bf16.msrb.mxu2 %v1356_v46  ;;  %v1299_v45 = vld [vmem:[%s1763_s0 + $0x80] sm:$0xf0]  ;;  %v1368_v46 = vld [vmem:[%s1762_s1 + $0x218] sm:$0xff] }
  0x25   :  { %835 = vmatpush.bf16.msrb.mxu3 %v1364_v47  ;;  %v1295_v47 = vld [vmem:[%s1763_s0 + $0x64] sm:$0xf] }
  0x26   :  { %779 = vmatpush.bf16.msrb.mxu0 %v1339_v48  ;;  %v987_v48 = vld [vmem:[%s1763_s0 + $0x84] sm:$0xf0] }
  0x27   :  { %798 = vmatpush.bf16.msrb.mxu1 %v1347_v49  ;;  %v978_v49 = vor.u32 %v1298_v41, %v977_v40 }
  0x28   :  { %817 = vmatpush.bf16.msrb.mxu2 %v1355_v50  ;;  %v982_v50 = vor.u32 %v1294_v42, %v979_v43 }
  0x29   :  { %836 = vmatpush.bf16.msrb.mxu3 %v1363_v51  ;;  %v986_v51 = vor.u32 %v1299_v45, %v985_v44 }
  0x2a   :  { %780 = vmatpush.bf16.msrb.mxu0 %v1338_v52  ;;  %v990_v52 = vor.u32 %v1295_v47, %v987_v48 }
  0x2b   :  { %799 = vmatpush.bf16.msrb.mxu1 %v1346_v53  ;;  %v1367_v53 = vld [vmem:[%s1762_s1 + $0x210] sm:$0xff] }
  0x2c   :  { %818 = vmatpush.bf16.msrb.mxu2 %v1354_v54  ;;  %v1366_v54 = vld [vmem:[%s1762_s1 + $0x208] sm:$0xff] }
  0x2d   :  { %837 = vmatpush.bf16.msrb.mxu3 %v1362_v55  ;;  %v1365_v55 = vld [vmem:[%s1762_s1 + $0x200] sm:$0xff] }
  0x2e   :  { %781 = vmatpush.bf16.msrb.mxu0 %v1337_v56  ;;  %v957_v56 = vld [vmem:[%s1763_s0 + $0x20] sm:$0xf] }
  0x2f   :  { %800 = vmatpush.bf16.msrb.mxu1 %v1345_v57  ;;  %v1291_v57 = vld [vmem:[%s1763_s0 + $0x40] sm:$0xf0] }
  0x30   :  { %819 = vmatpush.bf16.msrb.mxu2 %v1353_v58  ;;  %v993_v58 = vld [vmem:[%s1763_s0 + $0x68] sm:$0xf]  ;;  %v958_v60 = vor.u32 %v1291_v57, %v957_v56 }
  0x31   :  { %838 = vmatpush.bf16.msrb.mxu3 %v1361_v59  ;;  %715 = vmatmul.bf16.gmra.mxu0 %v962_v6  ;;  %v1300_v59 = vld [vmem:[%s1763_s0 + $0x88] sm:$0xf0] }
  0x32   :  { %782 = vmatpush.bf16.msrb.mxu0 %v1336_v4  ;;  %734 = vmatmul.bf16.gmra.mxu1 %v966_v7  ;;  %v994_v61 = vor.u32 %v1300_v59, %v993_v58 }
  0x33   :  { %801 = vmatpush.bf16.msrb.mxu1 %v1344_v5  ;;  %753 = vmatmul.bf16.gmra.mxu2 %v970_v8 }
  0x34   :  { %772 = vmatmul.bf16.gmra.mxu3 %v974_v9  ;;  %820 = vmatpush.bf16.msrb.mxu2 %v1352_v10 }
  0x35   :  { %839 = vmatpush.bf16.msrb.mxu3 %v1360_v11 }
  0x36   :  { %783 = vmatpush.bf16.msrb.mxu0 %v1335_v12 }
  0x37   :  { %802 = vmatpush.bf16.msrb.mxu1 %v1343_v13 }
  0x38   :  { %821 = vmatpush.bf16.msrb.mxu2 %v1351_v14 }
  0x39   :  { %840 = vmatpush.bf16.msrb.mxu3 %v1359_v15 }
  0x3a   :  { %784 = vmatpush.bf16.msrb.mxu0 %v1334_v16 }
  0x3b   :  { %803 = vmatpush.bf16.msrb.mxu1 %v1342_v17 }
  0x3c   :  { %822 = vmatpush.bf16.msrb.mxu2 %v1350_v18 }
  0x3d   :  { %841 = vmatpush.bf16.msrb.mxu3 %v1358_v19 }
  0x3e   :  { %785 = vmatpush.bf16.msrb.mxu0 %v1333_v20 }
  0x3f   :  { %804 = vmatpush.bf16.msrb.mxu1 %v1341_v21 }
  0x40   :  { %823 = vmatpush.bf16.msrb.mxu2 %v1349_v22  ;;  %v1382_v22 = vmov 0.0  }
  0x41   :  { %842 = vmatpush.bf16.msrb.mxu3 %v1357_v23  ;;  %786 = vmatmul.bf16.vlgmr.msrb.gmra.mxu0 %v942_v33  ;;  %881 = vst [vmem:[%s1764_s3] sm:$0x1] %v1382_v22 }
  0x42   :  { %854 = vmatpush.bf16.msra.mxu0 %v1372_v26  ;;  %805 = vmatmul.bf16.vlgmr.msrb.gmra.mxu1 %v946_v34  ;;  %882 = vst [vmem:[%s1765_s4] sm:$0x1] %v1382_v22 }
  0x43   :  { %1373 = vmatpush.bf16.msra.mxu1 %v1372_v26  ;;  %824 = vmatmul.bf16.vlgmr.msrb.gmra.mxu2 %v950_v35 }
  0x44   :  { %843 = vmatmul.bf16.vlgmr.msrb.gmra.mxu3 %v954_v36 }
  0x46   :  { %855 = vmatpush.bf16.msra.mxu0 %v1371_v37 }
  0x47   :  { %1374 = vmatpush.bf16.msra.mxu1 %v1371_v37 }
  0x48   :  { %v883_v22 = vld [vmem:[%s1764_s3] sm:$0x1] }
  0x4a   :  { %856 = vmatpush.bf16.msra.mxu0 %v1370_v38 }
  0x4b   :  { %1375 = vmatpush.bf16.msra.mxu1 %v1370_v38 }
  0x4e   :  { %857 = vmatpush.bf16.msra.mxu0 %v1369_v39 }
  0x4f   :  { %1376 = vmatpush.bf16.msra.mxu1 %v1369_v39 }
  0x51   :  { %791 = vmatmul.bf16.gmra.mxu0 %v978_v49 }
  0x52   :  { %858 = vmatpush.bf16.msra.mxu0 %v1368_v46  ;;  %810 = vmatmul.bf16.gmra.mxu1 %v982_v50 }
  0x53   :  { %1377 = vmatpush.bf16.msra.mxu1 %v1368_v46  ;;  %829 = vmatmul.bf16.gmra.mxu2 %v986_v51 }
  0x54   :  { %848 = vmatmul.bf16.gmra.mxu3 %v990_v52 }
  0x56   :  { %859 = vmatpush.bf16.msra.mxu0 %v1367_v53 }
  0x57   :  { %1378 = vmatpush.bf16.msra.mxu1 %v1367_v53 }
  0x5a   :  { %860 = vmatpush.bf16.msra.mxu0 %v1366_v54 }
  0x5b   :  { %1379 = vmatpush.bf16.msra.mxu1 %v1366_v54 }
  0x5e   :  { %861 = vmatpush.bf16.msra.mxu0 %v1365_v55 }
  0x5f   :  { %1380 = vmatpush.bf16.msra.mxu1 %v1365_v55 }
  0x61   :  { %862 = vmatmul.bf16.vlgmr.msra.gmra.mxu0 %v958_v60 }
  0x62   :  { %867 = vmatmul.bf16.vlgmr.msra.gmra.mxu1 %v994_v61 }
  0x9e   :  { %v711_v62 = vpop.f32.mrf.mxu0 }
  0x9f   :  { %v730_v63 = vpop.f32.mrf.mxu1 }
  0xa0   :  { %v731_v20 = vadd.f32 %v730_v63, %v711_v62 }
  0xa6   :  { %v749_v0 = vpop.f32.mrf.mxu2  ;;  %v713_v2 = vpop.f32.mrf.mxu0 }
  0xa7   :  { %v768_v1 = vpop.f32.mrf.mxu3  ;;  %v732_v3 = vpop.f32.mrf.mxu1  ;;  %v750_v23 = vadd.f32 %v749_v0, %v731_v20 }
  0xa8   :  { %v733_v31 = vadd.f32 %v732_v3, %v713_v2 }
  0xa9   :  { %v769_v29 = vadd.f32 %v768_v1, %v750_v23 }
  0xae   :  { %v751_v4 = vpop.f32.mrf.mxu2  ;;  %v716_v6 = vpop.f32.mrf.mxu0 }
  0xaf   :  { %v770_v5 = vpop.f32.mrf.mxu3  ;;  %v735_v7 = vpop.f32.mrf.mxu1  ;;  %v752_v35 = vadd.f32 %v751_v4, %v733_v31 }
  0xb0   :  { %v736_v21 = vadd.f32 %v735_v7, %v716_v6 }
  0xb1   :  { %v771_v43 = vadd.f32 %v770_v5, %v752_v35 }
  0xb6   :  { %v754_v8 = vpop.f32.mrf.mxu2  ;;  %v718_v10 = vpop.f32.mrf.mxu0 }
  0xb7   :  { %v773_v9 = vpop.f32.mrf.mxu3  ;;  %v737_v11 = vpop.f32.mrf.mxu1  ;;  %v755_v24 = vadd.f32 %v754_v8, %v736_v21 }
  0xb8   :  { %v738_v32 = vadd.f32 %v737_v11, %v718_v10 }
  0xb9   :  { %v774_v30 = vadd.f32 %v773_v9, %v755_v24 }
  0xbe   :  { %v756_v12 = vpop.f32.mrf.mxu2  ;;  %v787_v14 = vpop.f32.mrf.mxu0 }
  0xbf   :  { %v775_v13 = vpop.f32.mrf.mxu3  ;;  %v806_v15 = vpop.f32.mrf.mxu1  ;;  %v788_v33 = vadd.f32 %v787_v14, %v769_v29  ;;  %v757_v36 = vadd.f32 %v756_v12, %v738_v32 }
  0xc1   :  { %v807_v40 = vadd.f32 %v806_v15, %v788_v33  ;;  %v776_v44 = vadd.f32 %v775_v13, %v757_v36 }
  0xc6   :  { %v825_v16 = vpop.f32.mrf.mxu2  ;;  %v789_v18 = vpop.f32.mrf.mxu0 }
  0xc7   :  { %v844_v17 = vpop.f32.mrf.mxu3  ;;  %v808_v19 = vpop.f32.mrf.mxu1  ;;  %v826_v45 = vadd.f32 %v825_v16, %v807_v40  ;;  %v790_v47 = vadd.f32 %v789_v18, %v771_v43 }
  0xc9   :  { %v845_v49 = vadd.f32 %v844_v17, %v826_v45  ;;  %v809_v54 = vadd.f32 %v808_v19, %v790_v47 }
  0xce   :  { %v827_v25 = vpop.f32.mrf.mxu2  ;;  %v792_v27 = vpop.f32.mrf.mxu0 }
  0xcf   :  { %v846_v26 = vpop.f32.mrf.mxu3  ;;  %v811_v28 = vpop.f32.mrf.mxu1  ;;  %v793_v34 = vadd.f32 %v792_v27, %v774_v30  ;;  %v828_v58 = vadd.f32 %v827_v25, %v809_v54  ;;  %v895_v25 = vld [vmem:[%s1765_s4] sm:$0x1] }
  0xd1   :  { %v812_v41 = vadd.f32 %v811_v28, %v793_v34  ;;  %v847_v61 = vadd.f32 %v846_v26, %v828_v58 }
  0xd6   :  { %v830_v37 = vpop.f32.mrf.mxu2  ;;  %v794_v38 = vpop.f32.mrf.mxu0 }
  0xd7   :  { %v813_v39 = vpop.f32.mrf.mxu1  ;;  %v849_v42 = vpop.f32.mrf.mxu3  ;;  %v831_v46 = vadd.f32 %v830_v37, %v812_v41  ;;  %v795_v48 = vadd.f32 %v794_v38, %v776_v44 }
  0xd9   :  { %v850_v50 = vadd.f32 %v849_v42, %v831_v46  ;;  %v814_v55 = vadd.f32 %v813_v39, %v795_v48 }
  0xde   :  { %v832_v51 = vpop.f32.mrf.mxu2  ;;  %v863_v52 = vpop.f32.mrf.mxu0 }
  0xdf   :  { %v868_v53 = vpop.f32.mrf.mxu1  ;;  %v864_v56 = vadd.f32 %v863_v52, %v845_v49  ;;  %v833_v59 = vadd.f32 %v832_v51, %v814_v55  ;;  %v851_v60 = vpop.f32.mrf.mxu3 }
  0xe0   :  { %v869_v57 = vadd.f32 %v868_v53, %v850_v50 }
  0xe1   :  { %873 = vst [vmem:[%s1766_s2] sm:$0xff] %v864_v56  ;;  %v852_v62 = vadd.f32 %v851_v60, %v833_v59  ;;  %v896_v3 = vmul.f32 %v864_v56, %v864_v56 }
  0xe2   :  { %875 = vst [vmem:[%s1766_s2 + $0x10] sm:$0xff] %v869_v57  ;;  %v898_v6 = vmul.f32 %v869_v57, %v869_v57 }
  0xe6   :  { %v865_v63 = vpop.f32.mrf.mxu0 }
  0xe7   :  { %v870_v0 = vpop.f32.mrf.mxu1  ;;  %v866_v1 = vadd.f32 %v865_v63, %v847_v61 }
  0xe8   :  { %v871_v2 = vadd.f32 %v870_v0, %v852_v62 }
  0xe9   :  { %874 = vst [vmem:[%s1766_s2 + $0x8] sm:$0xff] %v866_v1  ;;  %v884_v4 = vadd.f32 %v866_v1, %v864_v56  ;;  %v897_v5 = vmul.f32 %v866_v1, %v866_v1 }
  0xea   :  { %876 = vst [vmem:[%s1766_s2 + $0x18] sm:$0xff] %v871_v2  ;;  %v899_v10 = vmul.f32 %v871_v2, %v871_v2 }
  0xeb   :  { %v900_v7 = vadd.f32 %v897_v5, %v896_v3  ;;  %v885_v8 = vadd.f32 %v884_v4, %v869_v57 }
  0xed   :  { %v886_v9 = vadd.f32 %v885_v8, %v871_v2  ;;  %v901_v11 = vadd.f32 %v900_v7, %v898_v6 }
  0xef   :  { %v887_v12 = vrot.slane %v886_v9, 4  ;;  %v902_v13 = vadd.f32 %v901_v11, %v899_v10 }
  0xf1   :  { %v888_v14 = vadd.f32 %v887_v12, %v886_v9  ;;  %v903_v15 = vrot.slane %v902_v13, 4 }
  0xf3   :  { %v889_v16 = vrot.slane %v888_v14, 2  ;;  %v904_v17 = vadd.f32 %v903_v15, %v902_v13 }
  0xf5   :  { %v890_v18 = vadd.f32 %v889_v16, %v888_v14  ;;  %v905_v19 = vrot.slane %v904_v17, 2 }
  0xf7   :  { %v891_v20 = vrot.slane %v890_v18, 1  ;;  %v906_v21 = vadd.f32 %v905_v19, %v904_v17 }
  0xf9   :  { %v892_v23 = vadd.f32 %v891_v20, %v890_v18  ;;  %v907_v24 = vrot.slane %v906_v21, 1 }
  0xfb   :  { %v893_v26 = vadd.f32 %v892_v23, %v883_v22  ;;  %v908_v27 = vadd.f32 %v907_v24, %v906_v21 }
  0xfd   :  { %894 = vst [vmem:[%s1764_s3] sm:$0x1] %v893_v26  ;;  %v909_v28 = vadd.f32 %v908_v27, %v895_v25 }
  0xff   :  { %910 = vst [vmem:[%s1765_s4] sm:$0x1] %v909_v28 }

// kernel: _lambda_.31
= control target key start
LH: loop header
LB: loop body
LE: loop exit
PB: predicated region body
PF: predicated region fallthrough
CT: control target
= control target key end

     0   :  { %s175_s0 = inlined_call_operand.vmem [shape: f32[32,128], index: 0, kind: input, shape index: {}]   ;;  %s176_s1 = inlined_call_operand.vmem [shape: f32[1,128], index: 1, kind: input, shape index: {}]   ;;  %s177_s2 = inlined_call_operand.vmem [shape: f32[1,128], index: 2, kind: input, shape index: {}]   ;;  %s178_s3 = inlined_call_operand.vmem [shape: f32[32,128], index: 3, kind: input, shape index: {}]   ;;  %s179_s4 = inlined_call_operand.vmem [shape: f32[1,128], index: 4, kind: input, shape index: {}]   ;;  %s180_s5 = inlined_call_operand.vmem [shape: f32[1,128], index: 5, kind: input, shape index: {}]   ;;  %s181_s6 = inlined_call_operand.vmem [shape: bf16[32,128], index: 6, kind: output, shape index: {}]  }
   0x1   :  { %v23_v0 = vld [vmem:[%s175_s0] sm:$0xff]  ;;  %v24_v1 = vld [vmem:[%s175_s0 + $0x8] sm:$0xff]  ;;  %v25_v10 = vld [vmem:[%s175_s0 + $0x10] sm:$0xff] }
   0x2   :  { %v94_v2 = vld [vmem:[%s176_s1] ss:$0 sm:$0xff]  ;;  %v44_v5 = vld [vmem:[%s178_s3 + $0x8] sm:$0xff]  ;;  %v26_v11 = vld [vmem:[%s175_s0 + $0x18] sm:$0xff] }
   0x3   :  { %v95_v3 = vld [vmem:[%s177_s2] ss:$0 sm:$0xff]  ;;  %v31_v6 = vmul.f32 %v94_v2, %v23_v0  ;;  %v32_v7 = vmul.f32 %v94_v2, %v24_v1  ;;  %v45_v12 = vld [vmem:[%s178_s3 + $0x10] sm:$0xff]  ;;  %v46_v17 = vld [vmem:[%s178_s3 + $0x18] sm:$0xff]  ;;  %v33_v18 = vmul.f32 %v94_v2, %v25_v10  ;;  %v34_v19 = vmul.f32 %v94_v2, %v26_v11 }
   0x4   :  { %v43_v4 = vld [vmem:[%s178_s3] sm:$0xff] }
   0x5   :  { %v96_v8 = vld [vmem:[%s179_s4] ss:$0 sm:$0xff]  ;;  %v39_v13 = vadd.f32 %v95_v3, %v31_v6  ;;  %v40_v14 = vadd.f32 %v95_v3, %v32_v7  ;;  %v41_v24 = vadd.f32 %v95_v3, %v33_v18  ;;  %v42_v25 = vadd.f32 %v95_v3, %v34_v19 }
   0x6   :  { %v97_v9 = vld [vmem:[%s180_s5] ss:$0 sm:$0xff]  ;;  %v51_v15 = vmul.f32 %v96_v8, %v43_v4  ;;  %v52_v16 = vmul.f32 %v96_v8, %v44_v5  ;;  %v53_v20 = vmul.f32 %v96_v8, %v45_v12  ;;  %v54_v21 = vmul.f32 %v96_v8, %v46_v17 }
   0x8   :  { %v59_v22 = vadd.f32 %v97_v9, %v51_v15  ;;  %v60_v23 = vadd.f32 %v97_v9, %v52_v16  ;;  %v61_v26 = vadd.f32 %v97_v9, %v53_v20  ;;  %v62_v27 = vadd.f32 %v97_v9, %v54_v21 }
   0xa   :  { %v63_v28 = vadd.f32 %v59_v22, %v39_v13  ;;  %v64_v29 = vadd.f32 %v60_v23, %v40_v14  ;;  %v65_v30 = vadd.f32 %v61_v26, %v41_v24  ;;  %v66_v31 = vadd.f32 %v62_v27, %v42_v25 }
   0xc   :  { %v67_v32 = vmax.f32 %v63_v28, 0.0  ;;  %v68_v33 = vmax.f32 %v64_v29, 0.0  ;;  %v69_v34 = vmax.f32 %v65_v30, 0.0  ;;  %v70_v35 = vmax.f32 %v66_v31, 0.0 }
   0xe   :  { %v86_v36 = vpack.c.bf16 %v68_v33, %v67_v32  ;;  %v91_v37 = vpack.c.bf16 %v70_v35, %v69_v34 }
  0x10   :  { %87 = vst [vmem:[%s181_s6] sm:$0xff] %v86_v36  }
  0x11   :  { %93 = vst [vmem:[%s181_s6 + $0x8] sm:$0xff] %v91_v37  }

// kernel: _lambda_.33
= control target key start
LH: loop header
LB: loop body
LE: loop exit
PB: predicated region body
PF: predicated region fallthrough
CT: control target
= control target key end

     0   :  { %s66_s0 = inlined_call_operand.vmem [shape: f32[8,128], index: 0, kind: input, shape index: {}]   ;;  %s67_s1 = inlined_call_operand.vmem [shape: f32[1,128], index: 1, kind: input, shape index: {}]   ;;  %s68_s2 = inlined_call_operand.vmem [shape: f32[1,128], index: 2, kind: input, shape index: {}]   ;;  %s69_s3 = inlined_call_operand.vmem [shape: bf16[8,128], index: 3, kind: output, shape index: {}]  }
   0x1   :  { %v14_v0 = vld [vmem:[%s66_s0] sm:$0xff] }
   0x2   :  { %v32_v1 = vld [vmem:[%s67_s1] ss:$0 sm:$0xff] }
   0x3   :  { %v33_v2 = vld [vmem:[%s68_s2] ss:$0 sm:$0xff]  ;;  %v19_v3 = vmul.f32 %v32_v1, %v14_v0 }
   0x5   :  { %v24_v4 = vadd.f32 %v33_v2, %v19_v3 }
   0x7   :  { %v25_v5 = vmax.f32 %v24_v4, 0.0 }
   0x9   :  { %v26_v6 = vpack.c.bf16 %v25_v5, %v25_v5 }
   0xb   :  { %27 = vst [vmem:[%s69_s3] sm:$0xf] %v26_v6 }

// kernel: _lambda_.32
= control target key start
LH: loop header
LB: loop body
LE: loop exit
PB: predicated region body
PF: predicated region fallthrough
CT: control target
= control target key end

     0   :  { %s1421_s1 = inlined_call_operand.vmem [shape: bf16[1152,128], index: 1, kind: input, shape index: {}]   ;;  %s1422_s0 = inlined_call_operand.vmem [shape: bf16[8,1152], index: 0, kind: input, shape index: {}]   ;;  %s1423_s3 = inlined_call_operand.vmem [shape: f32[1,128], index: 3, kind: output, shape index: {1}]   ;;  %s1424_s4 = inlined_call_operand.vmem [shape: f32[1,128], index: 4, kind: output, shape index: {2}]   ;;  %s1425_s2 = inlined_call_operand.vmem [shape: f32[8,128], index: 2, kind: output, shape index: {0}]  }
   0x1   :  { %v1077_v0 = vld [vmem:[%s1421_s1 + $0x38] sm:$0xff]  ;;  %v1076_v4 = vld [vmem:[%s1421_s1 + $0x30] sm:$0xff]  ;;  %v1075_v8 = vld [vmem:[%s1421_s1 + $0x28] sm:$0xff] }
   0x2   :  { %v1093_v1 = vld [vmem:[%s1421_s1 + $0xb8] sm:$0xff]  ;;  %627 = vmatpush.bf16.msra.mxu0 %v1077_v0  ;;  %v1092_v5 = vld [vmem:[%s1421_s1 + $0xb0] sm:$0xff]  ;;  %v1091_v9 = vld [vmem:[%s1421_s1 + $0xa8] sm:$0xff] }
   0x3   :  { %v1101_v2 = vld [vmem:[%s1421_s1 + $0xf8] sm:$0xff]  ;;  %653 = vmatpush.bf16.msra.mxu2 %v1093_v1  ;;  %v1100_v6 = vld [vmem:[%s1421_s1 + $0xf0] sm:$0xff]  ;;  %v1099_v10 = vld [vmem:[%s1421_s1 + $0xe8] sm:$0xff] }
   0x4   :  { %v1085_v3 = vld [vmem:[%s1421_s1 + $0x78] sm:$0xff]  ;;  %666 = vmatpush.bf16.msra.mxu3 %v1101_v2  ;;  %v1084_v7 = vld [vmem:[%s1421_s1 + $0x70] sm:$0xff]  ;;  %v1083_v11 = vld [vmem:[%s1421_s1 + $0x68] sm:$0xff] }
   0x5   :  { %640 = vmatpush.bf16.msra.mxu1 %v1085_v3  ;;  %v1074_v12 = vld [vmem:[%s1421_s1 + $0x20] sm:$0xff]  ;;  %v1073_v16 = vld [vmem:[%s1421_s1 + $0x18] sm:$0xff]  ;;  %v1072_v20 = vld [vmem:[%s1421_s1 + $0x10] sm:$0xff] }
   0x6   :  { %628 = vmatpush.bf16.msra.mxu0 %v1076_v4  ;;  %v1090_v13 = vld [vmem:[%s1421_s1 + $0xa0] sm:$0xff]  ;;  %v1089_v17 = vld [vmem:[%s1421_s1 + $0x98] sm:$0xff]  ;;  %v1088_v21 = vld [vmem:[%s1421_s1 + $0x90] sm:$0xff] }
   0x7   :  { %654 = vmatpush.bf16.msra.mxu2 %v1092_v5  ;;  %v1098_v14 = vld [vmem:[%s1421_s1 + $0xe0] sm:$0xff]  ;;  %v1097_v18 = vld [vmem:[%s1421_s1 + $0xd8] sm:$0xff]  ;;  %v1096_v22 = vld [vmem:[%s1421_s1 + $0xd0] sm:$0xff] }
   0x8   :  { %667 = vmatpush.bf16.msra.mxu3 %v1100_v6  ;;  %v1082_v15 = vld [vmem:[%s1421_s1 + $0x60] sm:$0xff]  ;;  %v1081_v19 = vld [vmem:[%s1421_s1 + $0x58] sm:$0xff]  ;;  %v1080_v23 = vld [vmem:[%s1421_s1 + $0x50] sm:$0xff] }
   0x9   :  { %641 = vmatpush.bf16.msra.mxu1 %v1084_v7  ;;  %v1071_v24 = vld [vmem:[%s1421_s1 + $0x8] sm:$0xff]  ;;  %v14_v29 = vld [vmem:[%s1422_s0] sm:$0xff]  ;;  %v1109_v34 = vld [vmem:[%s1421_s1 + $0x138] sm:$0xff] }
   0xa   :  { %629 = vmatpush.bf16.msra.mxu0 %v1075_v8  ;;  %v1087_v25 = vld [vmem:[%s1421_s1 + $0x88] sm:$0xff]  ;;  %v1070_v30 = vld [vmem:[%s1421_s1] sm:$0xff]  ;;  %v168_v33 = vunpack.c.l.b16 %v14_v29  ;;  %v1125_v35 = vld [vmem:[%s1421_s1 + $0x1b8] sm:$0xff]  ;;  %v169_v39 = vunpack.c.h.b16 %v14_v29 }
   0xb   :  { %655 = vmatpush.bf16.msra.mxu2 %v1091_v9  ;;  %v1095_v26 = vld [vmem:[%s1421_s1 + $0xc8] sm:$0xff]  ;;  %v1086_v31 = vld [vmem:[%s1421_s1 + $0x80] sm:$0xff]  ;;  %v1133_v40 = vld [vmem:[%s1421_s1 + $0x1f8] sm:$0xff] }
   0xc   :  { %668 = vmatpush.bf16.msra.mxu3 %v1099_v10  ;;  %v1079_v27 = vld [vmem:[%s1421_s1 + $0x48] sm:$0xff]  ;;  %v1094_v36 = vld [vmem:[%s1421_s1 + $0xc0] sm:$0xff]  ;;  %v1117_v41 = vld [vmem:[%s1421_s1 + $0x178] sm:$0xff]  ;;  %v177_v43 = vpack.c.b16 %v168_v33, %v168_v33  ;;  %v178_v47 = vpack.c.b16 %v169_v39, %v169_v39 }
   0xd   :  { %642 = vmatpush.bf16.msra.mxu1 %v1083_v11  ;;  %v15_v28 = vld [vmem:[%s1422_s0 + $0x8] sm:$0xff]  ;;  %v1078_v37 = vld [vmem:[%s1421_s1 + $0x40] sm:$0xff]  ;;  %v1108_v44 = vld [vmem:[%s1421_s1 + $0x130] sm:$0xff] }
   0xe   :  { %630 = vmatpush.bf16.msra.mxu0 %v1074_v12  ;;  %v170_v32 = vunpack.c.l.b16 %v15_v28  ;;  %v171_v38 = vunpack.c.h.b16 %v15_v28  ;;  %v1124_v45 = vld [vmem:[%s1421_s1 + $0x1b0] sm:$0xff]  ;;  %v1107_v50 = vld [vmem:[%s1421_s1 + $0x128] sm:$0xff]  ;;  %v1106_v54 = vld [vmem:[%s1421_s1 + $0x120] sm:$0xff] }
   0xf   :  { %656 = vmatpush.bf16.msra.mxu2 %v1090_v13  ;;  %v1132_v48 = vld [vmem:[%s1421_s1 + $0x1f0] sm:$0xff]  ;;  %v1123_v51 = vld [vmem:[%s1421_s1 + $0x1a8] sm:$0xff]  ;;  %v1122_v55 = vld [vmem:[%s1421_s1 + $0x1a0] sm:$0xff] }
  0x10   :  { %669 = vmatpush.bf16.msra.mxu3 %v1098_v14  ;;  %v179_v42 = vpack.c.b16 %v170_v32, %v170_v32  ;;  %v180_v46 = vpack.c.b16 %v171_v38, %v171_v38  ;;  %v1116_v49 = vld [vmem:[%s1421_s1 + $0x170] sm:$0xff]  ;;  %v1131_v52 = vld [vmem:[%s1421_s1 + $0x1e8] sm:$0xff]  ;;  %v1130_v56 = vld [vmem:[%s1421_s1 + $0x1e0] sm:$0xff] }
  0x11   :  { %643 = vmatpush.bf16.msra.mxu1 %v1082_v15  ;;  %v1115_v53 = vld [vmem:[%s1421_s1 + $0x168] sm:$0xff]  ;;  %v1114_v57 = vld [vmem:[%s1421_s1 + $0x160] sm:$0xff]  ;;  %v1105_v58 = vld [vmem:[%s1421_s1 + $0x118] sm:$0xff] }
  0x12   :  { %631 = vmatpush.bf16.msra.mxu0 %v1073_v16  ;;  %v1121_v59 = vld [vmem:[%s1421_s1 + $0x198] sm:$0xff]  ;;  %v1104_v62 = vld [vmem:[%s1421_s1 + $0x110] sm:$0xff]  ;;  %v1103_v2 = vld [vmem:[%s1421_s1 + $0x108] sm:$0xff] }
  0x13   :  { %657 = vmatpush.bf16.msra.mxu2 %v1089_v17  ;;  %v1129_v60 = vld [vmem:[%s1421_s1 + $0x1d8] sm:$0xff]  ;;  %v1120_v63 = vld [vmem:[%s1421_s1 + $0x190] sm:$0xff]  ;;  %v1119_v3 = vld [vmem:[%s1421_s1 + $0x188] sm:$0xff] }
  0x14   :  { %670 = vmatpush.bf16.msra.mxu3 %v1097_v18  ;;  %v1113_v61 = vld [vmem:[%s1421_s1 + $0x158] sm:$0xff]  ;;  %v1128_v0 = vld [vmem:[%s1421_s1 + $0x1d0] sm:$0xff]  ;;  %v1127_v6 = vld [vmem:[%s1421_s1 + $0x1c8] sm:$0xff] }
  0x15   :  { %644 = vmatpush.bf16.msra.mxu1 %v1081_v19  ;;  %v1112_v1 = vld [vmem:[%s1421_s1 + $0x150] sm:$0xff]  ;;  %v17_v4 = vld [vmem:[%s1422_s0 + $0x18] sm:$0xff]  ;;  %v1111_v7 = vld [vmem:[%s1421_s1 + $0x148] sm:$0xff] }
  0x16   :  { %632 = vmatpush.bf16.msra.mxu0 %v1072_v20  ;;  %v16_v5 = vld [vmem:[%s1422_s0 + $0x10] sm:$0xff]  ;;  %v174_v8 = vunpack.c.l.b16 %v17_v4  ;;  %v1102_v10 = vld [vmem:[%s1421_s1 + $0x100] sm:$0xff]  ;;  %v1141_v12 = vld [vmem:[%s1421_s1 + $0x238] sm:$0xff]  ;;  %v175_v13 = vunpack.c.h.b16 %v17_v4 }
  0x17   :  { %658 = vmatpush.bf16.msra.mxu2 %v1088_v21  ;;  %v172_v9 = vunpack.c.l.b16 %v16_v5  ;;  %v1118_v11 = vld [vmem:[%s1421_s1 + $0x180] sm:$0xff]  ;;  %v173_v16 = vunpack.c.h.b16 %v16_v5  ;;  %v1140_v19 = vld [vmem:[%s1421_s1 + $0x230] sm:$0xff] }
  0x18   :  { %671 = vmatpush.bf16.msra.mxu3 %v1096_v22  ;;  %v1126_v14 = vld [vmem:[%s1421_s1 + $0x1c0] sm:$0xff]  ;;  %v183_v17 = vpack.c.b16 %v174_v8, %v174_v8  ;;  %v184_v20 = vpack.c.b16 %v175_v13, %v175_v13  ;;  %v1139_v22 = vld [vmem:[%s1421_s1 + $0x228] sm:$0xff] }
  0x19   :  { %645 = vmatpush.bf16.msra.mxu1 %v1080_v23  ;;  %v1110_v15 = vld [vmem:[%s1421_s1 + $0x140] sm:$0xff]  ;;  %v181_v18 = vpack.c.b16 %v172_v9, %v172_v9  ;;  %v182_v21 = vpack.c.b16 %v173_v16, %v173_v16 }
  0x1a   :  { %633 = vmatpush.bf16.msra.mxu0 %v1071_v24  ;;  %v1138_v23 = vld [vmem:[%s1421_s1 + $0x220] sm:$0xff]  ;;  %v1137_v24 = vld [vmem:[%s1421_s1 + $0x218] sm:$0xff] }
  0x1b   :  { %659 = vmatpush.bf16.msra.mxu2 %v1087_v25  ;;  %v1136_v25 = vld [vmem:[%s1421_s1 + $0x210] sm:$0xff]  ;;  %v1134_v29 = vld [vmem:[%s1421_s1 + $0x200] sm:$0xff] }
  0x1c   :  { %672 = vmatpush.bf16.msra.mxu3 %v1095_v26  ;;  %v1135_v26 = vld [vmem:[%s1421_s1 + $0x208] sm:$0xff] }
  0x1d   :  { %646 = vmatpush.bf16.msra.mxu1 %v1079_v27  ;;  %v18_v27 = vld [vmem:[%s1422_s0 + $0x20] sm:$0xf] }
  0x1e   :  { %634 = vmatpush.bf16.msra.mxu0 %v1070_v30  ;;  %v176_v28 = vunpack.c.l.b16 %v18_v27 }
  0x1f   :  { %660 = vmatpush.bf16.msra.mxu2 %v1086_v31 }
  0x20   :  { %673 = vmatpush.bf16.msra.mxu3 %v1094_v36  ;;  %v185_v30 = vpack.c.b16 %v176_v28, %v176_v28 }
  0x21   :  { %647 = vmatpush.bf16.msra.mxu1 %v1078_v37  ;;  %635 = vmatmul.bf16.vlgmr.msra.gmra.mxu0 %v177_v43 }
  0x22   :  { %679 = vmatpush.bf16.msrb.mxu0 %v1109_v34  ;;  %661 = vmatmul.bf16.vlgmr.msra.gmra.mxu2 %v179_v42 }
  0x23   :  { %705 = vmatpush.bf16.msrb.mxu2 %v1125_v35  ;;  %674 = vmatmul.bf16.vlgmr.msra.gmra.mxu3 %v180_v46 }
  0x24   :  { %718 = vmatpush.bf16.msrb.mxu3 %v1133_v40  ;;  %648 = vmatmul.bf16.vlgmr.msra.gmra.mxu1 %v178_v47  ;;  %v1143_v40 = vmov 0.0  }
  0x25   :  { %692 = vmatpush.bf16.msrb.mxu1 %v1117_v41  ;;  %749 = vst [vmem:[%s1423_s3] sm:$0x1] %v1143_v40 }
  0x26   :  { %680 = vmatpush.bf16.msrb.mxu0 %v1108_v44  ;;  %750 = vst [vmem:[%s1424_s4] sm:$0x1] %v1143_v40 }
  0x27   :  { %706 = vmatpush.bf16.msrb.mxu2 %v1124_v45 }
  0x28   :  { %719 = vmatpush.bf16.msrb.mxu3 %v1132_v48 }
  0x29   :  { %693 = vmatpush.bf16.msrb.mxu1 %v1116_v49 }
  0x2a   :  { %681 = vmatpush.bf16.msrb.mxu0 %v1107_v50 }
  0x2b   :  { %707 = vmatpush.bf16.msrb.mxu2 %v1123_v51 }
  0x2c   :  { %720 = vmatpush.bf16.msrb.mxu3 %v1131_v52  ;;  %v751_v4 = vld [vmem:[%s1423_s3] sm:$0x1] }
  0x2d   :  { %694 = vmatpush.bf16.msrb.mxu1 %v1115_v53 }
  0x2e   :  { %682 = vmatpush.bf16.msrb.mxu0 %v1106_v54 }
  0x2f   :  { %708 = vmatpush.bf16.msrb.mxu2 %v1122_v55 }
  0x30   :  { %721 = vmatpush.bf16.msrb.mxu3 %v1130_v56 }
  0x31   :  { %695 = vmatpush.bf16.msrb.mxu1 %v1114_v57 }
  0x32   :  { %683 = vmatpush.bf16.msrb.mxu0 %v1105_v58 }
  0x33   :  { %709 = vmatpush.bf16.msrb.mxu2 %v1121_v59 }
  0x34   :  { %722 = vmatpush.bf16.msrb.mxu3 %v1129_v60 }
  0x35   :  { %696 = vmatpush.bf16.msrb.mxu1 %v1113_v61 }
  0x36   :  { %684 = vmatpush.bf16.msrb.mxu0 %v1104_v62 }
  0x37   :  { %710 = vmatpush.bf16.msrb.mxu2 %v1120_v63 }
  0x38   :  { %723 = vmatpush.bf16.msrb.mxu3 %v1128_v0 }
  0x39   :  { %697 = vmatpush.bf16.msrb.mxu1 %v1112_v1 }
  0x3a   :  { %685 = vmatpush.bf16.msrb.mxu0 %v1103_v2 }
  0x3b   :  { %711 = vmatpush.bf16.msrb.mxu2 %v1119_v3 }
  0x3c   :  { %724 = vmatpush.bf16.msrb.mxu3 %v1127_v6 }
  0x3d   :  { %698 = vmatpush.bf16.msrb.mxu1 %v1111_v7  ;;  %v760_v7 = vld [vmem:[%s1424_s4] sm:$0x1] }
  0x3e   :  { %686 = vmatpush.bf16.msrb.mxu0 %v1102_v10 }
  0x3f   :  { %712 = vmatpush.bf16.msrb.mxu2 %v1118_v11 }
  0x40   :  { %725 = vmatpush.bf16.msrb.mxu3 %v1126_v14 }
  0x41   :  { %699 = vmatpush.bf16.msrb.mxu1 %v1110_v15  ;;  %687 = vmatmul.bf16.vlgmr.msrb.gmra.mxu0 %v181_v18 }
  0x42   :  { %731 = vmatpush.bf16.msra.mxu0 %v1141_v12  ;;  %713 = vmatmul.bf16.vlgmr.msrb.gmra.mxu2 %v183_v17 }
  0x43   :  { %726 = vmatmul.bf16.vlgmr.msrb.gmra.mxu3 %v184_v20 }
  0x44   :  { %700 = vmatmul.bf16.vlgmr.msrb.gmra.mxu1 %v182_v21 }
  0x46   :  { %732 = vmatpush.bf16.msra.mxu0 %v1140_v19 }
  0x4a   :  { %733 = vmatpush.bf16.msra.mxu0 %v1139_v22 }
  0x4e   :  { %734 = vmatpush.bf16.msra.mxu0 %v1138_v23 }
  0x52   :  { %735 = vmatpush.bf16.msra.mxu0 %v1137_v24 }
  0x56   :  { %736 = vmatpush.bf16.msra.mxu0 %v1136_v25 }
  0x5a   :  { %737 = vmatpush.bf16.msra.mxu0 %v1135_v26 }
  0x5e   :  { %738 = vmatpush.bf16.msra.mxu0 %v1134_v29 }
  0x61   :  { %739 = vmatmul.bf16.vlgmr.msra.gmra.mxu0 %v185_v30 }
  0x9e   :  { %v636_v31 = vpop.f32.mrf.mxu0 }
  0xa1   :  { %v649_v32 = vpop.f32.mrf.mxu1 }
  0xa2   :  { %v650_v42 = vadd.f32 %v649_v32, %v636_v31 }
  0xa5   :  { %v662_v33 = vpop.f32.mrf.mxu2 }
  0xa6   :  { %v675_v34 = vpop.f32.mrf.mxu3  ;;  %v638_v35 = vpop.f32.mrf.mxu0  ;;  %v663_v44 = vadd.f32 %v662_v33, %v650_v42 }
  0xa8   :  { %v676_v48 = vadd.f32 %v675_v34, %v663_v44 }
  0xa9   :  { %v651_v36 = vpop.f32.mrf.mxu1 }
  0xad   :  { %v664_v37 = vpop.f32.mrf.mxu2 }
  0xae   :  { %v677_v38 = vpop.f32.mrf.mxu3 }
  0xbe   :  { %v688_v39 = vpop.f32.mrf.mxu0 }
  0xbf   :  { %v689_v50 = vadd.f32 %v688_v39, %v676_v48 }
  0xc1   :  { %v701_v41 = vpop.f32.mrf.mxu1 }
  0xc2   :  { %v702_v52 = vadd.f32 %v701_v41, %v689_v50 }
  0xc5   :  { %v714_v43 = vpop.f32.mrf.mxu2 }
  0xc6   :  { %v727_v45 = vpop.f32.mrf.mxu3  ;;  %v690_v46 = vpop.f32.mrf.mxu0  ;;  %v715_v53 = vadd.f32 %v714_v43, %v702_v52 }
  0xc8   :  { %v728_v54 = vadd.f32 %v727_v45, %v715_v53 }
  0xc9   :  { %v703_v47 = vpop.f32.mrf.mxu1 }
  0xcd   :  { %v716_v49 = vpop.f32.mrf.mxu2 }
  0xce   :  { %v729_v51 = vpop.f32.mrf.mxu3 }
  0xde   :  { %v740_v55 = vpop.f32.mrf.mxu0 }
  0xdf   :  { %v741_v56 = vadd.f32 %v740_v55, %v728_v54 }
  0xe1   :  { %744 = vst [vmem:[%s1425_s2] sm:$0xff] %v741_v56  ;;  %v752_v57 = vrot.slane %v741_v56, 4  ;;  %v761_v58 = vmul.f32 %v741_v56, %v741_v56 }
  0xe3   :  { %v753_v59 = vadd.f32 %v752_v57, %v741_v56  ;;  %v762_v60 = vrot.slane %v761_v58, 4 }
  0xe5   :  { %v754_v61 = vrot.slane %v753_v59, 2  ;;  %v763_v62 = vadd.f32 %v762_v60, %v761_v58 }
  0xe6   :  { %v742_v63 = vpop.f32.mrf.mxu0 }
  0xe7   :  { %v755_v0 = vadd.f32 %v754_v61, %v753_v59  ;;  %v764_v1 = vrot.slane %v763_v62, 2 }
  0xe9   :  { %v756_v2 = vrot.slane %v755_v0, 1  ;;  %v765_v3 = vadd.f32 %v764_v1, %v763_v62 }
  0xeb   :  { %v757_v5 = vadd.f32 %v756_v2, %v755_v0  ;;  %v766_v6 = vrot.slane %v765_v3, 1 }
  0xed   :  { %v758_v8 = vadd.f32 %v757_v5, %v751_v4  ;;  %v767_v9 = vadd.f32 %v766_v6, %v765_v3 }
  0xef   :  { %759 = vst [vmem:[%s1423_s3] sm:$0x1] %v758_v8  ;;  %v768_v10 = vadd.f32 %v767_v9, %v760_v7 }
  0xf1   :  { %769 = vst [vmem:[%s1424_s4] sm:$0x1] %v768_v10 }

// kernel: _lambda_.35
= control target key start
LH: loop header
LB: loop body
LE: loop exit
PB: predicated region body
PF: predicated region fallthrough
CT: control target
= control target key end

     0   :  { %s113_s0 = inlined_call_operand.vmem [shape: f32[8,128], index: 0, kind: input, shape index: {}]   ;;  %s114_s1 = inlined_call_operand.vmem [shape: f32[1,128], index: 1, kind: input, shape index: {}]   ;;  %s115_s2 = inlined_call_operand.vmem [shape: f32[1,128], index: 2, kind: input, shape index: {}]   ;;  %s116_s3 = inlined_call_operand.vmem [shape: f32[8,128], index: 3, kind: input, shape index: {}]   ;;  %s117_s4 = inlined_call_operand.vmem [shape: f32[1,128], index: 4, kind: input, shape index: {}]   ;;  %s118_s5 = inlined_call_operand.vmem [shape: f32[1,128], index: 5, kind: input, shape index: {}]   ;;  %s119_s6 = inlined_call_operand.vmem [shape: bf16[8,128], index: 6, kind: output, shape index: {}]  }
   0x1   :  { %v23_v0 = vld [vmem:[%s113_s0] sm:$0xff] }
   0x2   :  { %v53_v1 = vld [vmem:[%s114_s1] ss:$0 sm:$0xff] }
   0x3   :  { %v54_v2 = vld [vmem:[%s115_s2] ss:$0 sm:$0xff]  ;;  %v28_v4 = vmul.f32 %v53_v1, %v23_v0 }
   0x4   :  { %v34_v3 = vld [vmem:[%s116_s3] sm:$0xff] }
   0x5   :  { %v55_v5 = vld [vmem:[%s117_s4] ss:$0 sm:$0xff]  ;;  %v33_v7 = vadd.f32 %v54_v2, %v28_v4 }
   0x6   :  { %v56_v6 = vld [vmem:[%s118_s5] ss:$0 sm:$0xff]  ;;  %v39_v8 = vmul.f32 %v55_v5, %v34_v3 }
   0x8   :  { %v44_v9 = vadd.f32 %v56_v6, %v39_v8 }
   0xa   :  { %v45_v10 = vadd.f32 %v44_v9, %v33_v7 }
   0xc   :  { %v46_v11 = vmax.f32 %v45_v10, 0.0 }
   0xe   :  { %v47_v12 = vpack.c.bf16 %v46_v11, %v46_v11 }
  0x10   :  { %48 = vst [vmem:[%s119_s6] sm:$0xf] %v47_v12 }

</bundles_post_ra>
